<compile_context>
chip_gen: v7x
topology: tpu7x:2x2x1
jax: 0.10.0
libtpu: 0.0.40
codegen_flags: <defaults>
</compile_context>

<pallas_src>
import math
import functools

import jax
import jax.numpy as jnp
from jax import lax
from jax.experimental import pallas as pl
from jax.experimental.pallas import tpu as pltpu


def _erf_approx(x):
    # Abramowitz & Stegun 7.1.26 rational approximation; the divide uses the
    # EUP approximate reciprocal (free slot), overall GELU accuracy ~1e-3.
    a1, a2, a3, a4, a5 = (0.254829592, -0.284496736, 1.421413741,
                          -1.453152027, 1.061405429)
    p = 0.3275911
    ax = jnp.abs(x)
    t = pl.reciprocal(1.0 + p * ax, approx=True)
    poly = ((((a5 * t + a4) * t + a3) * t + a2) * t + a1) * t
    y = 1.0 - poly * jnp.exp(-ax * ax)
    return jnp.where(x >= 0, y, -y)


def _gelu_exact(x):
    return 0.5 * x * (1.0 + _erf_approx(x * (1.0 / math.sqrt(2.0))))


def _mixffn_kernel(W, T, eps,
                   x_ref, fcw_ref, fcb_ref, dww_ref, dwb_ref,
                   g_ref, beta_ref, pww_ref, pwb_ref,
                   o_ref, h_scr, hl_scr, hr_scr):
    hid = fcw_ref.shape[1]
    n_int = T * W              # tokens produced by this strip
    n_ext = (T + 2) * W        # strip tokens + one halo row above/below

    s = pl.program_id(1)
    n_strips = pl.num_programs(1)

    # ---- fc on the halo-extended token strip: bf16 MXU, f32 accumulation ----
    x_ext = x_ref[0, 0]                                            # (n_ext, C) bf16
    h_scr[...] = (jnp.dot(x_ext, fcw_ref[...],
                          preferred_element_type=jnp.float32)
                  + fcb_ref[...])
    # drop_1 / drop_2 are nn.Identity (dropout == 0.0 in the module).

    # Halo rows outside the image (global rows -1 and H) must be zero for the
    # conv's zero padding (fc of the zero-padded row would otherwise leave
    # the fc bias there).
    @pl.when(s == 0)
    def _():
        h_scr[0:W, :] = jnp.zeros((W, hid), jnp.float32)

    @pl.when(s == n_strips - 1)
    def _():
        h_scr[n_ext - W:n_ext, :] = jnp.zeros((W, hid), jnp.float32)

    h = h_scr[...]                                                 # (n_ext, hid) f32

    # Column-boundary masks via in-kernel iota (no HBM inputs needed).
    col = lax.broadcasted_iota(jnp.int32, (n_ext, 1), 0) % W
    colL = (col > 0).astype(jnp.float32)          # 1.0 if col > 0
    colR = (col < (W - 1)).astype(jnp.float32)    # 1.0 if col < W-1

    # ---- depthwise 3x3 conv (padding=1, groups=hid) --------------------------
    # Two XLU rolls build the column-shifted copies; the dy taps are
    # sublane-aligned static row-window slices (offsets 0, W, 2W; W % 8 == 0).
    hl_scr[...] = pltpu.roll(h, shift=1, axis=0) * colL            # h[t-1] (dx=-1)
    hr_scr[...] = pltpu.roll(h, shift=n_ext - 1, axis=0) * colR    # h[t+1] (dx=+1)

    dww = dww_ref[...]                                             # (9, hid)
    acc = jnp.zeros((n_int, hid), jnp.float32) + dwb_ref[...]      # bias init
    for dy in (-1, 0, 1):
        off = (1 + dy) * W
        row = (dy + 1) * 3
        acc = acc + hl_scr[off:off + n_int, :] * dww[row + 0]      # dx = -1
        acc = acc + h_scr[off:off + n_int, :] * dww[row + 1]       # dx =  0
        acc = acc + hr_scr[off:off + n_int, :] * dww[row + 2]      # dx = +1

    # ---- LayerNorm over channels (two-pass centered variance, eps=1e-5) -----
    inv_hid = 1.0 / hid
    mean = jnp.sum(acc, axis=-1, keepdims=True) * inv_hid
    cent = acc - mean
    var = jnp.sum(cent * cent, axis=-1, keepdims=True) * inv_hid
    rstd = lax.rsqrt(var + eps)
    normed = cent * rstd * g_ref[...] + beta_ref[...]

    # ---- GELU (erf-based, matching nn.GELU default) --------------------------
    act = _gelu_exact(normed)

    # ---- 1x1 conv: (n_int, hid) @ (hid, embed_pad), bf16 MXU / f32 acc -------
    out = (jnp.dot(act.astype(jnp.bfloat16), pww_ref[...],
                   preferred_element_type=jnp.float32)
           + pwb_ref[...])
    o_ref[0] = out


def _vmem_caps():
    """(physical VMEM bytes, clamped scoped limit) for the current chip."""
    try:
        cap = int(pltpu.get_tpu_info().vmem_capacity_bytes)
    except Exception:
        cap = 64 << 20                      # conservative (v7x per-TC size)
    cap = max(cap, 16 << 20)
    return cap, int(cap * 0.85)


def _strip_vmem_bytes(T, W, C, hid, embed_pad):
    n_int = T * W
    n_ext = (T + 2) * W
    x_blk = n_ext * C * 2                   # bf16 strip
    out_blk = n_int * embed_pad * 4         # f32 out block
    scratch = 3 * n_ext * hid * 4           # h / h_left / h_right
    interm = 4 * n_int * hid * 4 + n_int * embed_pad * 4
    return 2 * (x_blk + out_blk) + scratch + interm


def _pick_strip_rows(B, H, W, C, hid, embed_pad, budget_bytes):
    """Largest strip height T that divides H, keeps (T*W) % 8 == 0 (or T == H)
    and fits the generation-aware VMEM budget; prefers >= 2 total grid steps
    when B == 1 so both v7x TensorCores get work."""
    cands = [t for t in range(1, H + 1)
             if H % t == 0 and ((t * W) % 8 == 0 or t == H)]
    fitting = [t for t in cands
               if _strip_vmem_bytes(t, W, C, hid, embed_pad) <= budget_bytes]
    if not fitting:
        return min(cands)
    if B == 1:
        multi = [t for t in fitting if (H // t) >= 2]
        if multi:
            return max(multi)
    return max(fitting)


def mix_feedforward(x_nchw, params, strip_rows=None):
    fc_w, fc_b, dw_w, dw_b, ln_g, ln_b, pw_w, pw_b = params
    B, C, H, W = x_nchw.shape
    hid = fc_w.shape[1]
    embed = pw_w.shape[1]
    HW = H * W
    embed_pad = ((embed + 127) // 128) * 128
    # TODO(synk): a 256-multiple N pad would raise MXU occupancy on v6e/v7x,
    # but padding `hid` is not free (LayerNorm stats span it), so we keep 128.

    _, vmem_cap_limit = _vmem_caps()
    w_bytes = ((C * hid + hid * embed_pad) * 2
               + (4 * hid + embed_pad) * 4 + 9 * hid * 4)
    budget = max(vmem_cap_limit - 2 * w_bytes - (6 << 20), 4 << 20)

    T = strip_rows if strip_rows is not None else _pick_strip_rows(
        B, H, W, C, hid, embed_pad, budget)
    assert H % T == 0 and ((T * W) % 8 == 0 or T == H), (H, W, T)
    S = H // T
    n_int = T * W
    n_ext = (T + 2) * W

    # Layout plumbing (plain JAX): NCHW -> token-major channel-last, one zero
    # halo row above/below the image, then overlapping row strips so the
    # kernel only ever pipelines one strip of x through VMEM.
    x_tok = jnp.transpose(x_nchw.reshape(B, C, HW), (0, 2, 1)).astype(jnp.bfloat16)
    zrow = jnp.zeros((B, W, C), jnp.bfloat16)
    x_pad = jnp.concatenate([zrow, x_tok, zrow], axis=1)             # (B,(H+2)W,C)
    x_strips = jnp.stack(
        [lax.slice_in_dim(x_pad, s * n_int, s * n_int + n_ext, axis=1)
         for s in range(S)], axis=1)                                 # (B,S,n_ext,C)

    fc_w_bf = fc_w.astype(jnp.bfloat16)
    pw_w_p = jnp.pad(pw_w, ((0, 0), (0, embed_pad - embed))).astype(jnp.bfloat16)
    pw_b_p = jnp.pad(pw_b, ((0, 0), (0, embed_pad - embed))).astype(jnp.float32)
    fc_b_f = fc_b.astype(jnp.float32)
    dw_w_f = dw_w.astype(jnp.float32)
    dw_b_f = dw_b.astype(jnp.float32)
    ln_g_f = ln_g.astype(jnp.float32)
    ln_b_f = ln_b.astype(jnp.float32)

    # VMEM limit: cover the actual working set, never exceed physical capacity.
    x_blk = n_ext * C * 2
    out_blk = n_int * embed_pad * 4
    scratch = 3 * n_ext * hid * 4
    interm = 4 * n_int * hid * 4 + n_int * embed_pad * 4
    need = 2 * (x_blk + out_blk + w_bytes) + scratch + interm + (4 << 20)
    vmem_limit = int(min(max(need, 16 << 20), vmem_cap_limit))

    flops = int(2 * B * HW * C * hid + 2 * B * HW * hid * embed_pad
                + B * HW * hid * (2 * 9 + 16))
    trans = int(3 * B * HW * hid)
    bytes_acc = int(B * S * n_ext * C * 2 + B * HW * embed_pad * 4
                    + (C * hid + hid * embed_pad) * 2
                    + (13 * hid + embed_pad) * 4)

    kernel = functools.partial(_mixffn_kernel, W, T, 1e-5)
    out_pad = pl.pallas_call(
        kernel,
        out_shape=jax.ShapeDtypeStruct((B, HW, embed_pad), jnp.float32),
        grid=(B, S),
        in_specs=[
            pl.BlockSpec((1, 1, n_ext, C), lambda b, s: (b, s, 0, 0)),  # x strip
            pl.BlockSpec((C, hid), lambda b, s: (0, 0)),                # fc weight (bf16)
            pl.BlockSpec((1, hid), lambda b, s: (0, 0)),                # fc bias
            pl.BlockSpec((9, hid), lambda b, s: (0, 0)),                # dw conv weight
            pl.BlockSpec((1, hid), lambda b, s: (0, 0)),                # dw conv bias
            pl.BlockSpec((1, hid), lambda b, s: (0, 0)),                # LN gamma
            pl.BlockSpec((1, hid), lambda b, s: (0, 0)),                # LN beta
            pl.BlockSpec((hid, embed_pad), lambda b, s: (0, 0)),        # 1x1 conv w (bf16)
            pl.BlockSpec((1, embed_pad), lambda b, s: (0, 0)),          # 1x1 conv bias
        ],
        out_specs=pl.BlockSpec((1, n_int, embed_pad), lambda b, s: (b, s, 0)),
        scratch_shapes=[pltpu.VMEM((n_ext, hid), jnp.float32)] * 3,
        compiler_params=pltpu.CompilerParams(
            dimension_semantics=("parallel", "parallel"),
            vmem_limit_bytes=vmem_limit),
        cost_estimate=pl.CostEstimate(flops=flops, transcendentals=trans,
                                      bytes_accessed=bytes_acc),
    )(x_strips, fc_w_bf, fc_b_f, dw_w_f, dw_b_f, ln_g_f, ln_b_f, pw_w_p, pw_b_p)

    out = out_pad[:, :, :embed].reshape(B, H, W, embed)
    return jnp.transpose(out, (0, 3, 1, 2))                         # NCHW


def mix_feedforward_ref(x_nchw, params, matmul_dtype=jnp.float32):
    """Pure-JAX reference mirroring the PyTorch forward (for validation).
    matmul_dtype=bf16 reproduces the kernel's MXU rounding for tight checks."""
    fc_w, fc_b, dw_w, dw_b, ln_g, ln_b, pw_w, pw_b = params
    B, C, H, W = x_nchw.shape
    hid = fc_w.shape[1]
    md = matmul_dtype
    x = jnp.transpose(x_nchw.reshape(B, C, H * W), (0, 2, 1))       # (B,HW,C)
    h = jnp.dot(x.astype(md), fc_w.astype(md),
                preferred_element_type=jnp.float32) + fc_b          # (B,HW,hid)
    h = h.reshape(B, H, W, hid)                                     # NHWC
    dw_hwio = dw_w.reshape(3, 3, 1, hid)
    conv = lax.conv_general_dilated(
        h, dw_hwio, window_strides=(1, 1), padding=((1, 1), (1, 1)),
        dimension_numbers=("NHWC", "HWIO", "NHWC"),
        feature_group_count=hid) + dw_b.reshape(1, 1, 1, hid)
    mean = conv.mean(-1, keepdims=True)
    var = ((conv - mean) ** 2).mean(-1, keepdims=True)
    n = (conv - mean) / jnp.sqrt(var + 1e-5)
    n = n * ln_g.reshape(1, 1, 1, hid) + ln_b.reshape(1, 1, 1, hid)
    g = 0.5 * n * (1.0 + lax.erf(n / jnp.sqrt(2.0)))                # exact GELU
    out = jnp.dot(g.astype(md), pw_w.astype(md),
                  preferred_element_type=jnp.float32) + pw_b        # (B,H,W,embed)
    return jnp.transpose(out, (0, 3, 1, 2))


if __name__ == "__main__":
    # TODO(synk): DropPath (stochastic depth) in training mode is not modeled;
    # with dropout=0.0 (the module's default) it is an exact identity.
    B, embed, H, W = 2, 8, 16, 16
    ratio = 2
    hid = embed * ratio

    keys = jax.random.split(jax.random.PRNGKey(0), 10)
    x = jax.random.normal(keys[0], (B, embed, H, W), jnp.float32)
    params = (
        0.2 * jax.random.normal(keys[1], (embed, hid), jnp.float32),    # fc.weight^T
        0.1 * jax.random.normal(keys[2], (1, hid), jnp.float32),        # fc.bias
        0.2 * jax.random.normal(keys[3], (9, hid), jnp.float32),        # dw conv weight
        0.1 * jax.random.normal(keys[4], (1, hid), jnp.float32),        # dw conv bias
        1.0 + 0.1 * jax.random.normal(keys[5], (1, hid), jnp.float32),  # LN gamma
        0.1 * jax.random.normal(keys[6], (1, hid), jnp.float32),        # LN beta
        0.2 * jax.random.normal(keys[7], (hid, embed), jnp.float32),    # 1x1 conv weight^T
        0.1 * jax.random.normal(keys[8], (1, embed), jnp.float32),      # 1x1 conv bias
    )

    # default (auto strip size) and a forced multi-strip run (exercises the
    # halo / pl.when / strip-streaming path).
    out = jax.block_until_ready(mix_feedforward(x, params))
    out_ms = jax.block_until_ready(mix_feedforward(x, params, strip_rows=4))

    ref_f32 = jax.block_until_ready(mix_feedforward_ref(x, params))
    ref_bf16 = jax.block_until_ready(
        mix_feedforward_ref(x, params, matmul_dtype=jnp.bfloat16))

    for o in (out, out_ms):
        assert o.shape == (B, embed, H, W), o.shape
        # like-for-like (bf16 MXU rounding in both): tight
        e_bf = float(jnp.max(jnp.abs(o - ref_bf16)))
        assert e_bf < 2e-2, f"mismatch vs bf16-matmul reference: {e_bf}"
        # against the exact f32 reference: loose (bf16 matmul inputs)
        e_32 = float(jnp.max(jnp.abs(o - ref_f32)))
        assert e_32 < 6e-2, f"mismatch vs f32 reference: {e_32}"

    print("KERNEL_OK")
</pallas_src>

<mosaic_0001>
module attributes {stable_mosaic.version = 11 : i64} {
  func.func @_mixffn_kernel(%arg0: i32, %arg1: i32, %arg2: memref<1x1x288x8xbf16, #tpu.memory_space<vmem>>, %arg3: memref<8x16xbf16, #tpu.memory_space<vmem>>, %arg4: memref<1x16xf32, #tpu.memory_space<vmem>>, %arg5: memref<9x16xf32, #tpu.memory_space<vmem>>, %arg6: memref<1x16xf32, #tpu.memory_space<vmem>>, %arg7: memref<1x16xf32, #tpu.memory_space<vmem>>, %arg8: memref<1x16xf32, #tpu.memory_space<vmem>>, %arg9: memref<16x128xbf16, #tpu.memory_space<vmem>>, %arg10: memref<1x128xf32, #tpu.memory_space<vmem>>, %arg11: memref<1x256x128xf32, #tpu.memory_space<vmem>>, %arg12: memref<288x16xf32, #tpu.memory_space<vmem>>, %arg13: memref<288x16xf32, #tpu.memory_space<vmem>>, %arg14: memref<288x16xf32, #tpu.memory_space<vmem>>) attributes {dimension_semantics = [#tpu.dimension_semantics<parallel>, #tpu.dimension_semantics<parallel>], iteration_bounds = array<i64: 2, 1>, scalar_prefetch = 0 : i64, scratch_operands = 3 : i64, tpu.core_type = #tpu.core_type<tc>, window_params = [{transform_indices = @transform_0, window_bounds = array<i64: 1, 1, 288, 8>}, {pipeline_mode = #tpu.pipeline_mode<synchronous>, transform_indices = @transform_1, window_bounds = array<i64: 8, 16>}, {pipeline_mode = #tpu.pipeline_mode<synchronous>, transform_indices = @transform_2, window_bounds = array<i64: 1, 16>}, {pipeline_mode = #tpu.pipeline_mode<synchronous>, transform_indices = @transform_3, window_bounds = array<i64: 9, 16>}, {pipeline_mode = #tpu.pipeline_mode<synchronous>, transform_indices = @transform_4, window_bounds = array<i64: 1, 16>}, {pipeline_mode = #tpu.pipeline_mode<synchronous>, transform_indices = @transform_5, window_bounds = array<i64: 1, 16>}, {pipeline_mode = #tpu.pipeline_mode<synchronous>, transform_indices = @transform_6, window_bounds = array<i64: 1, 16>}, {pipeline_mode = #tpu.pipeline_mode<synchronous>, transform_indices = @transform_7, window_bounds = array<i64: 16, 128>}, {pipeline_mode = #tpu.pipeline_mode<synchronous>, transform_indices = @transform_8, window_bounds = array<i64: 1, 128>}, {transform_indices = @transform_9, window_bounds = array<i64: 1, 256, 128>}]} {
    %c0 = arith.constant 0 : index
    %c0_0 = arith.constant 0 : index
    %c0_1 = arith.constant 0 : index
    %c0_2 = arith.constant 0 : index
    %0 = vector.load %arg2[%c0, %c0_0, %c0_1, %c0_2] : memref<1x1x288x8xbf16, #tpu.memory_space<vmem>>, vector<1x1x288x8xbf16>
    %1 = vector.shape_cast %0 : vector<1x1x288x8xbf16> to vector<288x8xbf16>
    %c0_3 = arith.constant 0 : index
    %c0_4 = arith.constant 0 : index
    %2 = vector.load %arg3[%c0_3, %c0_4] : memref<8x16xbf16, #tpu.memory_space<vmem>>, vector<8x16xbf16>
    %cst = arith.constant dense<0.000000e+00> : vector<288x16xf32>
    %3 = tpu.matmul %1, %2, %cst {dimension_numbers = #tpu.dot_dimension_numbers<[1], [0], [0], [1], [0, 0, 1, 1], [], []>} : vector<288x8xbf16>, vector<8x16xbf16>, vector<288x16xf32> -> vector<288x16xf32>
    %c0_5 = arith.constant 0 : index
    %c0_6 = arith.constant 0 : index
    %4 = vector.load %arg4[%c0_5, %c0_6] : memref<1x16xf32, #tpu.memory_space<vmem>>, vector<1x16xf32>
    %5 = vector.broadcast %4 : vector<1x16xf32> to vector<288x16xf32>
    %6 = arith.addf %3, %5 : vector<288x16xf32>
    %c0_7 = arith.constant 0 : index
    %c0_8 = arith.constant 0 : index
    %7 = vector.load %arg12[%c0_7, %c0_8] : memref<288x16xf32, #tpu.memory_space<vmem>>, vector<288x16xf32>
    tpu.vector_store %arg12[%c0_7, %c0_8], %6 {strides = array<i32>} : memref<288x16xf32, #tpu.memory_space<vmem>>, vector<288x16xf32>,
    %c0_i32 = arith.constant 0 : i32
    %8 = arith.cmpi eq, %arg1, %c0_i32 : i32
    %9 = arith.extui %8 : i1 to i32
    %c0_i32_9 = arith.constant 0 : i32
    %10 = arith.cmpi ne, %9, %c0_i32_9 : i32
    scf.if %10 {
      %cst_76 = arith.constant 0.000000e+00 : f32
      %186 = vector.broadcast %cst_76 : f32 to vector<16x16xf32>
      %c0_77 = arith.constant 0 : index
      %c0_78 = arith.constant 0 : index
      %187 = vector.load %arg12[%c0_77, %c0_78] : memref<288x16xf32, #tpu.memory_space<vmem>>, vector<16x16xf32>
      tpu.vector_store %arg12[%c0_77, %c0_78], %186 {strides = array<i32>} : memref<288x16xf32, #tpu.memory_space<vmem>>, vector<16x16xf32>,
    } else {
    }
    %c0_i32_10 = arith.constant 0 : i32
    %11 = arith.cmpi eq, %arg1, %c0_i32_10 : i32
    %12 = arith.extui %11 : i1 to i32
    %c0_i32_11 = arith.constant 0 : i32
    %13 = arith.cmpi ne, %12, %c0_i32_11 : i32
    scf.if %13 {
      %cst_76 = arith.constant 0.000000e+00 : f32
      %186 = vector.broadcast %cst_76 : f32 to vector<16x16xf32>
      %c272 = arith.constant 272 : index
      %c0_77 = arith.constant 0 : index
      %187 = vector.load %arg12[%c272, %c0_77] : memref<288x16xf32, #tpu.memory_space<vmem>>, vector<16x16xf32>
      tpu.vector_store %arg12[%c272, %c0_77], %186 {strides = array<i32>} : memref<288x16xf32, #tpu.memory_space<vmem>>, vector<16x16xf32>,
    } else {
    }
    %c0_12 = arith.constant 0 : index
    %c0_13 = arith.constant 0 : index
    %14 = vector.load %arg12[%c0_12, %c0_13] : memref<288x16xf32, #tpu.memory_space<vmem>>, vector<288x16xf32>
    %15 = tpu.iota {dimensions = array<i32: 0>} : vector<288x1xi32>
    %c16_i32 = arith.constant 16 : i32
    %c0_i32_14 = arith.constant 0 : i32
    %16 = arith.cmpi eq, %c16_i32, %c0_i32_14 : i32
    %c1_i32 = arith.constant 1 : i32
    %17 = arith.select %16, %c1_i32, %c16_i32 : i32
    %18 = vector.broadcast %17 : i32 to vector<288x1xi32>
    %19 = arith.remsi %15, %18 : vector<288x1xi32>
    %c0_i32_15 = arith.constant 0 : i32
    %20 = vector.broadcast %c0_i32_15 : i32 to vector<288x1xi32>
    %21 = arith.cmpi ne, %19, %20 : vector<288x1xi32>
    %c0_i32_16 = arith.constant 0 : i32
    %22 = vector.broadcast %c0_i32_16 : i32 to vector<288x1xi32>
    %23 = arith.cmpi slt, %19, %22 : vector<288x1xi32>
    %c0_i32_17 = arith.constant 0 : i32
    %24 = arith.cmpi slt, %17, %c0_i32_17 : i32
    %25 = vector.broadcast %24 : i1 to vector<288x1xi1>
    %26 = vector.broadcast %25 : vector<288x1xi1> to vector<288x1xi1>
    %27 = arith.xori %23, %26 : vector<288x1xi1>
    %28 = arith.andi %27, %21 : vector<288x1xi1>
    %29 = vector.broadcast %17 : i32 to vector<288x1xi32>
    %30 = arith.addi %19, %29 : vector<288x1xi32>
    %31 = arith.select %28, %30, %19 : vector<288x1xi1>, vector<288x1xi32>
    %c0_i32_18 = arith.constant 0 : i32
    %32 = vector.broadcast %c0_i32_18 : i32 to vector<288x1xi32>
    %33 = arith.cmpi sgt, %31, %32 : vector<288x1xi32>
    %34 = arith.extui %33 : vector<288x1xi1> to vector<288x1xi32>
    %35 = arith.sitofp %34 : vector<288x1xi32> to vector<288x1xf32>
    %c15_i32 = arith.constant 15 : i32
    %36 = vector.broadcast %c15_i32 : i32 to vector<288x1xi32>
    %37 = arith.cmpi slt, %31, %36 : vector<288x1xi32>
    %38 = arith.extui %37 : vector<288x1xi1> to vector<288x1xi32>
    %39 = arith.sitofp %38 : vector<288x1xi32> to vector<288x1xf32>
    %c1_i32_19 = arith.constant 1 : i32
    %40 = tpu.dynamic_rotate %14 by %c1_i32_19 dim 0 : vector<288x16xf32>, i32 -> vector<288x16xf32>
    %41 = vector.broadcast %35 : vector<288x1xf32> to vector<288x16xf32>
    %42 = arith.mulf %40, %41 : vector<288x16xf32>
    %c0_20 = arith.constant 0 : index
    %c0_21 = arith.constant 0 : index
    %43 = vector.load %arg13[%c0_20, %c0_21] : memref<288x16xf32, #tpu.memory_space<vmem>>, vector<288x16xf32>
    tpu.vector_store %arg13[%c0_20, %c0_21], %42 {strides = array<i32>} : memref<288x16xf32, #tpu.memory_space<vmem>>, vector<288x16xf32>,
    %c287_i32 = arith.constant 287 : i32
    %44 = tpu.dynamic_rotate %14 by %c287_i32 dim 0 : vector<288x16xf32>, i32 -> vector<288x16xf32>
    %45 = vector.broadcast %39 : vector<288x1xf32> to vector<288x16xf32>
    %46 = arith.mulf %44, %45 : vector<288x16xf32>
    %c0_22 = arith.constant 0 : index
    %c0_23 = arith.constant 0 : index
    %47 = vector.load %arg14[%c0_22, %c0_23] : memref<288x16xf32, #tpu.memory_space<vmem>>, vector<288x16xf32>
    tpu.vector_store %arg14[%c0_22, %c0_23], %46 {strides = array<i32>} : memref<288x16xf32, #tpu.memory_space<vmem>>, vector<288x16xf32>,
    %c0_24 = arith.constant 0 : index
    %c0_25 = arith.constant 0 : index
    %48 = vector.load %arg5[%c0_24, %c0_25] : memref<9x16xf32, #tpu.memory_space<vmem>>, vector<9x16xf32>
    %cst_26 = arith.constant 0.000000e+00 : f32
    %49 = vector.broadcast %cst_26 : f32 to vector<256x16xf32>
    %c0_27 = arith.constant 0 : index
    %c0_28 = arith.constant 0 : index
    %50 = vector.load %arg6[%c0_27, %c0_28] : memref<1x16xf32, #tpu.memory_space<vmem>>, vector<1x16xf32>
    %51 = vector.broadcast %50 : vector<1x16xf32> to vector<256x16xf32>
    %52 = arith.addf %49, %51 : vector<256x16xf32>
    %c0_29 = arith.constant 0 : index
    %c0_30 = arith.constant 0 : index
    %53 = vector.load %arg13[%c0_29, %c0_30] : memref<288x16xf32, #tpu.memory_space<vmem>>, vector<256x16xf32>
    %54 = vector.extract_strided_slice %48 {offsets = [0, 0], sizes = [1, 16], strides = [1, 1]} : vector<9x16xf32> to vector<1x16xf32>
    %55 = vector.shape_cast %54 : vector<1x16xf32> to vector<16xf32>
    %56 = vector.shape_cast %55 : vector<16xf32> to vector<1x16xf32>
    %57 = vector.broadcast %56 : vector<1x16xf32> to vector<256x16xf32>
    %58 = arith.mulf %53, %57 : vector<256x16xf32>
    %59 = arith.addf %52, %58 : vector<256x16xf32>
    %c0_31 = arith.constant 0 : index
    %c0_32 = arith.constant 0 : index
    %60 = vector.load %arg12[%c0_31, %c0_32] : memref<288x16xf32, #tpu.memory_space<vmem>>, vector<256x16xf32>
    %61 = vector.extract_strided_slice %48 {offsets = [1, 0], sizes = [1, 16], strides = [1, 1]} : vector<9x16xf32> to vector<1x16xf32>
    %62 = vector.shape_cast %61 : vector<1x16xf32> to vector<16xf32>
    %63 = vector.shape_cast %62 : vector<16xf32> to vector<1x16xf32>
    %64 = vector.broadcast %63 : vector<1x16xf32> to vector<256x16xf32>
    %65 = arith.mulf %60, %64 : vector<256x16xf32>
    %66 = arith.addf %59, %65 : vector<256x16xf32>
    %c0_33 = arith.constant 0 : index
    %c0_34 = arith.constant 0 : index
    %67 = vector.load %arg14[%c0_33, %c0_34] : memref<288x16xf32, #tpu.memory_space<vmem>>, vector<256x16xf32>
    %68 = vector.extract_strided_slice %48 {offsets = [2, 0], sizes = [1, 16], strides = [1, 1]} : vector<9x16xf32> to vector<1x16xf32>
    %69 = vector.shape_cast %68 : vector<1x16xf32> to vector<16xf32>
    %70 = vector.shape_cast %69 : vector<16xf32> to vector<1x16xf32>
    %71 = vector.broadcast %70 : vector<1x16xf32> to vector<256x16xf32>
    %72 = arith.mulf %67, %71 : vector<256x16xf32>
    %73 = arith.addf %66, %72 : vector<256x16xf32>
    %c16 = arith.constant 16 : index
    %c0_35 = arith.constant 0 : index
    %74 = vector.load %arg13[%c16, %c0_35] : memref<288x16xf32, #tpu.memory_space<vmem>>, vector<256x16xf32>
    %75 = vector.extract_strided_slice %48 {offsets = [3, 0], sizes = [1, 16], strides = [1, 1]} : vector<9x16xf32> to vector<1x16xf32>
    %76 = vector.shape_cast %75 : vector<1x16xf32> to vector<16xf32>
    %77 = vector.shape_cast %76 : vector<16xf32> to vector<1x16xf32>
    %78 = vector.broadcast %77 : vector<1x16xf32> to vector<256x16xf32>
    %79 = arith.mulf %74, %78 : vector<256x16xf32>
    %80 = arith.addf %73, %79 : vector<256x16xf32>
    %c16_36 = arith.constant 16 : index
    %c0_37 = arith.constant 0 : index
    %81 = vector.load %arg12[%c16_36, %c0_37] : memref<288x16xf32, #tpu.memory_space<vmem>>, vector<256x16xf32>
    %82 = vector.extract_strided_slice %48 {offsets = [4, 0], sizes = [1, 16], strides = [1, 1]} : vector<9x16xf32> to vector<1x16xf32>
    %83 = vector.shape_cast %82 : vector<1x16xf32> to vector<16xf32>
    %84 = vector.shape_cast %83 : vector<16xf32> to vector<1x16xf32>
    %85 = vector.broadcast %84 : vector<1x16xf32> to vector<256x16xf32>
    %86 = arith.mulf %81, %85 : vector<256x16xf32>
    %87 = arith.addf %80, %86 : vector<256x16xf32>
    %c16_38 = arith.constant 16 : index
    %c0_39 = arith.constant 0 : index
    %88 = vector.load %arg14[%c16_38, %c0_39] : memref<288x16xf32, #tpu.memory_space<vmem>>, vector<256x16xf32>
    %89 = vector.extract_strided_slice %48 {offsets = [5, 0], sizes = [1, 16], strides = [1, 1]} : vector<9x16xf32> to vector<1x16xf32>
    %90 = vector.shape_cast %89 : vector<1x16xf32> to vector<16xf32>
    %91 = vector.shape_cast %90 : vector<16xf32> to vector<1x16xf32>
    %92 = vector.broadcast %91 : vector<1x16xf32> to vector<256x16xf32>
    %93 = arith.mulf %88, %92 : vector<256x16xf32>
    %94 = arith.addf %87, %93 : vector<256x16xf32>
    %c32 = arith.constant 32 : index
    %c0_40 = arith.constant 0 : index
    %95 = vector.load %arg13[%c32, %c0_40] : memref<288x16xf32, #tpu.memory_space<vmem>>, vector<256x16xf32>
    %96 = vector.extract_strided_slice %48 {offsets = [6, 0], sizes = [1, 16], strides = [1, 1]} : vector<9x16xf32> to vector<1x16xf32>
    %97 = vector.shape_cast %96 : vector<1x16xf32> to vector<16xf32>
    %98 = vector.shape_cast %97 : vector<16xf32> to vector<1x16xf32>
    %99 = vector.broadcast %98 : vector<1x16xf32> to vector<256x16xf32>
    %100 = arith.mulf %95, %99 : vector<256x16xf32>
    %101 = arith.addf %94, %100 : vector<256x16xf32>
    %c32_41 = arith.constant 32 : index
    %c0_42 = arith.constant 0 : index
    %102 = vector.load %arg12[%c32_41, %c0_42] : memref<288x16xf32, #tpu.memory_space<vmem>>, vector<256x16xf32>
    %103 = vector.extract_strided_slice %48 {offsets = [7, 0], sizes = [1, 16], strides = [1, 1]} : vector<9x16xf32> to vector<1x16xf32>
    %104 = vector.shape_cast %103 : vector<1x16xf32> to vector<16xf32>
    %105 = vector.shape_cast %104 : vector<16xf32> to vector<1x16xf32>
    %106 = vector.broadcast %105 : vector<1x16xf32> to vector<256x16xf32>
    %107 = arith.mulf %102, %106 : vector<256x16xf32>
    %108 = arith.addf %101, %107 : vector<256x16xf32>
    %c32_43 = arith.constant 32 : index
    %c0_44 = arith.constant 0 : index
    %109 = vector.load %arg14[%c32_43, %c0_44] : memref<288x16xf32, #tpu.memory_space<vmem>>, vector<256x16xf32>
    %110 = vector.extract_strided_slice %48 {offsets = [8, 0], sizes = [1, 16], strides = [1, 1]} : vector<9x16xf32> to vector<1x16xf32>
    %111 = vector.shape_cast %110 : vector<1x16xf32> to vector<16xf32>
    %112 = vector.shape_cast %111 : vector<16xf32> to vector<1x16xf32>
    %113 = vector.broadcast %112 : vector<1x16xf32> to vector<256x16xf32>
    %114 = arith.mulf %109, %113 : vector<256x16xf32>
    %115 = arith.addf %108, %114 : vector<256x16xf32>
    %cst_45 = arith.constant dense<0.000000e+00> : vector<256xf32>
    %116 = vector.multi_reduction <add>, %115, %cst_45 [1] : vector<256x16xf32> to vector<256xf32>
    %117 = vector.shape_cast %116 : vector<256xf32> to vector<256x1xf32>
    %cst_46 = arith.constant 6.250000e-02 : f32
    %118 = vector.broadcast %cst_46 : f32 to vector<256x1xf32>
    %119 = arith.mulf %117, %118 : vector<256x1xf32>
    %120 = vector.broadcast %119 : vector<256x1xf32> to vector<256x16xf32>
    %121 = arith.subf %115, %120 : vector<256x16xf32>
    %122 = arith.mulf %121, %121 : vector<256x16xf32>
    %cst_47 = arith.constant dense<0.000000e+00> : vector<256xf32>
    %123 = vector.multi_reduction <add>, %122, %cst_47 [1] : vector<256x16xf32> to vector<256xf32>
    %124 = vector.shape_cast %123 : vector<256xf32> to vector<256x1xf32>
    %cst_48 = arith.constant 6.250000e-02 : f32
    %125 = vector.broadcast %cst_48 : f32 to vector<256x1xf32>
    %126 = arith.mulf %124, %125 : vector<256x1xf32>
    %cst_49 = arith.constant 9.99999974E-6 : f32
    %127 = vector.broadcast %cst_49 : f32 to vector<256x1xf32>
    %128 = arith.addf %126, %127 : vector<256x1xf32>
    %129 = math.rsqrt %128 : vector<256x1xf32>
    %130 = vector.broadcast %129 : vector<256x1xf32> to vector<256x16xf32>
    %131 = arith.mulf %121, %130 : vector<256x16xf32>
    %c0_50 = arith.constant 0 : index
    %c0_51 = arith.constant 0 : index
    %132 = vector.load %arg7[%c0_50, %c0_51] : memref<1x16xf32, #tpu.memory_space<vmem>>, vector<1x16xf32>
    %133 = vector.broadcast %132 : vector<1x16xf32> to vector<256x16xf32>
    %134 = arith.mulf %131, %133 : vector<256x16xf32>
    %c0_52 = arith.constant 0 : index
    %c0_53 = arith.constant 0 : index
    %135 = vector.load %arg8[%c0_52, %c0_53] : memref<1x16xf32, #tpu.memory_space<vmem>>, vector<1x16xf32>
    %136 = vector.broadcast %135 : vector<1x16xf32> to vector<256x16xf32>
    %137 = arith.addf %134, %136 : vector<256x16xf32>
    %cst_54 = arith.constant 5.000000e-01 : f32
    %138 = vector.broadcast %cst_54 : f32 to vector<256x16xf32>
    %139 = arith.mulf %138, %137 : vector<256x16xf32>
    %cst_55 = arith.constant 0.707106769 : f32
    %140 = vector.broadcast %cst_55 : f32 to vector<256x16xf32>
    %141 = arith.mulf %137, %140 : vector<256x16xf32>
    %142 = math.absf %141 : vector<256x16xf32>
    %cst_56 = arith.constant 0.327591091 : f32
    %143 = vector.broadcast %cst_56 : f32 to vector<256x16xf32>
    %144 = arith.mulf %143, %142 : vector<256x16xf32>
    %cst_57 = arith.constant 1.000000e+00 : f32
    %145 = vector.broadcast %cst_57 : f32 to vector<256x16xf32>
    %146 = arith.addf %145, %144 : vector<256x16xf32>
    %147 = tpu.reciprocal %146 {approx = true} : vector<256x16xf32> -> vector<256x16xf32>
    %cst_58 = arith.constant 1.06140542 : f32
    %148 = vector.broadcast %cst_58 : f32 to vector<256x16xf32>
    %149 = arith.mulf %148, %147 : vector<256x16xf32>
    %cst_59 = arith.constant -1.45315206 : f32
    %150 = vector.broadcast %cst_59 : f32 to vector<256x16xf32>
    %151 = arith.addf %149, %150 : vector<256x16xf32>
    %152 = arith.mulf %151, %147 : vector<256x16xf32>
    %cst_60 = arith.constant 1.42141378 : f32
    %153 = vector.broadcast %cst_60 : f32 to vector<256x16xf32>
    %154 = arith.addf %152, %153 : vector<256x16xf32>
    %155 = arith.mulf %154, %147 : vector<256x16xf32>
    %cst_61 = arith.constant -0.284496725 : f32
    %156 = vector.broadcast %cst_61 : f32 to vector<256x16xf32>
    %157 = arith.addf %155, %156 : vector<256x16xf32>
    %158 = arith.mulf %157, %147 : vector<256x16xf32>
    %cst_62 = arith.constant 0.254829586 : f32
    %159 = vector.broadcast %cst_62 : f32 to vector<256x16xf32>
    %160 = arith.addf %158, %159 : vector<256x16xf32>
    %161 = arith.mulf %160, %147 : vector<256x16xf32>
    %cst_63 = arith.constant 0.000000e+00 : f32
    %162 = vector.broadcast %cst_63 : f32 to vector<256x16xf32>
    %163 = arith.subf %162, %142 : vector<256x16xf32>
    %164 = arith.mulf %163, %142 : vector<256x16xf32>
    %165 = math.exp %164 : vector<256x16xf32>
    %166 = arith.mulf %161, %165 : vector<256x16xf32>
    %cst_64 = arith.constant 1.000000e+00 : f32
    %167 = vector.broadcast %cst_64 : f32 to vector<256x16xf32>
    %168 = arith.subf %167, %166 : vector<256x16xf32>
    %cst_65 = arith.constant 0.000000e+00 : f32
    %169 = vector.broadcast %cst_65 : f32 to vector<256x16xf32>
    %170 = arith.cmpf oge, %141, %169 : vector<256x16xf32>
    %cst_66 = arith.constant 0.000000e+00 : f32
    %171 = vector.broadcast %cst_66 : f32 to vector<256x16xf32>
    %172 = arith.subf %171, %168 : vector<256x16xf32>
    %173 = arith.select %170, %168, %172 : vector<256x16xi1>, vector<256x16xf32>
    %cst_67 = arith.constant 1.000000e+00 : f32
    %174 = vector.broadcast %cst_67 : f32 to vector<256x16xf32>
    %175 = arith.addf %174, %173 : vector<256x16xf32>
    %176 = arith.mulf %139, %175 : vector<256x16xf32>
    %177 = arith.truncf %176 : vector<256x16xf32> to vector<256x16xbf16>
    %c0_68 = arith.constant 0 : index
    %c0_69 = arith.constant 0 : index
    %178 = vector.load %arg9[%c0_68, %c0_69] : memref<16x128xbf16, #tpu.memory_space<vmem>>, vector<16x128xbf16>
    %cst_70 = arith.constant dense<0.000000e+00> : vector<256x128xf32>
    %179 = tpu.matmul %177, %178, %cst_70 {dimension_numbers = #tpu.dot_dimension_numbers<[1], [0], [0], [1], [0, 0, 1, 1], [], []>} : vector<256x16xbf16>, vector<16x128xbf16>, vector<256x128xf32> -> vector<256x128xf32>
    %c0_71 = arith.constant 0 : index
    %c0_72 = arith.constant 0 : index
    %180 = vector.load %arg10[%c0_71, %c0_72] : memref<1x128xf32, #tpu.memory_space<vmem>>, vector<1x128xf32>
    %181 = vector.broadcast %180 : vector<1x128xf32> to vector<256x128xf32>
    %182 = arith.addf %179, %181 : vector<256x128xf32>
    %c0_73 = arith.constant 0 : index
    %c0_74 = arith.constant 0 : index
    %c0_75 = arith.constant 0 : index
    %183 = vector.load %arg11[%c0_73, %c0_74, %c0_75] : memref<1x256x128xf32, #tpu.memory_space<vmem>>, vector<1x256x128xf32>
    %184 = vector.shape_cast %183 : vector<1x256x128xf32> to vector<256x128xf32>
    %185 = vector.shape_cast %182 : vector<256x128xf32> to vector<1x256x128xf32>
    tpu.vector_store %arg11[%c0_73, %c0_74, %c0_75], %185 {strides = array<i32>} : memref<1x256x128xf32, #tpu.memory_space<vmem>>, vector<1x256x128xf32>,
    return
  }
  func.func @transform_0(%arg0: i32, %arg1: i32) -> (i32, i32, i32, i32) {
    %c0_i32 = arith.constant 0 : i32
    %c0_i32_0 = arith.constant 0 : i32
    %c0_i32_1 = arith.constant 0 : i32
    return %arg0, %arg1, %c0_i32, %c0_i32_0 : i32, i32, i32, i32
  }
  func.func @transform_1(%arg0: i32, %arg1: i32) -> (i32, i32) {
    %c0_i32 = arith.constant 0 : i32
    %c0_i32_0 = arith.constant 0 : i32
    %c0_i32_1 = arith.constant 0 : i32
    return %c0_i32, %c0_i32_0 : i32, i32
  }
  func.func @transform_2(%arg0: i32, %arg1: i32) -> (i32, i32) {
    %c0_i32 = arith.constant 0 : i32
    %c0_i32_0 = arith.constant 0 : i32
    %c0_i32_1 = arith.constant 0 : i32
    return %c0_i32, %c0_i32_0 : i32, i32
  }
  func.func @transform_3(%arg0: i32, %arg1: i32) -> (i32, i32) {
    %c0_i32 = arith.constant 0 : i32
    %c0_i32_0 = arith.constant 0 : i32
    %c0_i32_1 = arith.constant 0 : i32
    return %c0_i32, %c0_i32_0 : i32, i32
  }
  func.func @transform_4(%arg0: i32, %arg1: i32) -> (i32, i32) {
    %c0_i32 = arith.constant 0 : i32
    %c0_i32_0 = arith.constant 0 : i32
    %c0_i32_1 = arith.constant 0 : i32
    return %c0_i32, %c0_i32_0 : i32, i32
  }
  func.func @transform_5(%arg0: i32, %arg1: i32) -> (i32, i32) {
    %c0_i32 = arith.constant 0 : i32
    %c0_i32_0 = arith.constant 0 : i32
    %c0_i32_1 = arith.constant 0 : i32
    return %c0_i32, %c0_i32_0 : i32, i32
  }
  func.func @transform_6(%arg0: i32, %arg1: i32) -> (i32, i32) {
    %c0_i32 = arith.constant 0 : i32
    %c0_i32_0 = arith.constant 0 : i32
    %c0_i32_1 = arith.constant 0 : i32
    return %c0_i32, %c0_i32_0 : i32, i32
  }
  func.func @transform_7(%arg0: i32, %arg1: i32) -> (i32, i32) {
    %c0_i32 = arith.constant 0 : i32
    %c0_i32_0 = arith.constant 0 : i32
    %c0_i32_1 = arith.constant 0 : i32
    return %c0_i32, %c0_i32_0 : i32, i32
  }
  func.func @transform_8(%arg0: i32, %arg1: i32) -> (i32, i32) {
    %c0_i32 = arith.constant 0 : i32
    %c0_i32_0 = arith.constant 0 : i32
    %c0_i32_1 = arith.constant 0 : i32
    return %c0_i32, %c0_i32_0 : i32, i32
  }
  func.func @transform_9(%arg0: i32, %arg1: i32) -> (i32, i32, i32) {
    %c0_i32 = arith.constant 0 : i32
    %c0_i32_0 = arith.constant 0 : i32
    return %arg0, %arg1, %c0_i32 : i32, i32, i32
  }
}

</mosaic_0001>

<bundles_post_ra>
// kernel: tpu_custom_call.1
= control target key start
LH: loop header
LB: loop body
LE: loop exit
PB: predicated region body
PF: predicated region fallthrough
CT: control target
= control target key end

     0   :  { %14 = vsyncpa [#allocation6], 0  ;;  %s7674_s0 = inlined_call_operand.vmem [shape: bf16[2,1,288,8], index: 0, kind: input, shape index: {}]   ;;  %s7675_s1 = inlined_call_operand.vmem [shape: bf16[8,16], index: 1, kind: input, shape index: {}]   ;;  %s7676_s2 = inlined_call_operand.vmem [shape: f32[1,16], index: 2, kind: input, shape index: {}]   ;;  %s7677_s3 = inlined_call_operand.vmem [shape: f32[9,16], index: 3, kind: input, shape index: {}]   ;;  %s7678_s4 = inlined_call_operand.vmem [shape: f32[1,16], index: 4, kind: input, shape index: {}]   ;;  %s7679_s5 = inlined_call_operand.vmem [shape: f32[1,16], index: 5, kind: input, shape index: {}]   ;;  %s7680_s6 = inlined_call_operand.vmem [shape: f32[1,16], index: 6, kind: input, shape index: {}]   ;;  %s7681_s7 = inlined_call_operand.vmem [shape: bf16[16,128], index: 7, kind: input, shape index: {}]   ;;  %s7682_s8 = inlined_call_operand.vmem [shape: f32[1,128], index: 8, kind: input, shape index: {}]   ;;  %s7683_s9 = inlined_call_operand.hbm [shape: f32[2,256,128], index: 9, kind: output, shape index: {}]  }
   0x1   :  { %16 = vsyncpa [#allocation6 + $0x1], 0  ;;  %s4848_s30 = smov 0   ;;  %s4850_s10 = smov 0  }
   0x2   :  { %s4852_s11 = smov 0   ;;  %s4854_s12 = smov 0  }
   0x3   :  { %s4856_s13 = smov 0   ;;  %s4858_s14 = smov 0  }
   0x4 LB: > { %s4213_s15 = sadd.s32 4294967295, %s4792_s14   ;;  %s4214_s16 = sadd.s32 4294967294, %s4792_s14   ;;  %s4792_s14 = sphi %s4858_s14, %s22_s14   ;;  %s4788_s13 = sphi %s4856_s13, %s7936_s13   ;;  %s4784_s12 = sphi %s4854_s12, %s7935_s12   ;;  %s4780_s11 = sphi %s4852_s11, %s7934_s11   ;;  %s4776_s10 = sphi %s4850_s10, %s7933_s10   ;;  %s4772_s30 = sphi %s4848_s30, %s7932_s30  }
   0x5   : > { %s34_s17 = sadd.s32 1, %s4788_s13  ;;  %s239_s18 = sadd.s32 1, %s4780_s11 }
   0x6   : > { %p36_p0 = scmp.ge.s32.totalorder %s34_s17, 2  ;;  %p249_p1 = scmp.ne.s32.totalorder %s4780_s11, %s4776_s10 }
   0x7   : > { %p250_p2 = scmp.eq.s32.totalorder %s4213_s15, 1  ;;  %p255_p3 = scmp.ne.s32.totalorder %s4776_s10, %s4772_s30 }
   0x8   : > { %s7938_s17 = smov (%p36_p0, %s34_s17), 0  ;;  %p256_p5 = scmp.eq.s32.totalorder %s4214_s16, 1 }
   0x9   : > { %p4888_p4 = por %p250_p2, %p249_p1  ;;  %s234_s20 = ssub.s32 %s4788_s13, %s7938_s17 }
   0xa   : > { %p4217_p6 = scmp.ge.s32.totalorder %s4792_s14, 1  ;;  %p237_p7 = scmp.eq.s32.totalorder %s234_s20, 0 }
   0xb   : > { %p4895_p8 = por %p256_p5, %p255_p3  ;;  %p310_p9 = scmp.lt.s32.totalorder %s4792_s14, 3 }
   0xc   : > { %s4901_s22 = scalar_select %p237_p7, %s4780_s11, %s239_s18  }
   0xd   : > { %p311_p10 = pnand %p4217_p6, %p310_p9 }
   0xf   : > { %314 = sbr.rel (%p311_p10) target bundleno = 1226 (0x4ca), region = 56 }
  0x16   : > { %v397_v0 = vld [vmem:[%s7675_s1] sm:$0xf]  ;;  %vm550_vm0 = vcmask 1043456   ;;  %p350_p11 = scmp.lt.s32.totalorder %s4784_s12, 1  ;;  %vm495_vm1 = vcmask 64512   ;;  %v812_v20 = vlaneseq  ;;  %v7684_v39 = vmov 0.0  }
  0x17   : > { %4429 = vmatprep.subr.msk.bf16.mxu0 %vm550_vm0, %v397_v0  ;;  %v552_v1 = vsel %vm550_vm0, %v397_v0, 0  ;;  %v4962_v34 = vld [vmem:[%s7677_s3] sm:$0xff]  ;;  %vm731_vm14 = vcmask 130048   ;;  %s347_s15 = sand.u32 1, %s4776_s10   ;;  %s4320_s24 = sshll.u32 %s4784_s12, 12 }
  0x18   : > { %4358 = vmatpush3.bf16.msra.mxu0 %v552_v1  ;;  %s351_s25 = scalar_select %p350_p11, %s4784_s12, 1  ;;  %v4949_v21 = vshrl.u32 %v812_v20, 7 }
  0x19   : > { %s4218_s16 = sshll.u32 %s347_s15, 8  ;;  %s7618_s28 = scalar_lea.hbm %s7683_s9, %s4320_s24 }
  0x1a   : > { %s4430_s26 = smul.u32 144, %s351_s25  ;;  %v815_v22 = vadd.s32 16, %v4949_v21  ;;  %v814_v23 = vadd.s32 8, %v4949_v21  ;;  %v816_v24 = vadd.s32 24, %v4949_v21  ;;  %v817_v25 = vadd.s32 32, %v4949_v21  ;;  %s7553_s23 = scalar_lea.vmem [#allocation5], %s4218_s16 }
  0x1b   : > { %v818_v27 = vadd.s32 40, %v4949_v21  ;;  %v819_v28 = vadd.s32 48, %v4949_v21  ;;  %v1931_v29 = vsub.s32 1, %v4949_v21  ;;  %v2171_v30 = vsub.s32 4, %v4949_v21  ;;  %s4131_s25 = sshll.u32 %s7553_s23, 4  ;;  %s7628_s12 = scalar_lea.sflag [#allocation6], %s347_s15  ;;  %s7620_s25 = int_to_ptr.vmem [resolvable:$true] %s4131_s25 }
  0x1c   : > { %s4911_s29 = scalar_lea.vmem %s7674_s0, %s4430_s26  ;;  %v867_v26 = vand.u32 15, %v815_v22  ;;  %v860_v31 = vand.u32 15, %v814_v23  ;;  %v874_v32 = vand.u32 15, %v816_v24  ;;  %v881_v33 = vand.u32 15, %v817_v25  ;;  %s4795_s16 = smov [#allocation5]  }
  0x1d   : > { %v4489_v2 = vld [vmem:[%s4911_s29] sm:$0xff]   ;;  %v4490_v3 = vld [vmem:[%s4911_s29 + $0x8] sm:$0xff]   ;;  %v4491_v4 = vld [vmem:[%s4911_s29 + $0x10] sm:$0xff]   ;;  %v888_v35 = vand.u32 15, %v818_v27  ;;  %v895_v36 = vand.u32 15, %v819_v28  ;;  %v4965_v37 = vrot.slane %v4962_v34, %v1931_v29  ;;  %v4968_v38 = vrot.slane %v4962_v34, %v2171_v30  ;;  %s4718_s18 = sshll.u32 %s4795_s16, 4  ;;  %s4719_s18 = int_to_ptr.vmem [resolvable:$false] %s4718_s18 }
  0x1e   : > { %4359 = vmatprep.mubr.msk.bf16.mxu0 %vm495_vm1, %v4489_v2  ;;  %v4492_v5 = vld [vmem:[%s4911_s29 + $0x18] sm:$0xff]   ;;  %v4493_v6 = vld [vmem:[%s4911_s29 + $0x20] sm:$0xff]   ;;  %v4494_v7 = vld [vmem:[%s4911_s29 + $0x28] sm:$0xff]   ;;  %vm1283_vm2 = vcmp.gt.s32.totalorder %v867_v26, 0  ;;  %vm1390_vm3 = vcmp.lt.s32.totalorder %v860_v31, 15  ;;  %vm1285_vm4 = vcmp.gt.s32.totalorder %v881_v33, 0  ;;  %p4721_p1 = scmp.lt.s32.totalorder %s7620_s25, %s4719_s18 }
  0x1f   : > { %4360 = vmatmul.mubr.msk.bf16.vlgmr.msra.gmra.mrb[0].mxu0 %vm495_vm1, %v4490_v3  ;;  %v4495_v8 = vld [vmem:[%s4911_s29 + $0x30] sm:$0xff]   ;;  %v4496_v9 = vld [vmem:[%s4911_s29 + $0x38] sm:$0xff]   ;;  %v4497_v10 = vld [vmem:[%s4911_s29 + $0x40] sm:$0xff]   ;;  %v4971_v40 = vsel %vm1283_vm2, 1.0, %v7684_v39  ;;  %vm1392_vm5 = vcmp.lt.s32.totalorder %v874_v32, 15  ;;  %vm1287_vm6 = vcmp.gt.s32.totalorder %v895_v36, 0 }
  0x20   : > { %4363 = vmatprep.mubr.msk.bf16.mxu0 %vm495_vm1, %v4491_v4  ;;  %v4498_v11 = vld [vmem:[%s4911_s29 + $0x48] sm:$0xff]   ;;  %v4499_v12 = vld [vmem:[%s4911_s29 + $0x50] sm:$0xff]   ;;  %v4500_v13 = vld [vmem:[%s4911_s29 + $0x58] sm:$0xff]   ;;  %vm1394_vm7 = vcmp.lt.s32.totalorder %v888_v35, 15  ;;  %v1831_v41 = vsub.s32 0, %v4949_v21  ;;  %v2031_v42 = vsub.s32 2, %v4949_v21 }
  0x21   : > { %v4501_v14 = vld [vmem:[%s4911_s29 + $0x60] sm:$0xff]   ;;  %v4502_v15 = vld [vmem:[%s4911_s29 + $0x68] sm:$0xff]   ;;  %v4503_v16 = vld [vmem:[%s4911_s29 + $0x70] sm:$0xff]   ;;  %v821_v43 = vadd.s32 64, %v4949_v21  ;;  %v823_v44 = vadd.s32 80, %v4949_v21  ;;  %v2101_v45 = vsub.s32 3, %v4949_v21 }
  0x22   : > { %v4504_v17 = vld [vmem:[%s4911_s29 + $0x78] sm:$0xff]   ;;  %v4505_v18 = vld [vmem:[%s4911_s29 + $0x80] sm:$0xff]   ;;  %v4506_v19 = vld [vmem:[%s4911_s29 + $0x88] sm:$0xff]   ;;  %v2241_v46 = vsub.s32 5, %v4949_v21  ;;  %v825_v47 = vadd.s32 96, %v4949_v21  ;;  %v827_v48 = vadd.s32 112, %v4949_v21  ;;  %v4999_v56 = vrot.slane %v4962_v34, %v1831_v41 }
  0x23   : > { %v829_v49 = vadd.s32 128, %v4949_v21  ;;  %v820_v50 = vadd.s32 56, %v4949_v21  ;;  %v4984_v51 = vsel %vm1390_vm3, 1.0, %v7684_v39  ;;  %v4987_v52 = vsel %vm1285_vm4, 1.0, %v7684_v39  ;;  %s4714_s29 = scalar_lea.vmem %s7620_s25, 4096  ;;  %s4720_s20 = scalar_lea.vmem %s4719_s18, 8192 }
  0x24   : > { %v4990_v53 = vsel %vm1392_vm5, 1.0, %v7684_v39  ;;  %v4993_v54 = vsel %vm1287_vm6, 1.0, %v7684_v39  ;;  %v4996_v55 = vsel %vm1394_vm7, 1.0, %v7684_v39  ;;  %v5002_v57 = vrot.slane %v4962_v34, %v2031_v42  ;;  %p4715_p12 = scmp.ne.s32.totalorder %s7620_s25, %s4714_s29  ;;  %p4722_p2 = scmp.lt.s32.totalorder %s4720_s20, %s4714_s29 }
  0x25   : > { %v2381_v58 = vsub.s32 7, %v4949_v21  ;;  %v909_v59 = vand.u32 15, %v821_v43  ;;  %v923_v60 = vand.u32 15, %v823_v44  ;;  %v5006_v61 = vrot.slane %v4962_v34, %v2101_v45 }
  0x26   : > { %v5009_v62 = vrot.slane %v4962_v34, %v2241_v46  ;;  %v937_v63 = vand.u32 15, %v825_v47  ;;  %v951_v0 = vand.u32 15, %v827_v48  ;;  %v965_v1 = vand.u32 15, %v829_v49  ;;  %p4716_p13 = pnand %p4715_p12, %p4888_p4  ;;  %p4723_p3 = por %p4722_p2, %p4721_p1 }
  0x27   : > { %4364 = vmatmul.mubr.msk.bf16.gmra.mrb[4].mxu0 %vm495_vm1, %v4492_v5  ;;  %v902_v2 = vand.u32 15, %v820_v50  ;;  %v831_v3 = vadd.s32 144, %v4949_v21  ;;  %v833_v4 = vadd.s32 160, %v4949_v21  ;;  %v835_v5 = vadd.s32 176, %v4949_v21 }
  0x28   : > { %4367 = vmatprep.mubr.msk.bf16.mxu0 %vm495_vm1, %v4493_v6  ;;  %v837_v6 = vadd.s32 192, %v4949_v21  ;;  %vm5021_vm8 = vcmp.gt.s32.totalorder %v909_v59, 0  ;;  %vm5025_vm9 = vcmp.gt.s32.totalorder %v923_v60, 0  ;;  %vm5031_vm10 = vcmp.gt.s32.totalorder %v937_v63, 0  ;;  %v5113_v60 = vld [vmem:[%s7676_s2] ss:$0 sm:$0xff]  ;;  %p4717_p0 = pneg %p4716_p13 }
  0x29   : > { %vm5035_vm11 = vcmp.gt.s32.totalorder %v951_v0, 0  ;;  %vm5039_vm12 = vcmp.gt.s32.totalorder %v965_v1, 0  ;;  %vm5043_vm13 = vcmp.lt.s32.totalorder %v902_v2, 15  ;;  %v993_v20 = vand.u32 15, %v833_v4 }
  0x2a   : > { %v1007_v22 = vand.u32 15, %v835_v5  ;;  %v1021_v23 = vand.u32 15, %v837_v6  ;;  %v826_v27 = vadd.s32 104, %v4949_v21  ;;  %v5051_v28 = vsel %vm5021_vm8, 1.0, %v7684_v39  ;;  %p4724_p5 = pnand %p4723_p3, %p4717_p0 }
  0x2b   : > { %v5056_v29 = vsel %vm5025_vm9, 1.0, %v7684_v39  ;;  %v5064_v32 = vsel %vm5031_vm10, 1.0, %v7684_v39  ;;  %v5069_v33 = vsel %vm5035_vm11, 1.0, %v7684_v39  ;;  %v5074_v35 = vsel %vm5039_vm12, 1.0, %v7684_v39 }
  0x2c   : > { %vm5081_vm0 = vcmp.gt.s32.totalorder %v993_v20, 0  ;;  %vm5089_vm2 = vcmp.gt.s32.totalorder %v1021_v23, 0  ;;  %v944_v45 = vand.u32 15, %v826_v27  ;;  %v843_v46 = vadd.s32 240, %v4949_v21 }
  0x2d   : > { %v845_v47 = vadd.s32 256, %v4949_v21  ;;  %v828_v48 = vadd.s32 120, %v4949_v21  ;;  %v847_v50 = vadd.s32 272, %v4949_v21  ;;  %v832_v59 = vadd.s32 152, %v4949_v21 }
  0x2e   : > { %v5118_v63 = vsel %vm5081_vm0, 1.0, %v7684_v39  ;;  %v5128_v1 = vsel %vm5089_vm2, 1.0, %v7684_v39  ;;  %vm5146_vm7 = vcmp.lt.s32.totalorder %v944_v45, 15  ;;  %v834_v20 = vadd.s32 168, %v4949_v21 }
  0x2f   : > { %4368 = vmatmul.mubr.msk.bf16.gmra.mrb[8].mxu0 %vm495_vm1, %v4494_v7  ;;  %v5016_v7 = vrot.slane %v4962_v34, %v2381_v58  ;;  %v830_v58 = vadd.s32 136, %v4949_v21  ;;  %v838_v23 = vadd.s32 200, %v4949_v21  ;;  %v842_v27 = vadd.s32 232, %v4949_v21 }
  0x30   : > { %4371 = vmatprep.mubr.msk.bf16.mxu0 %vm495_vm1, %v4495_v8  ;;  %v839_v8 = vadd.s32 208, %v4949_v21  ;;  %vm1533_vm8 = vcmp.lt.s32.totalorder %v4949_v21, 1  ;;  %vm1678_vm9 = vcmp.lt.s32.totalorder %v4949_v21, 7  ;;  %v5168_v41 = vsel %vm5146_vm7, 1.0, %v7684_v39 }
  0x31   : > { %v1000_v45 = vand.u32 15, %v834_v20 }
  0x32   : > { %v1035_v24 = vand.u32 15, %v839_v8 }
  0x33   : > { %vm5218_vm2 = vcmp.lt.s32.totalorder %v1000_v45, 15 }
  0x34   : > { %vm5093_vm3 = vcmp.gt.s32.totalorder %v1035_v24, 0 }
  0x37   : > { %4372 = vmatmul.mubr.msk.bf16.gmra.mrb[12].mxu0 %vm495_vm1, %v4496_v9  ;;  %v841_v9 = vadd.s32 224, %v4949_v21 }
  0x38   : > { %4375 = vmatprep.mubr.msk.bf16.mxu0 %vm495_vm1, %v4497_v10  ;;  %v822_v10 = vadd.s32 72, %v4949_v21 }
  0x39   : > { %v1049_v25 = vand.u32 15, %v841_v9  ;;  %v1063_v9 = vand.u32 15, %v843_v46 }
  0x3a   : > { %v916_v26 = vand.u32 15, %v822_v10  ;;  %v1077_v10 = vand.u32 15, %v845_v47  ;;  %v1028_v47 = vand.u32 15, %v838_v23 }
  0x3b   : > { %vm5097_vm4 = vcmp.gt.s32.totalorder %v1049_v25, 0  ;;  %vm1311_vm10 = vcmp.gt.s32.totalorder %v1063_v9, 0 }
  0x3c   : > { %vm1398_vm5 = vcmp.lt.s32.totalorder %v916_v26, 15  ;;  %v5141_v4 = vsel %vm5097_vm4, 1.0, %v7684_v39  ;;  %v840_v26 = vadd.s32 216, %v4949_v21  ;;  %vm1313_vm12 = vcmp.gt.s32.totalorder %v1077_v10, 0 }
  0x3d   : > { %v5131_v2 = vsel %vm1398_vm5, 1.0, %v7684_v39  ;;  %vm5226_vm4 = vcmp.lt.s32.totalorder %v1028_v47, 15 }
  0x3f   : > { %4376 = vmatmul.mubr.msk.bf16.gmra.mrb[16].mxu0 %vm495_vm1, %v4498_v11  ;;  %v853_v11 = vand.u32 15, %v4949_v21 }
  0x40   : > { %4379 = vmatprep.mubr.msk.bf16.mxu0 %vm495_vm1, %v4499_v12  ;;  %v958_v12 = vand.u32 15, %v828_v48  ;;  %v5189_v48 = vsel %vm1311_vm10, 1.0, %v7684_v39 }
  0x42   : > { %vm5170_vm11 = vcmp.lt.s32.totalorder %v958_v12, 15 }
  0x43   : > { %v5200_v10 = vsel %vm5170_vm11, 1.0, %v7684_v39 }
  0x47   : > { %4380 = vmatmul.mubr.msk.bf16.gmra.mrb[20].mxu0 %vm495_vm1, %v4500_v13  ;;  %v2311_v13 = vsub.s32 6, %v4949_v21 }
  0x48   : > { %4383 = vmatprep.mubr.msk.bf16.mxu0 %vm495_vm1, %v4501_v14  ;;  %v824_v14 = vadd.s32 88, %v4949_v21 }
  0x49   : > { %v5059_v30 = vrot.slane %v4962_v34, %v2311_v13  ;;  %v5079_v34 = vsel %vm5043_vm13, 1.0, %v7684_v39  ;;  %vm1281_vm13 = vcmp.gt.s32.totalorder %v853_v11, 0 }
  0x4a   : > { %v930_v31 = vand.u32 15, %v824_v14  ;;  %v5195_v9 = vsel %vm1281_vm13, 1.0, %v7684_v39 }
  0x4b   : > { %7760 = vst [vmem:[#allocation9_spill] sm:$0xff] %v5195_v9 }
  0x4c   : > { %vm1400_vm6 = vcmp.lt.s32.totalorder %v930_v31, 15  ;;  %v844_v31 = vadd.s32 248, %v4949_v21 }
  0x4d   : > { %v5144_v5 = vsel %vm1400_vm6, 1.0, %v7684_v39 }
  0x4f   : > { %4384 = vmatmul.mubr.msk.bf16.gmra.mrb[24].mxu0 %vm495_vm1, %v4502_v15  ;;  %v1091_v15 = vand.u32 15, %v847_v50  ;;  %v1042_v50 = vand.u32 15, %v840_v26 }
  0x50   : > { %4387 = vmatprep.mubr.msk.bf16.mxu0 %vm495_vm1, %v4503_v16  ;;  %v972_v16 = vand.u32 15, %v830_v58  ;;  %v1056_v58 = vand.u32 15, %v842_v27 }
  0x51   : > { %vm5232_vm5 = vcmp.lt.s32.totalorder %v1042_v50, 15 }
  0x52   : > { %vm1406_vm0 = vcmp.lt.s32.totalorder %v972_v16, 15  ;;  %v846_v16 = vadd.s32 264, %v4949_v21  ;;  %vm5236_vm6 = vcmp.lt.s32.totalorder %v1056_v58, 15 }
  0x53   : > { %v5203_v11 = vsel %vm1406_vm0, 1.0, %v7684_v39  ;;  %v5288_v26 = vsel %vm5236_vm6, 1.0, %v7684_v39 }
  0x54   : > { %7761 = vst [vmem:[#allocation10_spill] sm:$0xff] %v5203_v11  ;;  %7781 = vst [vmem:[#allocation18_spill] sm:$0xff] %v5288_v26 }
  0x57   : > { %4388 = vmatmul.mubr.msk.bf16.gmra.mrb[28].mxu0 %vm495_vm1, %v4504_v17  ;;  %v986_v17 = vand.u32 15, %v832_v59  ;;  %v1070_v59 = vand.u32 15, %v844_v31 }
  0x58   : > { %4391 = vmatprep.mubr.msk.bf16.mxu0 %vm495_vm1, %v4505_v18 }
  0x59   : > { %vm5240_vm7 = vcmp.lt.s32.totalorder %v1070_v59, 15 }
  0x5f   : > { %4392 = vmatmul.mubr.msk.bf16.gmra.mrb[32].mxu0 %vm495_vm1, %v4506_v19  ;;  %v979_v19 = vand.u32 15, %v831_v3  ;;  %vm5085_vm1 = vcmp.gt.s32.totalorder %v1007_v22, 0  ;;  %v5136_v3 = vsel %vm5093_vm3, 1.0, %v7684_v39  ;;  %v836_v22 = vadd.s32 184, %v4949_v21 }
  0x60   : > { %v5123_v0 = vsel %vm5085_vm1, 1.0, %v7684_v39  ;;  %vm5182_vm1 = vcmp.lt.s32.totalorder %v986_v17, 15 }
  0x61   : > { %vm1299_vm15 = vcmp.gt.s32.totalorder %v979_v19, 0  ;;  %v1014_v46 = vand.u32 15, %v836_v22 }
  0x62   : > { %v5105_v49 = vsel %vm1299_vm15, 1.0, %v7684_v39  ;;  %vm5177_vm15 = vcmp.gt.s32.totalorder %v1091_v15, 0  ;;  %v5214_v15 = vsel %vm5182_vm1, 1.0, %v7684_v39 }
  0x63   : > { %7763 = vst [vmem:[#allocation12_spill] sm:$0xff] %v5214_v15  ;;  %vm5222_vm3 = vcmp.lt.s32.totalorder %v1014_v46, 15  ;;  %v1084_v46 = vand.u32 15, %v846_v16  ;;  %v5269_v16 = vsel %vm5226_vm4, 1.0, %v7684_v39 }
  0x64   : > { %7779 = vst [vmem:[#allocation16_spill] sm:$0xff] %v5269_v16 }
  0x65   : > { %vm5295_vm10 = vcmp.lt.s32.totalorder %v1084_v46, 15 }
  0xf2   : > { %v4361_v8 = vpop.f32.mrb[0].mxu0 }
  0xf3   : > { %v597_v13 = vadd.f32 %v4361_v8, %v5113_v60  ;;  %v588_v14 = vpop.f32.mrb[1].mxu0  ;;  %v5192_v8 = vsel %vm1313_vm12, 1.0, %v7684_v39 }
  0xf4   : > { %v589_v18 = vadd.f32 %v5113_v60, %v588_v14  ;;  %v4362_v19 = vpop.f32.mrb[2].mxu0  ;;  %7759 = vst [vmem:[#allocation8_spill] sm:$0xff] %v5192_v8  ;;  %v5209_v14 = vsel %vm5177_vm15, 1.0, %v7684_v39 }
  0xf5   : > { %734 = vst.msk [vmem:[#allocation2 + $0x10] sm:$0xff] %vm731_vm14, %v597_v13  ;;  %v600_v24 = vadd.f32 %v4362_v19, %v5113_v60  ;;  %v591_v25 = vpop.f32.mrb[3].mxu0  ;;  %7762 = vst [vmem:[#allocation11_spill] sm:$0xff] %v5209_v14 }
  0xf6   : > { %732 = vst.msk [vmem:[#allocation2] sm:$0xff] %vm731_vm14, %v589_v18  ;;  %v592_v36 = vadd.f32 %v5113_v60, %v591_v25 }
  0xf7   : > { %772 = vst.msk [vmem:[#allocation2] sm:$0xff] %vm731_vm14, %v7684_v39  ;;  %735 = vst.msk [vmem:[#allocation2 + $0x18] sm:$0xff] %vm731_vm14, %v600_v24 }
  0xf8   : > { %733 = vst.msk [vmem:[#allocation2 + $0x8] sm:$0xff] %vm731_vm14, %v592_v36 }
  0xf9   : > { %773 = vst.msk [vmem:[#allocation2 + $0x8] sm:$0xff] %vm731_vm14, %v7684_v39 }
  0xfa   : > { %v4365_v6 = vpop.f32.mrb[4].mxu0 }
  0xfb   : > { %v613_v12 = vadd.f32 %v4365_v6, %v5113_v60  ;;  %v604_v13 = vpop.f32.mrb[5].mxu0 }
  0xfc   : > { %v778_v17 = vld [vmem:[#allocation2 + $0x10] sm:$0xff]  ;;  %v605_v18 = vadd.f32 %v5113_v60, %v604_v13  ;;  %v4366_v19 = vpop.f32.mrb[6].mxu0  ;;  %v5264_v13 = vsel %vm5222_vm3, 1.0, %v7684_v39 }
  0xfd   : > { %738 = vst.msk [vmem:[#allocation2 + $0x30] sm:$0xff] %vm731_vm14, %v613_v12  ;;  %v616_v24 = vadd.f32 %v4366_v19, %v5113_v60  ;;  %v607_v25 = vpop.f32.mrb[7].mxu0  ;;  %v1499_v36 = vrot.slane %v778_v17, 7  ;;  %v1644_v42 = vrot.slane %v778_v17, 1  ;;  %v5259_v12 = vsel %vm5218_vm2, 1.0, %v7684_v39  ;;  %7778 = vst [vmem:[#allocation15_spill] sm:$0xff] %v5264_v13 }
  0xfe   : > { %v5244_v43 = vld [vmem:[#allocation2] sm:$0xff]  ;;  %v5246_v44 = vld [vmem:[#allocation2 + $0x18] sm:$0xff]  ;;  %736 = vst.msk [vmem:[#allocation2 + $0x20] sm:$0xff] %vm731_vm14, %v605_v18  ;;  %v608_v45 = vadd.f32 %v5113_v60, %v607_v25  ;;  %7777 = vst [vmem:[#allocation14_spill] sm:$0xff] %v5259_v12  ;;  %v5274_v18 = vsel %vm5232_vm5, 1.0, %v7684_v39  ;;  %v5283_v25 = vmul.f32 %v4965_v37, %v778_v17 }
  0xff   : > { %7776 = vst [vmem:[#allocation13_spill] sm:$0xff] %v5244_v43  ;;  %v7686_v47 = vrot.slane %v5244_v43, 7  ;;  %v7687_v50 = vrot.slane %v5244_v43, 1  ;;  %v1500_v58 = vrot.slane %v5246_v44, 7  ;;  %v1645_v59 = vrot.slane %v5246_v44, 1  ;;  %739 = vst.msk [vmem:[#allocation2 + $0x38] sm:$0xff] %vm731_vm14, %v616_v24 }
 0x100   : > { %v777_v6 = vld [vmem:[#allocation2 + $0x8] sm:$0xff]  ;;  %737 = vst.msk [vmem:[#allocation2 + $0x28] sm:$0xff] %vm731_vm14, %v608_v45  ;;  %7780 = vst [vmem:[#allocation17_spill] sm:$0xff] %v5274_v18  ;;  %v5293_v45 = vsel %vm5240_vm7, 1.0, %v7684_v39 }
 0x101   : > { %v1566_v19 = vsel %vm1533_vm8, %v1499_v36, %v1500_v58  ;;  %v1711_v20 = vsel %vm1678_vm9, %v1644_v42, %v1645_v59  ;;  %v1498_v24 = vrot.slane %v777_v6, 7  ;;  %v1643_v22 = vrot.slane %v777_v6, 1  ;;  %7782 = vst [vmem:[#allocation19_spill] sm:$0xff] %v5293_v45 }
 0x102   : > { %1609 = vst.msk [vmem:[#allocation3 + $0x18] sm:$0xff] %vm731_vm14, %v1566_v19  ;;  %1753 = vst.msk [vmem:[#allocation4 + $0x10] sm:$0xff] %vm731_vm14, %v1711_v20  ;;  %v4369_v23 = vpop.f32.mrb[8].mxu0 }
 0x103   : > { %v1567_v19 = vsel %vm1533_vm8, %v1498_v24, %v1499_v36  ;;  %v1568_v20 = vsel %vm1533_vm8, %v7686_v47, %v1498_v24  ;;  %v1712_v27 = vsel %vm1678_vm9, %v1643_v22, %v1644_v42  ;;  %v1713_v31 = vsel %vm1678_vm9, %v7687_v50, %v1643_v22  ;;  %v620_v46 = vpop.f32.mrb[9].mxu0 }
 0x104   : > { %v1572_v39 = vmul.f32 %v4971_v40, %v1567_v19  ;;  %1607 = vst.msk [vmem:[#allocation3 + $0x8] sm:$0xff] %vm731_vm14, %v1568_v20  ;;  %v1716_v36 = vmul.f32 %v4984_v51, %v1712_v27  ;;  %1751 = vst.msk [vmem:[#allocation4] sm:$0xff] %vm731_vm14, %v1713_v31  ;;  %v5315_v45 = vld [vmem:[#allocation2 + $0x30] sm:$0xff]  ;;  %v629_v24 = vadd.f32 %v4369_v23, %v5113_v60  ;;  %v4370_v47 = vpop.f32.mrb[10].mxu0 }
 0x105   : > { %v621_v42 = vadd.f32 %v5113_v60, %v620_v46  ;;  %v780_v26 = vld [vmem:[#allocation2 + $0x20] sm:$0xff]  ;;  %v632_v18 = vadd.f32 %v4370_v47, %v5113_v60  ;;  %v623_v22 = vpop.f32.mrb[11].mxu0  ;;  %v5322_v40 = vmul.f32 %v4965_v37, %v5246_v44  ;;  %v5325_v19 = vmul.f32 %v4968_v38, %v778_v17 }
 0x106   : > { %v5329_v51 = vmul.f32 %v4968_v38, %v5246_v44  ;;  %1608 = vst.msk [vmem:[#allocation3 + $0x10] sm:$0xff] %vm731_vm14, %v1572_v39  ;;  %1752 = vst.msk [vmem:[#allocation4 + $0x8] sm:$0xff] %vm731_vm14, %v1716_v36  ;;  %v1501_v23 = vrot.slane %v780_v26, 7  ;;  %v1646_v20 = vrot.slane %v780_v26, 1  ;;  %v5333_v27 = vld [vmem:[#allocation2 + $0x38] sm:$0xff]  ;;  %v624_v47 = vadd.f32 %v5113_v60, %v623_v22 }
 0x107   : > { %7785 = vst [vmem:[#allocation20_spill] sm:$0xff] %v5325_v19  ;;  %742 = vst.msk [vmem:[#allocation2 + $0x50] sm:$0xff] %vm731_vm14, %v629_v24  ;;  %v7787_v17 = vmov 0.0   ;;  %v1503_v44 = vrot.slane %v5315_v45, 7  ;;  %v1648_v39 = vrot.slane %v5315_v45, 1  ;;  %v1504_v46 = vrot.slane %v5333_v27, 7 }
 0x108   : > { %7786 = vst [vmem:[#allocation21_spill] sm:$0xff] %v5329_v51  ;;  %740 = vst.msk [vmem:[#allocation2 + $0x40] sm:$0xff] %vm731_vm14, %v621_v42  ;;  %v5341_v31 = vsel %vm5295_vm10, 1.0, %v7787_v17  ;;  %v1649_v36 = vrot.slane %v5333_v27, 1  ;;  %v5347_v50 = vld [vmem:[#allocation2 + $0x28] sm:$0xff]  ;;  %v1565_v24 = vsel %vm1533_vm8, %v1500_v58, %v1501_v23  ;;  %v1710_v6 = vsel %vm1678_vm9, %v1645_v59, %v1646_v20 }
 0x109   : > { %7788 = vst [vmem:[#allocation22_spill] sm:$0xff] %v5341_v31  ;;  %743 = vst.msk [vmem:[#allocation2 + $0x58] sm:$0xff] %vm731_vm14, %v632_v18  ;;  %v1502_v42 = vrot.slane %v5347_v50, 7  ;;  %v1647_v22 = vrot.slane %v5347_v50, 1  ;;  %v1574_v51 = vmul.f32 %v4987_v52, %v1565_v24  ;;  %v1718_v19 = vmul.f32 %v4990_v53, %v1710_v6  ;;  %v1999_v24 = vld [vmem:[#allocation4 + $0x10] sm:$0xff]  ;;  %v1800_v6 = vld [vmem:[#allocation3 + $0x18] sm:$0xff] }
 0x10a   : > { %741 = vst.msk [vmem:[#allocation2 + $0x48] sm:$0xff] %vm731_vm14, %v624_v47  ;;  %v1562_v31 = vsel %vm1533_vm8, %v1503_v44, %v1504_v46  ;;  %v1707_v18 = vsel %vm1678_vm9, %v1648_v39, %v1649_v36  ;;  %v4373_v53 = vpop.f32.mrb[12].mxu0 }
 0x10b   : > { %1613 = vst.msk [vmem:[#allocation3 + $0x38] sm:$0xff] %vm731_vm14, %v1562_v31  ;;  %v1563_v58 = vsel %vm1533_vm8, %v1502_v42, %v1503_v44  ;;  %v1564_v59 = vsel %vm1533_vm8, %v1501_v23, %v1502_v42  ;;  %v1708_v47 = vsel %vm1678_vm9, %v1647_v22, %v1648_v39  ;;  %v1709_v52 = vsel %vm1678_vm9, %v1646_v20, %v1647_v22  ;;  %v636_v20 = vpop.f32.mrb[13].mxu0 }
 0x10c   : > { %1757 = vst.msk [vmem:[#allocation4 + $0x30] sm:$0xff] %vm731_vm14, %v1707_v18  ;;  %1610 = vst.msk [vmem:[#allocation3 + $0x20] sm:$0xff] %vm731_vm14, %v1574_v51  ;;  %v1576_v31 = vmul.f32 %v4993_v54, %v1563_v58  ;;  %v1720_v23 = vmul.f32 %v4996_v55, %v1708_v47  ;;  %v645_v44 = vadd.f32 %v4373_v53, %v5113_v60  ;;  %v4374_v51 = vpop.f32.mrb[14].mxu0 }
 0x10d   : > { %1754 = vst.msk [vmem:[#allocation4 + $0x18] sm:$0xff] %vm731_vm14, %v1718_v19  ;;  %1611 = vst.msk [vmem:[#allocation3 + $0x28] sm:$0xff] %vm731_vm14, %v1564_v59  ;;  %v5382_v39 = vmul.f32 %v4965_v37, %v5315_v45  ;;  %v637_v42 = vadd.f32 %v5113_v60, %v636_v20  ;;  %v5386_v19 = vmul.f32 %v4965_v37, %v780_v26  ;;  %v639_v59 = vpop.f32.mrb[15].mxu0  ;;  %v1799_v47 = vld [vmem:[#allocation3 + $0x10] sm:$0xff] }
 0x10e   : > { %1755 = vst.msk [vmem:[#allocation4 + $0x20] sm:$0xff] %vm731_vm14, %v1709_v52  ;;  %v5389_v54 = vmul.f32 %v4968_v38, %v780_v26  ;;  %v5393_v55 = vmul.f32 %v4968_v38, %v5315_v45  ;;  %1756 = vst.msk [vmem:[#allocation4 + $0x28] sm:$0xff] %vm731_vm14, %v1720_v23  ;;  %v5397_v22 = vld [vmem:[#allocation2 + $0x50] sm:$0xff]  ;;  %v648_v58 = vadd.f32 %v4374_v51, %v5113_v60 }
 0x10f   : > { %7789 = vst [vmem:[#allocation23_spill] sm:$0xff] %v5386_v19  ;;  %1612 = vst.msk [vmem:[#allocation3 + $0x30] sm:$0xff] %vm731_vm14, %v1576_v31  ;;  %v5399_v18 = vld [vmem:[#allocation2 + $0x40] sm:$0xff]  ;;  %v2035_v26 = vmul.f32 %v5002_v57, %v1999_v24  ;;  %v5406_v52 = vmul.f32 %v5016_v7, %v5315_v45  ;;  %v5409_v53 = vmul.f32 %v4999_v56, %v1800_v6  ;;  %v1507_v45 = vrot.slane %v5397_v22, 7 }
 0x110   : > { %7790 = vst [vmem:[#allocation24_spill] sm:$0xff] %v5393_v55  ;;  %7791 = vst [vmem:[#allocation25_spill] sm:$0xff] %v5397_v22  ;;  %v1505_v31 = vrot.slane %v5399_v18, 7  ;;  %v5413_v20 = vld [vmem:[#allocation2 + $0x58] sm:$0xff]  ;;  %v5422_v24 = vmul.f32 %v4965_v37, %v5333_v27  ;;  %v640_v23 = vadd.f32 %v5113_v60, %v639_v59  ;;  %v7793_v19 = vrot.slane %v5399_v18, 1 }
 0x111   : > { %7792 = vst [vmem:[#allocation26_spill] sm:$0xff] %v5399_v18  ;;  %746 = vst.msk [vmem:[#allocation2 + $0x70] sm:$0xff] %vm731_vm14, %v645_v44  ;;  %v5418_v44 = vmul.f32 %v4965_v37, %v5347_v50  ;;  %v1508_v6 = vrot.slane %v5413_v20, 7  ;;  %v5426_v51 = vld [vmem:[#allocation2 + $0x48] sm:$0xff] }
 0x112   : > { %744 = vst.msk [vmem:[#allocation2 + $0x60] sm:$0xff] %vm731_vm14, %v637_v42  ;;  %747 = vst.msk [vmem:[#allocation2 + $0x78] sm:$0xff] %vm731_vm14, %v648_v58  ;;  %v1835_v42 = vmul.f32 %v4999_v56, %v1799_v47  ;;  %v1561_v55 = vsel %vm1533_vm8, %v1504_v46, %v1505_v31  ;;  %v1706_v16 = vsel %vm1678_vm9, %v1649_v36, %v7793_v19  ;;  %v1506_v13 = vrot.slane %v5426_v51, 7  ;;  %v5442_v58 = vld [vmem:[%s7678_s4] ss:$0 sm:$0xff] }
 0x113   : > { %v1578_v59 = vmul.f32 %v5051_v28, %v1561_v55  ;;  %v1558_v47 = vsel %vm1533_vm8, %v1507_v45, %v1508_v6  ;;  %745 = vst.msk [vmem:[#allocation2 + $0x68] sm:$0xff] %vm731_vm14, %v640_v23  ;;  %v1722_v36 = vmul.f32 %v5079_v34, %v1706_v16  ;;  %v7689_v19 = vrot.slane %v5397_v22, 1  ;;  %v4377_v28 = vpop.f32.mrb[16].mxu0  ;;  %v1801_v55 = vld [vmem:[#allocation3 + $0x20] sm:$0xff]  ;;  %v5456_v15 = vld [vmem:[#allocation4 + $0x30] sm:$0xff] }
 0x114   : > { %v1867_v46 = vadd.f32 %v5442_v58, %v1835_v42  ;;  %1617 = vst.msk [vmem:[#allocation3 + $0x58] sm:$0xff] %vm731_vm14, %v1558_v47  ;;  %v1559_v12 = vsel %vm1533_vm8, %v1506_v13, %v1507_v45  ;;  %v1560_v18 = vsel %vm1533_vm8, %v1505_v31, %v1506_v13  ;;  %v5460_v23 = vmul.f32 %v4968_v38, %v5347_v50  ;;  %v652_v45 = vpop.f32.mrb[17].mxu0 }
 0x115   : > { %1614 = vst.msk [vmem:[#allocation3 + $0x40] sm:$0xff] %vm731_vm14, %v1578_v59  ;;  %v1580_v34 = vmul.f32 %v5056_v29, %v1559_v12  ;;  %1615 = vst.msk [vmem:[#allocation3 + $0x48] sm:$0xff] %vm731_vm14, %v1560_v18  ;;  %v661_v16 = vadd.f32 %v4377_v28, %v5113_v60  ;;  %v2001_v13 = vld [vmem:[#allocation4 + $0x20] sm:$0xff]  ;;  %v5470_v31 = vmul.f32 %v4968_v38, %v5333_v27  ;;  %v7794_v29 = vrot.slane %v5426_v51, 1  ;;  %v4378_v59 = vpop.f32.mrb[18].mxu0 }
 0x116   : > { %v1967_v42 = vadd.f32 %v5283_v25, %v1867_v46  ;;  %1758 = vst.msk [vmem:[#allocation4 + $0x38] sm:$0xff] %vm731_vm14, %v1722_v36  ;;  %v653_v25 = vadd.f32 %v5113_v60, %v652_v45  ;;  %v1803_v47 = vld [vmem:[#allocation3 + $0x30] sm:$0xff]  ;;  %v2105_v46 = vmul.f32 %v5006_v61, %v1801_v55  ;;  %v664_v28 = vadd.f32 %v4378_v59, %v5113_v60  ;;  %v655_v50 = vpop.f32.mrb[19].mxu0 }
 0x117   : > { %v5479_v12 = vsel %vm1678_vm9, %v7794_v29, %v7689_v19  ;;  %1616 = vst.msk [vmem:[#allocation3 + $0x50] sm:$0xff] %vm731_vm14, %v1580_v34  ;;  %750 = vst.msk [vmem:[#allocation2 + $0x90] sm:$0xff] %vm731_vm14, %v661_v16  ;;  %v5491_v29 = vmul.f32 %v4999_v56, %v1801_v55  ;;  %v1839_v19 = vmul.f32 %v4999_v56, %v1803_v47 }
 0x118   : > { %v5481_v18 = vld [vmem:[#allocation2 + $0x70] sm:$0xff]  ;;  %v2039_v45 = vmul.f32 %v5002_v57, %v5456_v15  ;;  %748 = vst.msk [vmem:[#allocation2 + $0x80] sm:$0xff] %vm731_vm14, %v653_v25  ;;  %v656_v34 = vadd.f32 %v5113_v60, %v655_v50  ;;  %v5502_v16 = vmul.f32 %v5002_v57, %v2001_v13  ;;  %v2067_v59 = vadd.f32 %v2035_v26, %v1967_v42  ;;  %v5526_v50 = vld [vmem:[%s7677_s3 + $0x8] ss:$0 sm:$0xff] }
 0x119   : > { %7795 = vst [vmem:[#allocation27_spill] sm:$0xff] %v5481_v18  ;;  %v5486_v36 = vld [vmem:[#allocation2 + $0x60] sm:$0xff]  ;;  %7797 = vst [vmem:[#allocation29_spill] sm:$0xff] %v5491_v29  ;;  %v5497_v9 = vld [vmem:[#allocation2 + $0x78] sm:$0xff]  ;;  %v1511_v55 = vrot.slane %v5481_v18, 7  ;;  %v1871_v14 = vadd.f32 %v5442_v58, %v1839_v19  ;;  %v2245_v43 = vmul.f32 %v5009_v62, %v2001_v13 }
 0x11a   : > { %7796 = vst [vmem:[#allocation28_spill] sm:$0xff] %v5486_v36  ;;  %v1509_v22 = vrot.slane %v5486_v36, 7  ;;  %7798 = vst [vmem:[#allocation30_spill] sm:$0xff] %v5502_v16  ;;  %v1512_v29 = vrot.slane %v5497_v9, 7  ;;  %v5513_v8 = vld [vmem:[#allocation2 + $0x68] sm:$0xff]  ;;  %v2137_v26 = vadd.f32 %v2105_v46, %v2067_v59  ;;  %v4381_v11 = vpop.f32.mrb[20].mxu0 }
 0x11b   : > { %751 = vst.msk [vmem:[#allocation2 + $0x98] sm:$0xff] %vm731_vm14, %v664_v28  ;;  %749 = vst.msk [vmem:[#allocation2 + $0x88] sm:$0xff] %vm731_vm14, %v656_v34  ;;  %v1510_v13 = vrot.slane %v5513_v8, 7  ;;  %v1971_v46 = vadd.f32 %v5382_v39, %v1871_v14  ;;  %v668_v19 = vpop.f32.mrb[21].mxu0 }
 0x11c   : > { %v1557_v25 = vsel %vm1533_vm8, %v1508_v6, %v1509_v22  ;;  %v1554_v28 = vsel %vm1533_vm8, %v1511_v55, %v1512_v29  ;;  %v2207_v34 = vadd.f32 %v5389_v54, %v2137_v26  ;;  %v2315_v6 = vmul.f32 %v5059_v30, %v1803_v47  ;;  %v4382_v26 = vpop.f32.mrb[22].mxu0 }
 0x11d   : > { %v1582_v42 = vmul.f32 %v5064_v32, %v1557_v25  ;;  %1621 = vst.msk [vmem:[#allocation3 + $0x78] sm:$0xff] %vm731_vm14, %v1554_v28  ;;  %v5530_v32 = vmul.f32 %v5006_v61, %v1803_v47  ;;  %v1555_v59 = vsel %vm1533_vm8, %v1510_v13, %v1511_v55  ;;  %v1556_v25 = vsel %vm1533_vm8, %v1509_v22, %v1510_v13  ;;  %v671_v13 = vpop.f32.mrb[23].mxu0 }
 0x11e   : > { %v677_v28 = vadd.f32 %v4381_v11, %v5113_v60  ;;  %v1584_v14 = vmul.f32 %v5069_v33, %v1555_v59  ;;  %1619 = vst.msk [vmem:[#allocation3 + $0x68] sm:$0xff] %vm731_vm14, %v1556_v25  ;;  %v5542_v39 = vld [vmem:[#allocation2 + $0x90] sm:$0xff]  ;;  %v669_v54 = vadd.f32 %v5113_v60, %v668_v19  ;;  %v2277_v55 = vadd.f32 %v2245_v43, %v2207_v34 }
 0x11f   : > { %7799 = vst [vmem:[#allocation31_spill] sm:$0xff] %v5530_v32  ;;  %1618 = vst.msk [vmem:[#allocation3 + $0x60] sm:$0xff] %vm731_vm14, %v1582_v42  ;;  %v5545_v42 = vadd.f32 %v2039_v45, %v1971_v46  ;;  %v5547_v32 = vld [vmem:[#allocation3 + $0x38] sm:$0xff]  ;;  %v7802_v22 = vrot.slane %v5486_v36, 1  ;;  %v7803_v11 = vrot.slane %v5413_v20, 1  ;;  %v5557_v33 = vld [vmem:[#allocation2 + $0x80] sm:$0xff]  ;;  %v680_v19 = vadd.f32 %v4382_v26, %v5113_v60 }
 0x120   : > { %7800 = vst [vmem:[#allocation32_spill] sm:$0xff] %v5542_v39  ;;  %7804 = vst [vmem:[#allocation34_spill] sm:$0xff] %v5557_v33  ;;  %v5563_v43 = vmul.f32 %v5009_v62, %v5456_v15  ;;  %v2455_v45 = vmul.f32 %v5526_v50, %v5456_v15  ;;  %v7806_v46 = vrot.slane %v5481_v18, 1  ;;  %v7807_v34 = vrot.slane %v5513_v8, 1 }
 0x121   : > { %7801 = vst [vmem:[#allocation33_spill] sm:$0xff] %v5545_v42  ;;  %v5555_v47 = vsel %vm1678_vm9, %v7803_v11, %v7802_v22  ;;  %754 = vst.msk [vmem:[#allocation2 + $0xb0] sm:$0xff] %vm731_vm14, %v677_v28  ;;  %v1513_v25 = vrot.slane %v5557_v33, 7  ;;  %v672_v26 = vadd.f32 %v5113_v60, %v671_v13  ;;  %v2347_v22 = vadd.f32 %v2315_v6, %v2277_v55  ;;  %v2000_v42 = vld [vmem:[#allocation4 + $0x18] sm:$0xff] }
 0x122   : > { %7805 = vst [vmem:[#allocation35_spill] sm:$0xff] %v5563_v43  ;;  %v5573_v59 = vsel %vm1678_vm9, %v7807_v34, %v7806_v46  ;;  %1620 = vst.msk [vmem:[#allocation3 + $0x70] sm:$0xff] %vm731_vm14, %v1584_v14  ;;  %v5577_v28 = vld [vmem:[#allocation2 + $0x98] sm:$0xff]  ;;  %v1515_v15 = vrot.slane %v5542_v39, 7  ;;  %v5584_v36 = vld [vmem:[#allocation2 + $0x88] sm:$0xff]  ;;  %v1840_v46 = vmul.f32 %v4999_v56, %v5547_v32  ;;  %v1868_v55 = vadd.f32 %v5442_v58, %v5409_v53  ;;  %v4385_v6 = vpop.f32.mrb[24].mxu0 }
 0x123   : > { %752 = vst.msk [vmem:[#allocation2 + $0xa0] sm:$0xff] %vm731_vm14, %v669_v54  ;;  %v1516_v18 = vrot.slane %v5577_v28, 7  ;;  %7808 = vst [vmem:[#allocation36_spill] sm:$0xff] %v5584_v36  ;;  %v1802_v14 = vld [vmem:[#allocation3 + $0x28] sm:$0xff]  ;;  %v1553_v54 = vsel %vm1533_vm8, %v1512_v29, %v1513_v25  ;;  %v1514_v13 = vrot.slane %v5584_v36, 7  ;;  %v2417_v11 = vadd.f32 %v5406_v52, %v2347_v22 }
 0x124   : > { %755 = vst.msk [vmem:[#allocation2 + $0xb8] sm:$0xff] %vm731_vm14, %v680_v19  ;;  %753 = vst.msk [vmem:[#allocation2 + $0xa8] sm:$0xff] %vm731_vm14, %v672_v26  ;;  %v1586_v34 = vmul.f32 %v5074_v35, %v1553_v54  ;;  %v1872_v43 = vadd.f32 %v5442_v58, %v1840_v46  ;;  %v7697_v29 = vrot.slane %v5542_v39, 1  ;;  %v5608_v35 = vmul.f32 %v4999_v56, %v1802_v14  ;;  %v684_v54 = vpop.f32.mrb[25].mxu0 }
 0x125   : > { %v1550_v19 = vsel %vm1533_vm8, %v1515_v15, %v1516_v18  ;;  %v1551_v26 = vsel %vm1533_vm8, %v1514_v13, %v1515_v15  ;;  %v1552_v53 = vsel %vm1533_vm8, %v1513_v25, %v1514_v13  ;;  %v693_v46 = vadd.f32 %v4385_v6, %v5113_v60  ;;  %v5617_v15 = vld [vmem:[#allocation4 + $0x38] sm:$0xff] }
 0x126   : > { %1625 = vst.msk [vmem:[#allocation3 + $0x98] sm:$0xff] %vm731_vm14, %v1550_v19  ;;  %1622 = vst.msk [vmem:[#allocation3 + $0x80] sm:$0xff] %vm731_vm14, %v1586_v34  ;;  %v1588_v22 = vmul.f32 %v5105_v49, %v1551_v26  ;;  %v5615_v19 = vadd.f32 %v2455_v45, %v2417_v11  ;;  %v7810_v25 = vrot.slane %v5557_v33, 1  ;;  %v7811_v13 = vrot.slane %v5497_v9, 1  ;;  %v4386_v26 = vpop.f32.mrb[26].mxu0 }
 0x127   : > { %1623 = vst.msk [vmem:[#allocation3 + $0x88] sm:$0xff] %vm731_vm14, %v1552_v53  ;;  %v685_v49 = vadd.f32 %v5113_v60, %v684_v54  ;;  %v1968_v6 = vadd.f32 %v5322_v40, %v1868_v55  ;;  %v2036_v45 = vmul.f32 %v5002_v57, %v2000_v42  ;;  %v7813_v11 = vrot.slane %v5584_v36, 1  ;;  %758 = vst.msk [vmem:[#allocation2 + $0xd0] sm:$0xff] %vm731_vm14, %v693_v46  ;;  %v687_v42 = vpop.f32.mrb[27].mxu0 }
 0x128   : > { %7809 = vst [vmem:[#allocation37_spill] sm:$0xff] %v5615_v19  ;;  %v5625_v34 = vsel %vm1678_vm9, %v7811_v13, %v7810_v25  ;;  %v5627_v52 = vld [vmem:[#allocation2 + $0xb0] sm:$0xff]  ;;  %1624 = vst.msk [vmem:[#allocation3 + $0x90] sm:$0xff] %vm731_vm14, %v1588_v22  ;;  %v2523_v54 = vsel %vm731_vm14, %v5615_v19, 0.0  ;;  %v696_v40 = vadd.f32 %v4386_v26, %v5113_v60  ;;  %v1972_v55 = vadd.f32 %v5422_v24, %v1872_v43  ;;  %v2002_v13 = vld [vmem:[#allocation4 + $0x28] sm:$0xff] }
 0x129   : > { %7812 = vst [vmem:[#allocation38_spill] sm:$0xff] %v5627_v52  ;;  %v5638_v53 = vsel %vm1678_vm9, %v7813_v11, %v7697_v29  ;;  %756 = vst.msk [vmem:[#allocation2 + $0xc0] sm:$0xff] %vm731_vm14, %v685_v49  ;;  %2524 = vadd.xlane.f32.xlu1 %v2523_v54  ;;  %v688_v22 = vadd.f32 %v5113_v60, %v687_v42  ;;  %v2040_v46 = vmul.f32 %v5002_v57, %v5617_v15 }
 0x12a   : > { %v5641_v25 = vld [vmem:[#allocation2 + $0xa0] sm:$0xff]  ;;  %v2068_v11 = vadd.f32 %v2036_v45, %v1968_v6  ;;  %v1519_v29 = vrot.slane %v5627_v52, 7  ;;  %759 = vst.msk [vmem:[#allocation2 + $0xd8] sm:$0xff] %vm731_vm14, %v696_v40  ;;  %v2106_v19 = vmul.f32 %v5006_v61, %v1802_v14  ;;  %v5668_v6 = vmul.f32 %v5002_v57, %v2002_v13  ;;  %v4389_v36 = vpop.f32.mrb[28].mxu0 }
 0x12b   : > { %7814 = vst [vmem:[#allocation39_spill] sm:$0xff] %v5641_v25  ;;  %v1517_v39 = vrot.slane %v5641_v25, 7  ;;  %v5649_v33 = vld [vmem:[#allocation2 + $0xb8] sm:$0xff]  ;;  %v5658_v43 = vld [vmem:[#allocation2 + $0xa8] sm:$0xff]  ;;  %757 = vst.msk [vmem:[#allocation2 + $0xc8] sm:$0xff] %vm731_vm14, %v688_v22  ;;  %v5680_v16 = vadd.f32 %v2040_v46, %v1972_v55  ;;  %v7816_v45 = vrot.slane %v5641_v25, 1 }
 0x12c   : > { %v1520_v24 = vrot.slane %v5649_v33, 7  ;;  %7815 = vst [vmem:[#allocation40_spill] sm:$0xff] %v5658_v43  ;;  %v1518_v54 = vrot.slane %v5658_v43, 7  ;;  %v2138_v14 = vadd.f32 %v2106_v19, %v2068_v11  ;;  %v700_v55 = vpop.f32.mrb[29].mxu0  ;;  %v5695_v46 = vld [vmem:[#allocation3 + $0x48] sm:$0xff] }
 0x12d   : > { %v1549_v49 = vsel %vm1533_vm8, %v1516_v18, %v1517_v39 }
 0x12e   : > { %v1590_v26 = vmul.f32 %v5118_v63, %v1549_v49  ;;  %v1546_v40 = vsel %vm1533_vm8, %v1519_v29, %v1520_v24  ;;  %v1547_v42 = vsel %vm1533_vm8, %v1518_v54, %v1519_v29  ;;  %v1548_v22 = vsel %vm1533_vm8, %v1517_v39, %v1518_v54 }
 0x12f   : > { %1629 = vst.msk [vmem:[#allocation3 + $0xb8] sm:$0xff] %vm731_vm14, %v1546_v40  ;;  %v7817_v63 = vrot.slane %v5577_v28, 1  ;;  %v1592_v11 = vmul.f32 %v5123_v0, %v1547_v42  ;;  %1627 = vst.msk [vmem:[#allocation3 + $0xa8] sm:$0xff] %vm731_vm14, %v1548_v22  ;;  %v2208_v29 = vadd.f32 %v5460_v23, %v2138_v14  ;;  %v2246_v39 = vmul.f32 %v5009_v62, %v2002_v13  ;;  %v4390_v42 = vpop.f32.mrb[30].mxu0 }
 0x130   : > { %1626 = vst.msk [vmem:[#allocation3 + $0xa0] sm:$0xff] %vm731_vm14, %v1590_v26  ;;  %v7818_v49 = vrot.slane %v5627_v52, 1  ;;  %v7819_v54 = vrot.slane %v5658_v43, 1  ;;  %v5705_v26 = vld [vmem:[#allocation2 + $0xd0] sm:$0xff]  ;;  %v5709_v0 = vmul.f32 %v5006_v61, %v5547_v32  ;;  %v709_v23 = vadd.f32 %v4389_v36, %v5113_v60  ;;  %v5714_v40 = vld [vmem:[#allocation2 + $0xc0] sm:$0xff] }
 0x131   : > { %v5688_v19 = vsel %vm1678_vm9, %v7817_v63, %v7816_v45  ;;  %7821 = vst [vmem:[#allocation42_spill] sm:$0xff] %v5705_v26  ;;  %v701_v13 = vadd.f32 %v5113_v60, %v700_v55  ;;  %1628 = vst.msk [vmem:[#allocation3 + $0xb0] sm:$0xff] %vm731_vm14, %v1592_v11  ;;  %v2278_v14 = vadd.f32 %v2246_v39, %v2208_v29  ;;  %v1521_v36 = vrot.slane %v5714_v40, 7  ;;  %v5723_v18 = vld [vmem:[#allocation2 + $0xd8] sm:$0xff] }
 0x132   : > { %v5703_v45 = vsel %vm1678_vm9, %v7819_v54, %v7818_v49  ;;  %7822 = vst [vmem:[#allocation43_spill] sm:$0xff] %v5714_v40  ;;  %v2316_v22 = vmul.f32 %v5059_v30, %v5547_v32  ;;  %v2386_v63 = vmul.f32 %v5016_v7, %v5333_v27  ;;  %v1724_v49 = vmul.f32 %v5131_v2, %v5479_v12  ;;  %v703_v54 = vpop.f32.mrb[31].mxu0  ;;  %v5736_v39 = vld [vmem:[#allocation2 + $0xc8] sm:$0xff] }
 0x133   : > { %7820 = vst [vmem:[#allocation41_spill] sm:$0xff] %v5703_v45  ;;  %v2456_v11 = vmul.f32 %v5526_v50, %v5617_v15  ;;  %762 = vst.msk [vmem:[#allocation2 + $0xf0] sm:$0xff] %vm731_vm14, %v709_v23  ;;  %v1842_v32 = vmul.f32 %v4999_v56, %v5695_v46  ;;  %v1870_v27 = vadd.f32 %v5442_v58, %v5608_v35  ;;  %v1523_v2 = vrot.slane %v5705_v26, 7 }
 0x134   : > { %760 = vst.msk [vmem:[#allocation2 + $0xe0] sm:$0xff] %vm731_vm14, %v701_v13  ;;  %v1524_v29 = vrot.slane %v5723_v18, 7  ;;  %v2348_v55 = vadd.f32 %v2316_v22, %v2278_v14  ;;  %1760 = vst.msk [vmem:[#allocation4 + $0x48] sm:$0xff] %vm731_vm14, %v1724_v49  ;;  %v1545_v23 = vsel %vm1533_vm8, %v1520_v24, %v1521_v36  ;;  %v7705_v13 = vrot.slane %v5714_v40, 1 }
 0x135   : > { %v1522_v52 = vrot.slane %v5736_v39, 7  ;;  %v7706_v35 = vrot.slane %v5736_v39, 1  ;;  %v1594_v25 = vmul.f32 %v5128_v1, %v1545_v23  ;;  %v1874_v45 = vadd.f32 %v5442_v58, %v1842_v32  ;;  %v4393_v1 = vpop.f32.mrb[32].mxu0 }
 0x136   : > { %v1542_v12 = vsel %vm1533_vm8, %v1523_v2, %v1524_v29  ;;  %v2418_v43 = vadd.f32 %v2386_v63, %v2348_v55  ;;  %v1942_v22 = vmul.f32 %v4965_v37, %v5426_v51  ;;  %v1970_v49 = vadd.f32 %v5418_v44, %v1870_v27 }
 0x137   : > { %1633 = vst.msk [vmem:[#allocation3 + $0xd8] sm:$0xff] %vm731_vm14, %v1542_v12  ;;  %v1543_v14 = vsel %vm1533_vm8, %v1522_v52, %v1523_v2  ;;  %v1544_v24 = vsel %vm1533_vm8, %v1521_v36, %v1522_v52  ;;  %1630 = vst.msk [vmem:[#allocation3 + $0xc0] sm:$0xff] %vm731_vm14, %v1594_v25  ;;  %v2248_v2 = vmul.f32 %v5009_v62, %v5617_v15  ;;  %v716_v52 = vpop.f32.mrb[33].mxu0  ;;  %v7824_v36 = vrot.slane %v5649_v33, 1 }
 0x138   : > { %v1596_v32 = vmul.f32 %v5136_v3, %v1543_v14  ;;  %1631 = vst.msk [vmem:[#allocation3 + $0xc8] sm:$0xff] %vm731_vm14, %v1544_v24  ;;  %v5762_v12 = vadd.f32 %v2456_v11, %v2418_v43  ;;  %v7825_v25 = vrot.slane %v5705_v26, 1  ;;  %v1974_v15 = vadd.f32 %v1942_v22, %v1874_v45  ;;  %v5781_v11 = vpop.f32.mrb[34].mxu0  ;;  %v1808_v22 = vld [vmem:[#allocation3 + $0x58] sm:$0xff] }
 0x139   : > { %v5770_v44 = vsel %vm1678_vm9, %v7824_v36, %v7705_v13  ;;  %v2070_v43 = vadd.f32 %v5668_v6, %v1970_v49  ;;  %v712_v14 = vadd.f32 %v4390_v42, %v5113_v60  ;;  %v704_v24 = vadd.f32 %v5113_v60, %v703_v54  ;;  %v5794_v6 = vpop.f32.mrb[35].mxu0 }
 0x13a   : > { %7823 = vst [vmem:[#allocation44_spill] sm:$0xff] %v5762_v12  ;;  %v5778_v3 = vsel %vm1678_vm9, %v7706_v35, %v7825_v25  ;;  %1632 = vst.msk [vmem:[#allocation3 + $0xd0] sm:$0xff] %vm731_vm14, %v1596_v32  ;;  %v2526_v27 = vsel %vm731_vm14, %v5762_v12, 0.0  ;;  %v5786_v55 = vld [vmem:[#allocation2 + $0xf0] sm:$0xff]  ;;  %v1726_v45 = vmul.f32 %v5144_v5, %v5555_v47  ;;  %v2110_v25 = vmul.f32 %v5006_v61, %v5695_v46 }
 0x13b   : > { %v5788_v23 = vld [vmem:[#allocation2 + $0xe0] sm:$0xff]  ;;  %2527 = vadd.xlane.f32.xlu1 %v2526_v27  ;;  %v2006_v36 = vld [vmem:[#allocation4 + $0x48] sm:$0xff]  ;;  %v2180_v42 = vmul.f32 %v4968_v38, %v5426_v51  ;;  %v1527_v54 = vrot.slane %v5786_v55, 7  ;;  %v2140_v13 = vadd.f32 %v5709_v0, %v2070_v43  ;;  %v2318_v5 = vmul.f32 %v5059_v30, %v5695_v46  ;;  %763 = vst.msk [vmem:[#allocation2 + $0xf8] sm:$0xff] %vm731_vm14, %v712_v14 }
 0x13c   : > { %7826 = vst [vmem:[#allocation45_spill] sm:$0xff] %v5788_v23  ;;  %v1525_v49 = vrot.slane %v5788_v23, 7  ;;  %v2388_v47 = vmul.f32 %v5016_v7, %v5426_v51  ;;  %761 = vst.msk [vmem:[#allocation2 + $0xe8] sm:$0xff] %vm731_vm14, %v704_v24  ;;  %v2042_v63 = vmul.f32 %v5002_v57, %v2006_v36  ;;  %v1844_v0 = vmul.f32 %v4999_v56, %v1808_v22  ;;  %v1810_v24 = vld [vmem:[#allocation3 + $0x68] sm:$0xff] }
 0x13d   : > { %1762 = vst.msk [vmem:[#allocation4 + $0x58] sm:$0xff] %vm731_vm14, %v1726_v45  ;;  %v2210_v43 = vadd.f32 %v5470_v31, %v2140_v13  ;;  %v2250_v32 = vmul.f32 %v5009_v62, %v2006_v36  ;;  %v2458_v14 = vmul.f32 %v5526_v50, %v2006_v36  ;;  %v7827_v45 = vrot.slane %v5788_v23, 1 }
 0x13e   : > { %v1541_v35 = vsel %vm1533_vm8, %v1524_v29, %v1525_v49  ;;  %v7828_v27 = vrot.slane %v5723_v18, 1  ;;  %v1876_v12 = vadd.f32 %v5442_v58, %v1844_v0  ;;  %v2142_v31 = vadd.f32 %v2110_v25, %v5680_v16 }
 0x13f   : > { %v1598_v46 = vmul.f32 %v5141_v4, %v1541_v35  ;;  %v1944_v4 = vmul.f32 %v4965_v37, %v5413_v20  ;;  %v2074_v13 = vadd.f32 %v2042_v63, %v1974_v15  ;;  %v2280_v35 = vadd.f32 %v2248_v2, %v2210_v43 }
 0x140   : > { %v5826_v29 = vsel %vm1678_vm9, %v7828_v27, %v7827_v45  ;;  %v725_v36 = vadd.f32 %v4393_v1, %v5113_v60  ;;  %v717_v23 = vadd.f32 %v5113_v60, %v716_v52  ;;  %v2112_v26 = vmul.f32 %v5006_v61, %v1808_v22 }
 0x141   : > { %1634 = vst.msk [vmem:[#allocation3 + $0xe0] sm:$0xff] %vm731_vm14, %v1598_v46  ;;  %v2212_v40 = vadd.f32 %v2180_v42, %v2142_v31  ;;  %v1728_v27 = vmul.f32 %v5168_v41, %v5573_v59  ;;  %v1846_v0 = vmul.f32 %v4999_v56, %v1810_v24  ;;  %v2350_v45 = vadd.f32 %v2318_v5, %v2280_v35 }
 0x142   : > { %v2182_v16 = vmul.f32 %v4968_v38, %v5413_v20  ;;  %v2320_v25 = vmul.f32 %v5059_v30, %v1808_v22  ;;  %v2390_v63 = vmul.f32 %v5016_v7, %v5413_v20  ;;  %766 = vst.msk [vmem:[#allocation2 + $0x110] sm:$0xff] %vm731_vm14, %v725_v36  ;;  %764 = vst.msk [vmem:[#allocation2 + $0x100] sm:$0xff] %vm731_vm14, %v717_v23  ;;  %v5846_v1 = vld [vmem:[#allocation2 + $0xf8] sm:$0xff] }
 0x143   : > { %v5848_v2 = vld [vmem:[#allocation2 + $0xe8] sm:$0xff]  ;;  %v1976_v41 = vadd.f32 %v1944_v4, %v1876_v12  ;;  %v2282_v52 = vadd.f32 %v2250_v32, %v2212_v40  ;;  %774 = vst.msk [vmem:[#allocation2 + $0x110] sm:$0xff] %vm731_vm14, %v7787_v17  ;;  %1764 = vst.msk [vmem:[#allocation4 + $0x68] sm:$0xff] %vm731_vm14, %v1728_v27  ;;  %v1946_v15 = vmul.f32 %v4965_v37, %v5513_v8  ;;  %v1528_v23 = vrot.slane %v5846_v1, 7 }
 0x144   : > { %v2008_v59 = vld [vmem:[#allocation4 + $0x58] sm:$0xff]  ;;  %v2114_v22 = vmul.f32 %v5006_v61, %v1810_v24  ;;  %v2420_v42 = vadd.f32 %v2388_v47, %v2350_v45  ;;  %v1526_v5 = vrot.slane %v5848_v2, 7  ;;  %v2144_v46 = vadd.f32 %v2112_v26, %v2074_v13 }
 0x145   : > { %v2044_v12 = vmul.f32 %v5002_v57, %v2008_v59  ;;  %v2352_v43 = vadd.f32 %v2320_v25, %v2282_v52  ;;  %v1878_v40 = vadd.f32 %v5442_v58, %v1846_v0  ;;  %v2184_v32 = vmul.f32 %v4968_v38, %v5513_v8 }
 0x146   : > { %v5862_v4 = vadd.f32 %v2458_v14, %v2420_v42  ;;  %v1538_v31 = vsel %vm1533_vm8, %v1527_v54, %v1528_v23  ;;  %v1539_v47 = vsel %vm1533_vm8, %v1526_v5, %v1527_v54  ;;  %v1540_v35 = vsel %vm1533_vm8, %v1525_v49, %v1526_v5 }
 0x147   : > { %1637 = vst.msk [vmem:[#allocation3 + $0xf8] sm:$0xff] %vm731_vm14, %v1538_v31  ;;  %v1600_v26 = vmul.f32 %v5189_v48, %v1539_v47  ;;  %1635 = vst.msk [vmem:[#allocation3 + $0xe8] sm:$0xff] %vm731_vm14, %v1540_v35  ;;  %v7713_v13 = vrot.slane %v5848_v2, 1  ;;  %v2422_v36 = vadd.f32 %v2390_v63, %v2352_v43  ;;  %v2322_v14 = vmul.f32 %v5059_v30, %v1810_v24  ;;  %v1812_v43 = vld [vmem:[#allocation3 + $0x78] sm:$0xff] }
 0x148   : > { %7829 = vst [vmem:[#allocation46_spill] sm:$0xff] %v5862_v4  ;;  %v2532_v27 = vsel %vm731_vm14, %v5862_v4, 0.0  ;;  %v2252_v0 = vmul.f32 %v5009_v62, %v2008_v59  ;;  %v2460_v54 = vmul.f32 %v5526_v50, %v2008_v59  ;;  %v2214_v45 = vadd.f32 %v2182_v16, %v2144_v46 }
 0x149   : > { %2533 = vadd.xlane.f32.xlu1 %v2532_v27  ;;  %v7712_v49 = vrot.slane %v5846_v1, 1  ;;  %1636 = vst.msk [vmem:[#allocation3 + $0xf0] sm:$0xff] %vm731_vm14, %v1600_v26  ;;  %v5881_v48 = vld [vmem:[#allocation2 + $0x100] sm:$0xff]  ;;  %v728_v25 = vadd.f32 %v5781_v11, %v5113_v60  ;;  %v720_v24 = vadd.f32 %v5113_v60, %v5794_v6  ;;  %v1730_v63 = vmul.f32 %v5200_v10, %v5625_v34  ;;  %v1814_v27 = vld [vmem:[#allocation3 + $0x88] sm:$0xff] }
 0x14a   : > { %v2076_v52 = vadd.f32 %v2044_v12, %v1976_v41  ;;  %v5889_v42 = vadd.f32 %v2460_v54, %v2422_v36  ;;  %v5891_v16 = vld [vmem:[#allocation2 + $0x110] sm:$0xff]  ;;  %v1529_v59 = vrot.slane %v5881_v48, 7  ;;  %v2010_v5 = vld [vmem:[#allocation4 + $0x68] sm:$0xff]  ;;  %v2284_v46 = vadd.f32 %v2252_v0, %v2214_v45 }
 0x14b   : > { %v7831_v31 = vrot.slane %v5786_v55, 1  ;;  %v7711_v10 = vrot.slane %v5881_v48, 1  ;;  %v1978_v34 = vadd.f32 %v1946_v15, %v1878_v40  ;;  %v2392_v11 = vmul.f32 %v5016_v7, %v5513_v8  ;;  %767 = vst.msk [vmem:[#allocation2 + $0x118] sm:$0xff] %vm731_vm14, %v728_v25  ;;  %765 = vst.msk [vmem:[#allocation2 + $0x108] sm:$0xff] %vm731_vm14, %v720_v24  ;;  %v7832_v40 = vld [vmem:[#allocation8_spill] sm:$0xff] }
 0x14c   : > { %7830 = vst [vmem:[#allocation47_spill] sm:$0xff] %v5889_v42  ;;  %1766 = vst.msk [vmem:[#allocation4 + $0x78] sm:$0xff] %vm731_vm14, %v1730_v63  ;;  %v2538_v6 = vsel %vm731_vm14, %v5889_v42, 0.0  ;;  %v1531_v41 = vrot.slane %v5891_v16, 7  ;;  %v1537_v12 = vsel %vm1533_vm8, %v1528_v23, %v1529_v59  ;;  %v2354_v47 = vadd.f32 %v2322_v14, %v2284_v46  ;;  %v7839_v42 = vld [vmem:[#allocation9_spill] sm:$0xff] }
 0x14d   : > { %v5900_v60 = vsel %vm1678_vm9, %v7713_v13, %v7831_v31  ;;  %775 = vst.msk [vmem:[#allocation2 + $0x118] sm:$0xff] %vm731_vm14, %v7787_v17  ;;  %2539 = vadd.xlane.f32.xlu1 %v2538_v6  ;;  %v1602_v35 = vmul.f32 %v7832_v40, %v1537_v12  ;;  %v2046_v26 = vmul.f32 %v5002_v57, %v2010_v5  ;;  %v1816_v13 = vld [vmem:[#allocation3 + $0x98] sm:$0xff] }
 0x14e   : > { %v1848_v36 = vmul.f32 %v4999_v56, %v1812_v43  ;;  %v2254_v0 = vmul.f32 %v5009_v62, %v2010_v5  ;;  %v2424_v54 = vadd.f32 %v2392_v11, %v2354_v47  ;;  %v2462_v45 = vmul.f32 %v5526_v50, %v2010_v5 }
 0x14f   : > { %v2146_v23 = vadd.f32 %v2114_v22, %v2076_v52  ;;  %v5927_v14 = vsel %vm1678_vm9, %v7712_v49, %v7711_v10  ;;  %1638 = vst.msk [vmem:[#allocation3 + $0x100] sm:$0xff] %vm731_vm14, %v1602_v35  ;;  %v2078_v25 = vadd.f32 %v2046_v26, %v1978_v34  ;;  %v1948_v63 = vmul.f32 %v4965_v37, %v5497_v9  ;;  %v7834_v22 = vld [vmem:[#allocation10_spill] sm:$0xff]  ;;  %v7835_v26 = vld [vmem:[#allocation36_spill] sm:$0xff] }
 0x150   : > { %v1880_v24 = vadd.f32 %v5442_v58, %v1848_v36  ;;  %v5933_v46 = vadd.f32 %v2462_v45, %v2424_v54  ;;  %v1732_v52 = vmul.f32 %v7834_v22, %v5638_v53  ;;  %v1850_v31 = vmul.f32 %v4999_v56, %v1814_v27 }
 0x151   : > { %v2216_v5 = vadd.f32 %v2184_v32, %v2146_v23  ;;  %v2116_v11 = vmul.f32 %v5006_v61, %v1812_v43  ;;  %v2186_v6 = vmul.f32 %v4968_v38, %v5497_v9  ;;  %v2324_v34 = vmul.f32 %v5059_v30, %v1812_v43 }
 0x152   : > { %7833 = vst [vmem:[#allocation8_spill] sm:$0xff] %v5933_v46  ;;  %v2394_v12 = vmul.f32 %v5016_v7, %v5497_v9  ;;  %v2544_v47 = vsel %vm731_vm14, %v5933_v46, 0.0  ;;  %v5946_v40 = vld [vmem:[#allocation2 + $0x108] sm:$0xff]  ;;  %v1980_v32 = vadd.f32 %v1948_v63, %v1880_v24  ;;  %1768 = vst.msk [vmem:[#allocation4 + $0x88] sm:$0xff] %vm731_vm14, %v1732_v52  ;;  %v1950_v36 = vmul.f32 %v4965_v37, %v7835_v26 }
 0x153   : > { %v2012_v35 = vld [vmem:[#allocation4 + $0x78] sm:$0xff]  ;;  %v2286_v53 = vadd.f32 %v2254_v0, %v2216_v5  ;;  %2545 = vadd.xlane.f32.xlu1 %v2544_v47  ;;  %v1530_v43 = vrot.slane %v5946_v40, 7  ;;  %v2118_v23 = vmul.f32 %v5006_v61, %v1814_v27  ;;  %v2148_v22 = vadd.f32 %v2116_v11, %v2078_v25  ;;  %v7836_v11 = vld [vmem:[#allocation13_spill] sm:$0xff] }
 0x154   : > { %v5951_v54 = vld [vmem:[#allocation2 + $0x118] sm:$0xff]  ;;  %v2048_v45 = vmul.f32 %v5002_v57, %v2012_v35  ;;  %v1882_v0 = vadd.f32 %v5442_v58, %v1850_v31  ;;  %v2188_v63 = vmul.f32 %v4968_v38, %v7835_v26  ;;  %v2464_v49 = vmul.f32 %v5526_v50, %v2012_v35 }
 0x155   : > { %v1532_v10 = vrot.slane %v5951_v54, 7  ;;  %v2356_v24 = vadd.f32 %v2324_v34, %v2286_v53  ;;  %v1535_v5 = vsel %vm1533_vm8, %v1530_v43, %v1531_v41  ;;  %v1536_v52 = vsel %vm1533_vm8, %v1529_v59, %v1530_v43  ;;  %v7838_v53 = vld [vmem:[#allocation11_spill] sm:$0xff] }
 0x156   : > { %v2080_v47 = vadd.f32 %v2048_v45, %v1980_v32  ;;  %v7837_v34 = vrot.slane %v7836_v11, 7  ;;  %v1604_v15 = vmul.f32 %v7838_v53, %v1535_v5  ;;  %1639 = vst.msk [vmem:[#allocation3 + $0x108] sm:$0xff] %vm731_vm14, %v1536_v52  ;;  %v7717_v59 = vrot.slane %v5946_v40, 1 }
 0x157   : > { %v1534_v25 = vsel %vm1533_vm8, %v1531_v41, %v1532_v10  ;;  %v2426_v46 = vadd.f32 %v2394_v12, %v2356_v24  ;;  %v2256_v32 = vmul.f32 %v5009_v62, %v2012_v35  ;;  %v2218_v43 = vadd.f32 %v2186_v6, %v2148_v22 }
 0x158   : > { %v1569_v31 = vsel %vm1533_vm8, %v1532_v10, %v7837_v34  ;;  %1641 = vst.msk [vmem:[#allocation3 + $0x118] sm:$0xff] %vm731_vm14, %v1534_v25  ;;  %1640 = vst.msk [vmem:[#allocation3 + $0x110] sm:$0xff] %vm731_vm14, %v1604_v15  ;;  %v1982_v45 = vadd.f32 %v1950_v36, %v1882_v0  ;;  %v7841_v10 = vld [vmem:[#allocation12_spill] sm:$0xff]  ;;  %v1852_v52 = vmul.f32 %v4999_v56, %v1816_v13  ;;  %v7842_v34 = vld [vmem:[#allocation41_spill] sm:$0xff] }
 0x159   : > { %v1570_v4 = vmul.f32 %v7839_v42, %v1569_v31  ;;  %v5978_v41 = vadd.f32 %v2464_v49, %v2426_v46  ;;  %v1734_v5 = vmul.f32 %v7841_v10, %v5688_v19  ;;  %v2014_v12 = vld [vmem:[#allocation4 + $0x88] sm:$0xff]  ;;  %v2288_v24 = vadd.f32 %v2256_v32, %v2218_v43  ;;  %v7843_v31 = vld [vmem:[#allocation14_spill] sm:$0xff] }
 0x15a   : > { %v2326_v25 = vmul.f32 %v5059_v30, %v1814_v27  ;;  %v2150_v35 = vadd.f32 %v2118_v23, %v2080_v47  ;;  %v2050_v49 = vmul.f32 %v5002_v57, %v2014_v12  ;;  %v2396_v46 = vmul.f32 %v5016_v7, %v7835_v26 }
 0x15b   : > { %7840 = vst [vmem:[#allocation10_spill] sm:$0xff] %v5978_v41  ;;  %1606 = vst.msk [vmem:[#allocation3] sm:$0xff] %vm731_vm14, %v1570_v4  ;;  %v2550_v15 = vsel %vm731_vm14, %v5978_v41, 0.0  ;;  %v1952_v19 = vmul.f32 %v4965_v37, %v5577_v28  ;;  %v1818_v4 = vld [vmem:[#allocation3 + $0xa8] sm:$0xff]  ;;  %v2258_v6 = vmul.f32 %v5009_v62, %v2014_v12  ;;  %v1884_v27 = vadd.f32 %v5442_v58, %v1852_v52 }
 0x15c   : > { %1770 = vst.msk [vmem:[#allocation4 + $0x98] sm:$0xff] %vm731_vm14, %v1734_v5  ;;  %2551 = vadd.xlane.f32.xlu1 %v2550_v15  ;;  %v2358_v36 = vadd.f32 %v2326_v25, %v2288_v24  ;;  %v2220_v23 = vadd.f32 %v2188_v63, %v2150_v35  ;;  %v2082_v22 = vadd.f32 %v2050_v49, %v1982_v45  ;;  %v1820_v15 = vld [vmem:[#allocation3 + $0xb8] sm:$0xff]  ;;  %v7844_v24 = vrot.slane %v5891_v16, 1 }
 0x15d   : > { %v2466_v0 = vmul.f32 %v5526_v50, %v2014_v12  ;;  %v2120_v47 = vmul.f32 %v5006_v61, %v1816_v13  ;;  %v1736_v53 = vmul.f32 %v7843_v31, %v7842_v34  ;;  %v2328_v10 = vmul.f32 %v5059_v30, %v1816_v13 }
 0x15e   : > { %v2428_v32 = vadd.f32 %v2396_v46, %v2358_v36  ;;  %v2290_v43 = vadd.f32 %v2258_v6, %v2220_v23  ;;  %v1854_v5 = vmul.f32 %v4999_v56, %v1818_v4  ;;  %v6008_v63 = vsel %vm1678_vm9, %v7717_v59, %v7844_v24  ;;  %v7846_v46 = vld [vmem:[#allocation40_spill] sm:$0xff]  ;;  %v7847_v23 = vld [vmem:[#allocation15_spill] sm:$0xff] }
 0x15f   : > { %v2190_v45 = vmul.f32 %v4968_v38, %v5577_v28  ;;  %v2398_v52 = vmul.f32 %v5016_v7, %v5577_v28  ;;  %1772 = vst.msk [vmem:[#allocation4 + $0xa8] sm:$0xff] %vm731_vm14, %v1736_v53  ;;  %v2152_v13 = vadd.f32 %v2120_v47, %v2082_v22  ;;  %v1984_v25 = vadd.f32 %v1952_v19, %v1884_v27 }
 0x160   : > { %v6015_v12 = vadd.f32 %v2466_v0, %v2428_v32  ;;  %v2360_v35 = vadd.f32 %v2328_v10, %v2290_v43  ;;  %v1886_v49 = vadd.f32 %v5442_v58, %v1854_v5  ;;  %v1954_v6 = vmul.f32 %v4965_v37, %v7846_v46  ;;  %v1822_v43 = vld [vmem:[#allocation3 + $0xc8] sm:$0xff] }
 0x161   : > { %v2222_v36 = vadd.f32 %v2190_v45, %v2152_v13  ;;  %v1738_v34 = vmul.f32 %v7847_v23, %v5770_v44  ;;  %v1856_v31 = vmul.f32 %v4999_v56, %v1820_v15  ;;  %v2122_v0 = vmul.f32 %v5006_v61, %v1818_v4 }
 0x162   : > { %7845 = vst [vmem:[#allocation36_spill] sm:$0xff] %v6015_v12  ;;  %v2556_v24 = vsel %vm731_vm14, %v6015_v12, 0.0  ;;  %v2430_v22 = vadd.f32 %v2398_v52, %v2360_v35  ;;  %v2192_v19 = vmul.f32 %v4968_v38, %v7846_v46  ;;  %v2330_v44 = vmul.f32 %v5059_v30, %v1818_v4 }
 0x163   : > { %v2016_v53 = vld [vmem:[#allocation4 + $0x98] sm:$0xff]  ;;  %2557 = vadd.xlane.f32.xlu1 %v2556_v24  ;;  %1774 = vst.msk [vmem:[#allocation4 + $0xb8] sm:$0xff] %vm731_vm14, %v1738_v34  ;;  %v1986_v10 = vadd.f32 %v1954_v6, %v1886_v49  ;;  %v2400_v5 = vmul.f32 %v5016_v7, %v7846_v46  ;;  %v1888_v45 = vadd.f32 %v5442_v58, %v1856_v31  ;;  %v7849_v6 = vld [vmem:[#allocation16_spill] sm:$0xff] }
 0x164   : > { %v2052_v27 = vmul.f32 %v5002_v57, %v2016_v53  ;;  %v2260_v47 = vmul.f32 %v5009_v62, %v2016_v53  ;;  %v2468_v32 = vmul.f32 %v5526_v50, %v2016_v53  ;;  %v1956_v52 = vmul.f32 %v4965_v37, %v5649_v33 }
 0x165   : > { %v2124_v24 = vmul.f32 %v5006_v61, %v1820_v15  ;;  %v2194_v4 = vmul.f32 %v4968_v38, %v5649_v33  ;;  %v2332_v49 = vmul.f32 %v5059_v30, %v1820_v15  ;;  %v1740_v34 = vmul.f32 %v7849_v6, %v5778_v3 }
 0x166   : > { %v2084_v13 = vadd.f32 %v2052_v27, %v1984_v25  ;;  %v6038_v35 = vadd.f32 %v2468_v32, %v2430_v22  ;;  %v2292_v23 = vadd.f32 %v2260_v47, %v2222_v36  ;;  %v2018_v53 = vld [vmem:[#allocation4 + $0xa8] sm:$0xff]  ;;  %v1858_v31 = vmul.f32 %v4999_v56, %v1822_v43  ;;  %v1824_v27 = vld [vmem:[#allocation3 + $0xd8] sm:$0xff] }
 0x167   : > { %v2054_v25 = vmul.f32 %v5002_v57, %v2018_v53  ;;  %v2402_v36 = vmul.f32 %v5016_v7, %v5649_v33  ;;  %v1988_v47 = vadd.f32 %v1956_v52, %v1888_v45  ;;  %1776 = vst.msk [vmem:[#allocation4 + $0xc8] sm:$0xff] %vm731_vm14, %v1740_v34  ;;  %v1958_v3 = vmul.f32 %v4965_v37, %v5736_v39 }
 0x168   : > { %7848 = vst [vmem:[#allocation13_spill] sm:$0xff] %v6038_v35  ;;  %v2562_v59 = vsel %vm731_vm14, %v6038_v35, 0.0  ;;  %v2362_v22 = vadd.f32 %v2330_v44, %v2292_v23  ;;  %v2154_v32 = vadd.f32 %v2122_v0, %v2084_v13  ;;  %v1890_v15 = vadd.f32 %v5442_v58, %v1858_v31 }
 0x169   : > { %2563 = vadd.xlane.f32.xlu1 %v2562_v59  ;;  %v2086_v6 = vadd.f32 %v2054_v25, %v1986_v10  ;;  %v2470_v35 = vmul.f32 %v5526_v50, %v2018_v53  ;;  %v2126_v44 = vmul.f32 %v5006_v61, %v1822_v43  ;;  %v2262_v23 = vmul.f32 %v5009_v62, %v2018_v53  ;;  %v7850_v59 = vld [vmem:[#allocation17_spill] sm:$0xff] }
 0x16a   : > { %v2432_v42 = vadd.f32 %v2400_v5, %v2362_v22  ;;  %v2020_v12 = vld [vmem:[#allocation4 + $0xb8] sm:$0xff]  ;;  %v2224_v41 = vadd.f32 %v2192_v19, %v2154_v32  ;;  %v1742_v0 = vmul.f32 %v7850_v59, %v5826_v29  ;;  %v1860_v45 = vmul.f32 %v4999_v56, %v1824_v27  ;;  %v1826_v29 = vld [vmem:[#allocation3 + $0xe8] sm:$0xff] }
 0x16b   : > { %v2056_v13 = vmul.f32 %v5002_v57, %v2020_v12  ;;  %v2196_v10 = vmul.f32 %v4968_v38, %v5736_v39  ;;  %v2334_v5 = vmul.f32 %v5059_v30, %v1822_v43  ;;  %v1990_v31 = vadd.f32 %v1958_v3, %v1890_v15 }
 0x16c   : > { %v6062_v52 = vadd.f32 %v2470_v35, %v2432_v42  ;;  %v2294_v34 = vadd.f32 %v2262_v23, %v2224_v41  ;;  %v2156_v25 = vadd.f32 %v2124_v24, %v2086_v6  ;;  %v2404_v19 = vmul.f32 %v5016_v7, %v5736_v39  ;;  %1778 = vst.msk [vmem:[#allocation4 + $0xd8] sm:$0xff] %vm731_vm14, %v1742_v0  ;;  %v7851_v23 = vld [vmem:[#allocation18_spill] sm:$0xff] }
 0x16d   : > { %v2088_v35 = vadd.f32 %v2056_v13, %v1988_v47  ;;  %v2264_v53 = vmul.f32 %v5009_v62, %v2020_v12  ;;  %v1892_v22 = vadd.f32 %v5442_v58, %v1860_v45  ;;  %v2472_v41 = vmul.f32 %v5526_v50, %v2020_v12 }
 0x16e   : > { %v2568_v42 = vsel %vm731_vm14, %v6062_v52, 0.0  ;;  %v2364_v32 = vadd.f32 %v2332_v49, %v2294_v34  ;;  %v2226_v43 = vadd.f32 %v2194_v4, %v2156_v25  ;;  %v1960_v24 = vmul.f32 %v4965_v37, %v5723_v18  ;;  %v2022_v15 = vld [vmem:[#allocation4 + $0xc8] sm:$0xff] }
 0x16f   : > { %2569 = vadd.xlane.f32.xlu1 %v2568_v42  ;;  %v2128_v3 = vmul.f32 %v5006_v61, %v1824_v27  ;;  %v2158_v6 = vadd.f32 %v2126_v44, %v2088_v35  ;;  %v1744_v59 = vmul.f32 %v7851_v23, %v5900_v60  ;;  %v1862_v47 = vmul.f32 %v4999_v56, %v1826_v29 }
 0x170   : > { %v2434_v0 = vadd.f32 %v2402_v36, %v2364_v32  ;;  %v2058_v45 = vmul.f32 %v5002_v57, %v2022_v15  ;;  %v2296_v13 = vadd.f32 %v2264_v53, %v2226_v43  ;;  %v2198_v12 = vmul.f32 %v4968_v38, %v5723_v18 }
 0x171   : > { %v2266_v4 = vmul.f32 %v5009_v62, %v2022_v15  ;;  %v1992_v49 = vadd.f32 %v1960_v24, %v1892_v22  ;;  %v2228_v34 = vadd.f32 %v2196_v10, %v2158_v6  ;;  %1780 = vst.msk [vmem:[#allocation4 + $0xe8] sm:$0xff] %vm731_vm14, %v1744_v59  ;;  %v1894_v44 = vadd.f32 %v5442_v58, %v1862_v47  ;;  %v1828_v22 = vld [vmem:[#allocation3 + $0xf8] sm:$0xff] }
 0x172   : > { %v6088_v25 = vadd.f32 %v2472_v41, %v2434_v0  ;;  %v2090_v60 = vadd.f32 %v2058_v45, %v1990_v31  ;;  %v2366_v42 = vadd.f32 %v2334_v5, %v2296_v13  ;;  %v2336_v36 = vmul.f32 %v5059_v30, %v1824_v27  ;;  %v7852_v47 = vld [vmem:[#allocation19_spill] sm:$0xff] }
 0x173   : > { %v2474_v35 = vmul.f32 %v5526_v50, %v2022_v15  ;;  %v2024_v53 = vld [vmem:[#allocation4 + $0xd8] sm:$0xff]  ;;  %v2298_v32 = vadd.f32 %v2266_v4, %v2228_v34  ;;  %v2406_v43 = vmul.f32 %v5016_v7, %v5723_v18  ;;  %v1962_v10 = vmul.f32 %v4965_v37, %v5848_v2 }
 0x174   : > { %v2574_v58 = vsel %vm731_vm14, %v6088_v25, 0.0  ;;  %v2436_v41 = vadd.f32 %v2404_v19, %v2366_v42  ;;  %v2060_v31 = vmul.f32 %v5002_v57, %v2024_v53  ;;  %v2130_v5 = vmul.f32 %v5006_v61, %v1826_v29 }
 0x175   : > { %2575 = vadd.xlane.f32.xlu1 %v2574_v58  ;;  %v2368_v27 = vadd.f32 %v2336_v36, %v2298_v32  ;;  %v1994_v24 = vadd.f32 %v1962_v10, %v1894_v44  ;;  %v2160_v15 = vadd.f32 %v2128_v3, %v2090_v60  ;;  %v2200_v6 = vmul.f32 %v4968_v38, %v5848_v2 }
 0x176   : > { %v6102_v23 = vadd.f32 %v2474_v35, %v2436_v41  ;;  %v2092_v59 = vadd.f32 %v2060_v31, %v1992_v49  ;;  %v1746_v0 = vmul.f32 %v7852_v47, %v5927_v14  ;;  %v1864_v45 = vmul.f32 %v4999_v56, %v1828_v22 }
 0x177   : > { %v2268_v19 = vmul.f32 %v5009_v62, %v2024_v53  ;;  %v2438_v13 = vadd.f32 %v2406_v43, %v2368_v27  ;;  %v2476_v4 = vmul.f32 %v5526_v50, %v2024_v53  ;;  %v2230_v34 = vadd.f32 %v2198_v12, %v2160_v15  ;;  %v6121_v12 = vld [vmem:[%s7678_s4] ss:$0 sm:$0xff]  ;;  %v2098_v27 = vld [vmem:[#allocation3 + $0x108] sm:$0xff] }
 0x178   : > { %v2580_v3 = vsel %vm731_vm14, %v6102_v23, 0.0  ;;  %v2026_v44 = vld [vmem:[#allocation4 + $0xe8] sm:$0xff]  ;;  %v2338_v60 = vmul.f32 %v5059_v30, %v1826_v29  ;;  %v2408_v49 = vmul.f32 %v5016_v7, %v5848_v2  ;;  %1782 = vst.msk [vmem:[#allocation4 + $0xf8] sm:$0xff] %vm731_vm14, %v1746_v0  ;;  %v2162_v14 = vadd.f32 %v2130_v5, %v2092_v59  ;;  %v7853_v0 = vld [vmem:[#allocation22_spill] sm:$0xff] }
 0x179   : > { %2581 = vadd.xlane.f32.xlu1 %v2580_v3  ;;  %v6115_v42 = vadd.f32 %v2476_v4, %v2438_v13  ;;  %v2062_v36 = vmul.f32 %v5002_v57, %v2026_v44  ;;  %v2300_v35 = vadd.f32 %v2268_v19, %v2230_v34  ;;  %v1896_v53 = vadd.f32 %v6121_v12, %v1864_v45  ;;  %v1797_v19 = vld [vmem:[#allocation3] sm:$0xff] }
 0x17a   : > { %v2270_v29 = vmul.f32 %v5009_v62, %v2026_v44  ;;  %v1964_v32 = vmul.f32 %v4965_v37, %v5846_v1  ;;  %v2132_v43 = vmul.f32 %v5006_v61, %v1828_v22  ;;  %v2232_v10 = vadd.f32 %v2200_v6, %v2162_v14 }
 0x17b   : > { %v2094_v58 = vadd.f32 %v2062_v36, %v1994_v24  ;;  %v2370_v41 = vadd.f32 %v2338_v60, %v2300_v35  ;;  %v2478_v31 = vmul.f32 %v5526_v50, %v2026_v44  ;;  %v2202_v5 = vmul.f32 %v4968_v38, %v5846_v1  ;;  %v1897_v44 = vld [vmem:[#allocation2] sm:$0xff] }
 0x17c   : > { %v2586_v15 = vsel %vm731_vm14, %v6115_v42, 0.0  ;;  %v2302_v59 = vadd.f32 %v2270_v29, %v2232_v10  ;;  %v2340_v47 = vmul.f32 %v5059_v30, %v1828_v22  ;;  %v1748_v45 = vmul.f32 %v7853_v0, %v6008_v63  ;;  %v1997_v29 = vld [vmem:[#allocation4] sm:$0xff] }
 0x17d   : > { %2587 = vadd.xlane.f32.xlu1 %v2586_v15  ;;  %v2440_v6 = vadd.f32 %v2408_v49, %v2370_v41  ;;  %v1996_v24 = vadd.f32 %v1964_v32, %v1896_v53  ;;  %v2410_v50 = vmul.f32 %v5016_v7, %v5846_v1  ;;  %v2164_v13 = vadd.f32 %v2132_v43, %v2094_v58  ;;  %v6156_v58 = vld [vmem:[%s7677_s3 + $0x8] ss:$0 sm:$0xff] }
 0x17e   : > { %v2372_v4 = vadd.f32 %v2340_v47, %v2302_v59  ;;  %1784 = vst.msk [vmem:[#allocation4 + $0x108] sm:$0xff] %vm731_vm14, %v1748_v45  ;;  %v2134_v34 = vmul.f32 %v5006_v61, %v2098_v27  ;;  %v2342_v3 = vmul.f32 %v5059_v30, %v2098_v27  ;;  %v848_v22 = vadd.s32 280, %v4949_v21 }
 0x17f   : > { %v6142_v60 = vadd.f32 %v2478_v31, %v2440_v6  ;;  %v2028_v63 = vld [vmem:[#allocation4 + $0xf8] sm:$0xff]  ;;  %v2234_v14 = vadd.f32 %v2202_v5, %v2164_v13  ;;  %v7854_v49 = vrot.slane %v7836_v11, 1  ;;  %v7855_v36 = vrot.slane %v5951_v54, 1 }
 0x180   : > { %v1833_v53 = vmul.f32 %v4999_v56, %v1797_v19  ;;  %v2064_v32 = vmul.f32 %v5002_v57, %v2028_v63  ;;  %v2272_v43 = vmul.f32 %v5009_v62, %v2028_v63  ;;  %v2442_v10 = vadd.f32 %v2410_v50, %v2372_v4  ;;  %v2308_v5 = vld [vmem:[#allocation3 + $0x118] sm:$0xff] }
 0x181   : > { %v1714_v35 = vsel %vm1678_vm9, %v7855_v36, %v7854_v49  ;;  %v2480_v11 = vmul.f32 %v6156_v58, %v2028_v63  ;;  %v2592_v41 = vsel %vm731_vm14, %v6142_v60, 0.0  ;;  %v1098_v31 = vand.u32 15, %v848_v22  ;;  %v1898_v63 = vld [vmem:[#allocation2 + $0x8] sm:$0xff] }
 0x182   : > { %v1865_v27 = vadd.f32 %v6121_v12, %v1833_v53  ;;  %v1933_v15 = vmul.f32 %v4965_v37, %v1897_v44  ;;  %2593 = vadd.xlane.f32.xlu1 %v2592_v41  ;;  %v2096_v59 = vadd.f32 %v2064_v32, %v1996_v24  ;;  %v2304_v0 = vadd.f32 %v2272_v43, %v2234_v14  ;;  %v1798_v24 = vld [vmem:[#allocation3 + $0x8] sm:$0xff] }
 0x183   : > { %v6163_v47 = vadd.f32 %v2480_v11, %v2442_v10  ;;  %v2033_v45 = vmul.f32 %v5002_v57, %v1997_v29  ;;  %v2204_v19 = vmul.f32 %v4968_v38, %v5946_v40  ;;  %v2412_v6 = vmul.f32 %v5016_v7, %v5946_v40  ;;  %v4702_v29 = vld [vmem:[#allocation3 + $0x10] sm:$0xff] }
 0x184   : > { %vm1424_vm8 = vcmp.lt.s32.totalorder %v1098_v31, 15  ;;  %v1965_v50 = vadd.f32 %v1933_v15, %v1865_v27  ;;  %v2374_v13 = vadd.f32 %v2342_v3, %v2304_v0  ;;  %v2166_v22 = vadd.f32 %v2134_v34, %v2096_v59  ;;  %v1998_v31 = vld [vmem:[#allocation4 + $0x8] sm:$0xff]  ;;  %v4703_v15 = vld [vmem:[#allocation4 + $0x10] sm:$0xff]  ;;  %v4704_v0 = vld [vmem:[#allocation3 + $0x20] sm:$0xff] }
 0x185   : > { %v4292_v4 = vsel %vm1424_vm8, 1.0, %v7787_v17  ;;  %v2344_v44 = vmul.f32 %v5059_v30, %v2308_v5  ;;  %v2598_v14 = vsel %vm731_vm14, %v6163_v47, 0.0  ;;  %v2238_v49 = vld [vmem:[#allocation4 + $0x108] sm:$0xff]  ;;  %v2103_v32 = vmul.f32 %v4702_v29, %v5006_v61 }
 0x186   : > { %v1750_v36 = vmul.f32 %v4292_v4, %v1714_v35  ;;  %v2065_v53 = vadd.f32 %v2033_v45, %v1965_v50  ;;  %2599 = vadd.xlane.f32.xlu1 %v2598_v14  ;;  %v2274_v43 = vmul.f32 %v5009_v62, %v2238_v49  ;;  %v2444_v3 = vadd.f32 %v2412_v6, %v2374_v13  ;;  %v7857_v6 = vld [vmem:[#allocation20_spill] sm:$0xff] }
 0x187   : > { %v2482_v17 = vmul.f32 %v6156_v58, %v2238_v49  ;;  %v2236_v34 = vadd.f32 %v2204_v19, %v2166_v22  ;;  %v2414_v10 = vmul.f32 %v5016_v7, %v5951_v54  ;;  %v1834_v41 = vmul.f32 %v4999_v56, %v1798_v24  ;;  %v1805_v19 = vld [vmem:[#allocation3 + $0x40] sm:$0xff] }
 0x188   : > { %1786 = vst.msk [vmem:[#allocation4 + $0x118] sm:$0xff] %vm731_vm14, %v1750_v36  ;;  %v2135_v11 = vadd.f32 %v2103_v32, %v2065_v53  ;;  %v1934_v35 = vmul.f32 %v4965_v37, %v1898_v63  ;;  %v2243_v59 = vmul.f32 %v4703_v15, %v5009_v62  ;;  %v2313_v45 = vmul.f32 %v4704_v0, %v5059_v30  ;;  %v4705_v13 = vld [vmem:[#allocation2 + $0x20] sm:$0xff]  ;;  %v4707_v53 = vld [vmem:[#allocation3 + $0x18] sm:$0xff]  ;;  %v4710_v0 = vld [vmem:[#allocation2 + $0x28] sm:$0xff] }
 0x189   : > { %v6182_v5 = vadd.f32 %v2482_v17, %v2444_v3  ;;  %v2306_v27 = vadd.f32 %v2274_v43, %v2236_v34  ;;  %v2383_v4 = vmul.f32 %v4705_v13, %v5016_v7  ;;  %v4706_v22 = vld [vmem:[#allocation4 + $0x20] sm:$0xff]  ;;  %v1866_v63 = vadd.f32 %v6121_v12, %v1834_v41  ;;  %v7859_v17 = vld [vmem:[#allocation26_spill] sm:$0xff]  ;;  %v4708_v15 = vld [vmem:[#allocation4 + $0x18] sm:$0xff] }
 0x18a   : > { %v2205_v50 = vadd.f32 %v7857_v6, %v2135_v11  ;;  %v2453_v24 = vmul.f32 %v4706_v22, %v6156_v58  ;;  %v2034_v36 = vmul.f32 %v5002_v57, %v1998_v31  ;;  %v2104_v29 = vmul.f32 %v4707_v53, %v5006_v61 }
 0x18b   : > { %7856 = vst [vmem:[#allocation11_spill] sm:$0xff] %v6182_v5  ;;  %v2604_v14 = vsel %vm731_vm14, %v6182_v5, 0.0  ;;  %v2376_v49 = vadd.f32 %v2344_v44, %v2306_v27  ;;  %v1966_v43 = vadd.f32 %v1934_v35, %v1866_v63  ;;  %v7858_v3 = vrot.slane %v5426_v51, 1  ;;  %v4709_v27 = vld [vmem:[#allocation3 + $0x28] sm:$0xff] }
 0x18c   : > { %2605 = vadd.xlane.f32.xlu1 %v2604_v14  ;;  %v2275_v32 = vadd.f32 %v2243_v59, %v2205_v50  ;;  %v7860_v34 = vrot.slane %v7859_v17, 1  ;;  %v1841_v41 = vmul.f32 %v4999_v56, %v1805_v19  ;;  %v2244_v44 = vmul.f32 %v4708_v15, %v5009_v62  ;;  %v7861_v35 = vld [vmem:[#allocation29_spill] sm:$0xff]  ;;  %v1905_v59 = vld [vmem:[#allocation2 + $0x40] sm:$0xff]  ;;  %v1807_v14 = vld [vmem:[#allocation3 + $0x50] sm:$0xff] }
 0x18d   : > { %v2314_v31 = vmul.f32 %v4709_v27, %v5059_v30  ;;  %v2384_v6 = vmul.f32 %v4710_v0, %v5016_v7  ;;  %v1869_v51 = vadd.f32 %v6121_v12, %v7861_v35  ;;  %v2446_v50 = vadd.f32 %v2414_v10, %v2376_v49  ;;  %v7862_v15 = vld [vmem:[#allocation23_spill] sm:$0xff]  ;;  %v7864_v0 = vld [vmem:[#allocation25_spill] sm:$0xff]  ;;  %v7866_v35 = vld [vmem:[#allocation30_spill] sm:$0xff] }
 0x18e   : > { %v1705_v11 = vsel %vm1678_vm9, %v7860_v34, %v7858_v3  ;;  %v2345_v13 = vadd.f32 %v2313_v45, %v2275_v32  ;;  %v2066_v22 = vadd.f32 %v2034_v36, %v1966_v43  ;;  %v2109_v63 = vmul.f32 %v5006_v61, %v1805_v19  ;;  %v4711_v3 = vld [vmem:[#allocation4 + $0x28] sm:$0xff]  ;;  %v1907_v43 = vld [vmem:[#allocation2 + $0x50] sm:$0xff] }
 0x18f   : > { %1759 = vst.msk [vmem:[#allocation4 + $0x40] sm:$0xff] %vm731_vm14, %v1705_v11  ;;  %v2448_v53 = vld [vmem:[#allocation4 + $0x118] sm:$0xff]  ;;  %v2454_v17 = vmul.f32 %v4711_v3, %v6156_v58  ;;  %v1873_v34 = vadd.f32 %v6121_v12, %v1841_v41  ;;  %v1969_v27 = vadd.f32 %v7862_v15, %v1869_v51  ;;  %v7863_v11 = vrot.slane %v5413_v20, 1 }
 0x190   : > { %v7865_v5 = vrot.slane %v7864_v0, 1  ;;  %v2484_v45 = vmul.f32 %v6156_v58, %v2448_v53  ;;  %v2415_v49 = vadd.f32 %v2383_v4, %v2345_v13  ;;  %v2136_v36 = vadd.f32 %v2104_v29, %v2066_v22  ;;  %v7868_v53 = vld [vmem:[#allocation21_spill] sm:$0xff] }
 0x191   : > { %v1941_v32 = vmul.f32 %v4965_v37, %v1905_v59  ;;  %v2069_v41 = vadd.f32 %v7866_v35, %v1969_v27  ;;  %v2179_v51 = vmul.f32 %v4968_v38, %v1905_v59  ;;  %v2317_v20 = vmul.f32 %v5059_v30, %v1805_v19  ;;  %v7869_v29 = vld [vmem:[#allocation33_spill] sm:$0xff] }
 0x192   : > { %v1703_v10 = vsel %vm1678_vm9, %v7865_v5, %v7863_v11  ;;  %v1843_v3 = vmul.f32 %v4999_v56, %v1807_v14  ;;  %v6224_v15 = vadd.f32 %v2484_v45, %v2446_v50  ;;  %v6226_v5 = vadd.f32 %v2453_v24, %v2415_v49  ;;  %v7870_v11 = vld [vmem:[#allocation31_spill] sm:$0xff] }
 0x193   : > { %1761 = vst.msk [vmem:[#allocation4 + $0x50] sm:$0xff] %vm731_vm14, %v1703_v10  ;;  %v2206_v4 = vadd.f32 %v7868_v53, %v2136_v36  ;;  %v2141_v13 = vadd.f32 %v2109_v63, %v7869_v29  ;;  %v1973_v22 = vadd.f32 %v1941_v32, %v1873_v34  ;;  %v2139_v0 = vadd.f32 %v7870_v11, %v2069_v41  ;;  %v7871_v34 = vld [vmem:[#allocation24_spill] sm:$0xff] }
 0x194   : > { %7867 = vst [vmem:[#allocation9_spill] sm:$0xff] %v6224_v15  ;;  %v1875_v10 = vadd.f32 %v6121_v12, %v1843_v3  ;;  %v1943_v27 = vmul.f32 %v4965_v37, %v1907_v43  ;;  %v2610_v19 = vsel %vm731_vm14, %v6224_v15, 0.0  ;;  %v2517_v50 = vsel %vm731_vm14, %v6226_v5, 0.0  ;;  %v1809_v29 = vld [vmem:[#allocation3 + $0x60] sm:$0xff]  ;;  %v7872_v15 = vld [vmem:[#allocation35_spill] sm:$0xff] }
 0x195   : > { %v2276_v45 = vadd.f32 %v2244_v44, %v2206_v4  ;;  %v2211_v49 = vadd.f32 %v2179_v51, %v2141_v13  ;;  %2611 = vadd.xlane.f32.xlu1 %v2610_v19  ;;  %2518 = vadd.xlane.f32.xlu0 %v2517_v50  ;;  %v2209_v36 = vadd.f32 %v7871_v34, %v2139_v0  ;;  %v7873_v13 = vrot.slane %v5513_v8, 1  ;;  %v7874_v19 = vld [vmem:[#allocation28_spill] sm:$0xff] }
 0x196   : > { %v2005_v24 = vld [vmem:[#allocation4 + $0x40] sm:$0xff]  ;;  %v2387_v41 = vmul.f32 %v5016_v7, %v1905_v59  ;;  %v1975_v3 = vadd.f32 %v1943_v27, %v1875_v10  ;;  %v2319_v53 = vmul.f32 %v5059_v30, %v1807_v14  ;;  %v7875_v50 = vrot.slane %v7874_v19, 1  ;;  %v1811_v19 = vld [vmem:[#allocation3 + $0x70] sm:$0xff] }
 0x197   : > { %v2041_v63 = vmul.f32 %v5002_v57, %v2005_v24  ;;  %v2249_v32 = vmul.f32 %v5009_v62, %v2005_v24  ;;  %v2346_v35 = vadd.f32 %v2314_v31, %v2276_v45  ;;  %v2279_v44 = vadd.f32 %v7872_v15, %v2209_v36  ;;  %v1909_v45 = vld [vmem:[#allocation2 + $0x60] sm:$0xff] }
 0x198   : > { %v1701_v0 = vsel %vm1678_vm9, %v7875_v50, %v7873_v13  ;;  %v2111_v59 = vmul.f32 %v5006_v61, %v1807_v14  ;;  %v2181_v10 = vmul.f32 %v4968_v38, %v1907_v43  ;;  %v2389_v27 = vmul.f32 %v5016_v7, %v1907_v43 }
 0x199   : > { %v2073_v11 = vadd.f32 %v2041_v63, %v1973_v22  ;;  %v2281_v51 = vadd.f32 %v2249_v32, %v2211_v49  ;;  %v2416_v34 = vadd.f32 %v2384_v6, %v2346_v35  ;;  %1763 = vst.msk [vmem:[#allocation4 + $0x60] sm:$0xff] %vm731_vm14, %v1701_v0  ;;  %v2349_v22 = vadd.f32 %v2317_v20, %v2279_v44  ;;  %v1911_v44 = vld [vmem:[#allocation2 + $0x70] sm:$0xff] }
 0x19a   : > { %v2007_v4 = vld [vmem:[#allocation4 + $0x50] sm:$0xff]  ;;  %v1845_v8 = vmul.f32 %v4999_v56, %v1809_v29  ;;  %v2457_v63 = vmul.f32 %v6156_v58, %v2005_v24  ;;  %v2113_v13 = vmul.f32 %v5006_v61, %v1809_v29 }
 0x19b   : > { %v2043_v31 = vmul.f32 %v5002_v57, %v2007_v4  ;;  %v2351_v15 = vadd.f32 %v2319_v53, %v2281_v51  ;;  %v6255_v49 = vadd.f32 %v2454_v17, %v2416_v34  ;;  %v2143_v36 = vadd.f32 %v2111_v59, %v2073_v11  ;;  %v7877_v51 = vld [vmem:[#allocation27_spill] sm:$0xff] }
 0x19c   : > { %v2419_v32 = vadd.f32 %v2387_v41, %v2349_v22  ;;  %v1877_v14 = vadd.f32 %v6121_v12, %v1845_v8  ;;  %v2251_v43 = vmul.f32 %v5009_v62, %v2007_v4  ;;  %v1945_v53 = vmul.f32 %v4965_v37, %v1909_v45  ;;  %v1813_v8 = vld [vmem:[#allocation3 + $0x80] sm:$0xff] }
 0x19d   : > { %v2075_v6 = vadd.f32 %v2043_v31, %v1975_v3  ;;  %v2421_v35 = vadd.f32 %v2389_v27, %v2351_v15  ;;  %v2520_v20 = vsel %vm731_vm14, %v6255_v49, 0.0  ;;  %v2213_v17 = vadd.f32 %v2181_v10, %v2143_v36 }
 0x19e   : > { %2521 = vadd.xlane.f32.xlu0 %v2520_v20  ;;  %v6264_v24 = vadd.f32 %v2457_v63, %v2419_v32  ;;  %v2459_v41 = vmul.f32 %v6156_v58, %v2007_v4  ;;  %v2183_v3 = vmul.f32 %v4968_v38, %v1909_v45  ;;  %v7876_v11 = vrot.slane %v5497_v9, 1 }
 0x19f   : > { %v7878_v50 = vrot.slane %v7877_v51, 1  ;;  %v1977_v34 = vadd.f32 %v1945_v53, %v1877_v14  ;;  %v2283_v31 = vadd.f32 %v2251_v43, %v2213_v17  ;;  %v2321_v59 = vmul.f32 %v5059_v30, %v1809_v29  ;;  %v1913_v51 = vld [vmem:[#allocation2 + $0x80] sm:$0xff] }
 0x1a0   : > { %v1847_v10 = vmul.f32 %v4999_v56, %v1811_v19  ;;  %v6277_v22 = vadd.f32 %v2459_v41, %v2421_v35  ;;  %v2009_v4 = vld [vmem:[#allocation4 + $0x60] sm:$0xff]  ;;  %v2391_v15 = vmul.f32 %v5016_v7, %v1909_v45  ;;  %v1947_v9 = vmul.f32 %v4965_v37, %v1911_v44 }
 0x1a1   : > { %v1699_v0 = vsel %vm1678_vm9, %v7878_v50, %v7876_v11  ;;  %v2145_v27 = vadd.f32 %v2113_v13, %v2075_v6  ;;  %v2529_v63 = vsel %vm731_vm14, %v6264_v24, 0.0  ;;  %v2045_v36 = vmul.f32 %v5002_v57, %v2009_v4  ;;  %v7880_v13 = vld [vmem:[#allocation34_spill] sm:$0xff] }
 0x1a2   : > { %1765 = vst.msk [vmem:[#allocation4 + $0x70] sm:$0xff] %vm731_vm14, %v1699_v0  ;;  %v2353_v32 = vadd.f32 %v2321_v59, %v2283_v31  ;;  %v2115_v29 = vmul.f32 %v5006_v61, %v1811_v19  ;;  %2530 = vadd.xlane.f32.xlu0 %v2529_v63  ;;  %v2253_v14 = vmul.f32 %v5009_v62, %v2009_v4  ;;  %v7879_v6 = vrot.slane %v7835_v26, 1 }
 0x1a3   : > { %v2461_v35 = vmul.f32 %v6156_v58, %v2009_v4  ;;  %v1879_v20 = vadd.f32 %v6121_v12, %v1847_v10  ;;  %v2215_v45 = vadd.f32 %v2183_v3, %v2145_v27  ;;  %v2077_v43 = vadd.f32 %v2045_v36, %v1977_v34  ;;  %v1815_v4 = vld [vmem:[#allocation3 + $0x90] sm:$0xff] }
 0x1a4   : > { %v2423_v53 = vadd.f32 %v2391_v15, %v2353_v32  ;;  %v7881_v17 = vrot.slane %v7880_v13, 1  ;;  %v1849_v11 = vmul.f32 %v4999_v56, %v1813_v8  ;;  %v2535_v50 = vsel %vm731_vm14, %v6277_v22, 0.0  ;;  %v1817_v13 = vld [vmem:[#allocation3 + $0xa0] sm:$0xff] }
 0x1a5   : > { %v2185_v0 = vmul.f32 %v4968_v38, %v1911_v44  ;;  %v2285_v31 = vadd.f32 %v2253_v14, %v2215_v45  ;;  %v2323_v3 = vmul.f32 %v5059_v30, %v1811_v19  ;;  %v1979_v26 = vadd.f32 %v1947_v9, %v1879_v20  ;;  %v7883_v14 = vld [vmem:[#allocation32_spill] sm:$0xff] }
 0x1a6   : > { %v1697_v41 = vsel %vm1678_vm9, %v7881_v17, %v7879_v6  ;;  %v6300_v34 = vadd.f32 %v2461_v35, %v2423_v53  ;;  %v2393_v59 = vmul.f32 %v5016_v7, %v1911_v44  ;;  %v2147_v10 = vadd.f32 %v2115_v29, %v2077_v43  ;;  %2536 = vadd.xlane.f32.xlu0 %v2535_v50  ;;  %v1915_v6 = vld [vmem:[#allocation2 + $0x90] sm:$0xff] }
 0x1a7   : > { %1767 = vst.msk [vmem:[#allocation4 + $0x80] sm:$0xff] %vm731_vm14, %v1697_v41  ;;  %v2355_v27 = vadd.f32 %v2323_v3, %v2285_v31  ;;  %v1881_v63 = vadd.f32 %v6121_v12, %v1849_v11  ;;  %v1949_v36 = vmul.f32 %v4965_v37, %v1913_v51  ;;  %v7882_v32 = vrot.slane %v5577_v28, 1 }
 0x1a8   : > { %v7884_v19 = vrot.slane %v7883_v14, 1  ;;  %v2117_v29 = vmul.f32 %v5006_v61, %v1813_v8  ;;  %v2187_v20 = vmul.f32 %v4968_v38, %v1913_v51  ;;  %v2217_v53 = vadd.f32 %v2185_v0, %v2147_v10  ;;  %v7886_v14 = vld [vmem:[#allocation39_spill] sm:$0xff] }
 0x1a9   : > { %v2011_v15 = vld [vmem:[#allocation4 + $0x70] sm:$0xff]  ;;  %v2425_v45 = vadd.f32 %v2393_v59, %v2355_v27  ;;  %v1851_v28 = vmul.f32 %v4999_v56, %v1815_v4  ;;  %v2541_v17 = vsel %vm731_vm14, %v6300_v34, 0.0  ;;  %v2325_v11 = vmul.f32 %v5059_v30, %v1813_v8 }
 0x1aa   : > { %v1695_v35 = vsel %vm1678_vm9, %v7884_v19, %v7882_v32  ;;  %v2047_v9 = vmul.f32 %v5002_v57, %v2011_v15  ;;  %v2255_v44 = vmul.f32 %v5009_v62, %v2011_v15  ;;  %v2463_v43 = vmul.f32 %v6156_v58, %v2011_v15  ;;  %2542 = vadd.xlane.f32.xlu0 %v2541_v17 }
 0x1ab   : > { %1769 = vst.msk [vmem:[#allocation4 + $0x90] sm:$0xff] %vm731_vm14, %v1695_v35  ;;  %v2395_v50 = vmul.f32 %v5016_v7, %v1913_v51  ;;  %v1981_v3 = vadd.f32 %v1949_v36, %v1881_v63  ;;  %v1883_v15 = vadd.f32 %v6121_v12, %v1851_v28  ;;  %v1951_v10 = vmul.f32 %v4965_v37, %v1915_v6 }
 0x1ac   : > { %v2079_v41 = vadd.f32 %v2047_v9, %v1979_v26  ;;  %v6322_v31 = vadd.f32 %v2463_v43, %v2425_v45  ;;  %v2287_v59 = vadd.f32 %v2255_v44, %v2217_v53  ;;  %v7885_v32 = vrot.slane %v7846_v46, 1  ;;  %v1917_v9 = vld [vmem:[#allocation2 + $0xa0] sm:$0xff] }
 0x1ad   : > { %v7887_v19 = vrot.slane %v7886_v14, 1  ;;  %v1853_v51 = vmul.f32 %v4999_v56, %v1817_v13  ;;  %v2119_v35 = vmul.f32 %v5006_v61, %v1815_v4  ;;  %v1983_v44 = vadd.f32 %v1951_v10, %v1883_v15 }
 0x1ae   : > { %v2013_v0 = vld [vmem:[#allocation4 + $0x80] sm:$0xff]  ;;  %v2149_v27 = vadd.f32 %v2117_v29, %v2079_v41  ;;  %v2547_v26 = vsel %vm731_vm14, %v6322_v31, 0.0  ;;  %v2357_v36 = vadd.f32 %v2325_v11, %v2287_v59  ;;  %v2327_v41 = vmul.f32 %v5059_v30, %v1815_v4 }
 0x1af   : > { %v1693_v8 = vsel %vm1678_vm9, %v7887_v19, %v7885_v32  ;;  %v2049_v63 = vmul.f32 %v5002_v57, %v2013_v0  ;;  %v2257_v46 = vmul.f32 %v5009_v62, %v2013_v0  ;;  %v1885_v45 = vadd.f32 %v6121_v12, %v1853_v51  ;;  %2548 = vadd.xlane.f32.xlu0 %v2547_v26  ;;  %v1819_v19 = vld [vmem:[#allocation3 + $0xb0] sm:$0xff] }
 0x1b0   : > { %1771 = vst.msk [vmem:[#allocation4 + $0xa0] sm:$0xff] %vm731_vm14, %v1693_v8  ;;  %v2219_v29 = vadd.f32 %v2187_v20, %v2149_v27  ;;  %v2427_v53 = vadd.f32 %v2395_v50, %v2357_v36  ;;  %v2465_v28 = vmul.f32 %v6156_v58, %v2013_v0  ;;  %v1953_v32 = vmul.f32 %v4965_v37, %v1917_v9 }
 0x1b1   : > { %v2081_v43 = vadd.f32 %v2049_v63, %v1981_v3  ;;  %v2121_v14 = vmul.f32 %v5006_v61, %v1817_v13  ;;  %v2189_v20 = vmul.f32 %v4968_v38, %v1915_v6  ;;  %v2397_v3 = vmul.f32 %v5016_v7, %v1915_v6  ;;  %v7889_v63 = vld [vmem:[#allocation38_spill] sm:$0xff] }
 0x1b2   : > { %v2015_v17 = vld [vmem:[#allocation4 + $0x90] sm:$0xff]  ;;  %v2289_v59 = vadd.f32 %v2257_v46, %v2219_v29  ;;  %v6345_v15 = vadd.f32 %v2465_v28, %v2427_v53  ;;  %v1985_v4 = vadd.f32 %v1953_v32, %v1885_v45  ;;  %v7888_v26 = vrot.slane %v5649_v33, 1 }
 0x1b3   : > { %v2051_v11 = vmul.f32 %v5002_v57, %v2015_v17  ;;  %v2151_v50 = vadd.f32 %v2119_v35, %v2081_v43  ;;  %v2259_v0 = vmul.f32 %v5009_v62, %v2015_v17  ;;  %v7890_v36 = vrot.slane %v7889_v63, 1  ;;  %v1919_v43 = vld [vmem:[#allocation2 + $0xb0] sm:$0xff] }
 0x1b4   : > { %v2359_v27 = vadd.f32 %v2327_v41, %v2289_v59  ;;  %v2553_v8 = vsel %vm731_vm14, %v6345_v15, 0.0  ;;  %v1855_v29 = vmul.f32 %v4999_v56, %v1819_v19  ;;  %v2467_v35 = vmul.f32 %v6156_v58, %v2015_v17 }
 0x1b5   : > { %v2083_v10 = vadd.f32 %v2051_v11, %v1983_v44  ;;  %v2221_v51 = vadd.f32 %v2189_v20, %v2151_v50  ;;  %v1691_v46 = vsel %vm1678_vm9, %v7890_v36, %v7888_v26  ;;  %2554 = vadd.xlane.f32.xlu0 %v2553_v8  ;;  %v2191_v45 = vmul.f32 %v4968_v38, %v1917_v9  ;;  %v1921_v36 = vld [vmem:[#allocation2 + $0xc0] sm:$0xff] }
 0x1b6   : > { %v2429_v6 = vadd.f32 %v2397_v3, %v2359_v27  ;;  %1773 = vst.msk [vmem:[#allocation4 + $0xb0] sm:$0xff] %vm731_vm14, %v1691_v46  ;;  %v2329_v41 = vmul.f32 %v5059_v30, %v1817_v13  ;;  %v2399_v11 = vmul.f32 %v5016_v7, %v1917_v9  ;;  %v1887_v17 = vadd.f32 %v6121_v12, %v1855_v29  ;;  %v1821_v3 = vld [vmem:[#allocation3 + $0xc0] sm:$0xff] }
 0x1b7   : > { %v2017_v44 = vld [vmem:[#allocation4 + $0xa0] sm:$0xff]  ;;  %v2153_v53 = vadd.f32 %v2121_v14, %v2083_v10  ;;  %v2291_v28 = vadd.f32 %v2259_v0, %v2221_v51  ;;  %v1955_v8 = vmul.f32 %v4965_v37, %v1919_v43  ;;  %v2123_v14 = vmul.f32 %v5006_v61, %v1819_v19  ;;  %v7892_v51 = vld [vmem:[#allocation43_spill] sm:$0xff] }
 0x1b8   : > { %v2053_v33 = vmul.f32 %v5002_v57, %v2017_v44  ;;  %v6365_v59 = vadd.f32 %v2467_v35, %v2429_v6  ;;  %v2261_v32 = vmul.f32 %v5009_v62, %v2017_v44  ;;  %v2331_v9 = vmul.f32 %v5059_v30, %v1819_v19 }
 0x1b9   : > { %v2223_v20 = vadd.f32 %v2191_v45, %v2153_v53  ;;  %v2361_v27 = vadd.f32 %v2329_v41, %v2291_v28  ;;  %v7891_v0 = vrot.slane %v5736_v39, 1  ;;  %v7893_v26 = vrot.slane %v7892_v51, 1  ;;  %v1823_v53 = vld [vmem:[#allocation3 + $0xd0] sm:$0xff] }
 0x1ba   : > { %v2085_v50 = vadd.f32 %v2053_v33, %v1985_v4  ;;  %v2559_v10 = vsel %vm731_vm14, %v6365_v59, 0.0  ;;  %v2469_v46 = vmul.f32 %v6156_v58, %v2017_v44  ;;  %v2193_v29 = vmul.f32 %v4968_v38, %v1919_v43 }
 0x1bb   : > { %v2293_v13 = vadd.f32 %v2261_v32, %v2223_v20  ;;  %v1689_v63 = vsel %vm1678_vm9, %v7893_v26, %v7891_v0  ;;  %2560 = vadd.xlane.f32.xlu0 %v2559_v10  ;;  %v2431_v4 = vadd.f32 %v2399_v11, %v2361_v27  ;;  %v1857_v6 = vmul.f32 %v4999_v56, %v1821_v3  ;;  %v7895_v32 = vld [vmem:[#allocation42_spill] sm:$0xff] }
 0x1bc   : > { %1775 = vst.msk [vmem:[#allocation4 + $0xc0] sm:$0xff] %vm731_vm14, %v1689_v63  ;;  %v1987_v35 = vadd.f32 %v1955_v8, %v1887_v17  ;;  %v2401_v39 = vmul.f32 %v5016_v7, %v1919_v43  ;;  %v2155_v45 = vadd.f32 %v2123_v14, %v2085_v50  ;;  %v1957_v11 = vmul.f32 %v4965_v37, %v1921_v36 }
 0x1bd   : > { %v2363_v19 = vadd.f32 %v2331_v9, %v2293_v13  ;;  %v6385_v33 = vadd.f32 %v2469_v46, %v2431_v4  ;;  %v2019_v28 = vld [vmem:[#allocation4 + $0xb0] sm:$0xff]  ;;  %v1889_v41 = vadd.f32 %v6121_v12, %v1857_v6  ;;  %v7894_v44 = vrot.slane %v5723_v18, 1 }
 0x1be   : > { %v7896_v20 = vrot.slane %v7895_v32, 1  ;;  %v2055_v17 = vmul.f32 %v5002_v57, %v2019_v28  ;;  %v2471_v43 = vmul.f32 %v6156_v58, %v2019_v28  ;;  %v2125_v50 = vmul.f32 %v5006_v61, %v1821_v3  ;;  %v1923_v9 = vld [vmem:[#allocation2 + $0xd0] sm:$0xff]  ;;  %v7898_v32 = vld [vmem:[#allocation45_spill] sm:$0xff] }
 0x1bf   : > { %v2433_v8 = vadd.f32 %v2401_v39, %v2363_v19  ;;  %v2565_v14 = vsel %vm731_vm14, %v6385_v33, 0.0  ;;  %v2263_v10 = vmul.f32 %v5009_v62, %v2019_v28  ;;  %v2225_v18 = vadd.f32 %v2193_v29, %v2155_v45  ;;  %v1825_v39 = vld [vmem:[#allocation3 + $0xe0] sm:$0xff] }
 0x1c0   : > { %v1687_v27 = vsel %vm1678_vm9, %v7896_v20, %v7894_v44  ;;  %v1859_v13 = vmul.f32 %v4999_v56, %v1823_v53  ;;  %2566 = vadd.xlane.f32.xlu0 %v2565_v14  ;;  %v2087_v0 = vadd.f32 %v2055_v17, %v1987_v35  ;;  %v2195_v26 = vmul.f32 %v4968_v38, %v1921_v36 }
 0x1c1   : > { %1777 = vst.msk [vmem:[#allocation4 + $0xd0] sm:$0xff] %vm731_vm14, %v1687_v27  ;;  %v6403_v51 = vadd.f32 %v2471_v43, %v2433_v8  ;;  %v2333_v63 = vmul.f32 %v5059_v30, %v1821_v3  ;;  %v1989_v4 = vadd.f32 %v1957_v11, %v1889_v41  ;;  %v2295_v46 = vadd.f32 %v2263_v10, %v2225_v18 }
 0x1c2   : > { %v2403_v6 = vmul.f32 %v5016_v7, %v1921_v36  ;;  %v1891_v19 = vadd.f32 %v6121_v12, %v1859_v13  ;;  %v1959_v29 = vmul.f32 %v4965_v37, %v1923_v9  ;;  %v2127_v45 = vmul.f32 %v5006_v61, %v1823_v53 }
 0x1c3   : > { %v2021_v28 = vld [vmem:[#allocation4 + $0xc0] sm:$0xff]  ;;  %v2157_v44 = vadd.f32 %v2125_v50, %v2087_v0  ;;  %v7897_v35 = vrot.slane %v5848_v2, 1  ;;  %v7899_v20 = vrot.slane %v7898_v32, 1  ;;  %v2571_v41 = vsel %vm731_vm14, %v6403_v51, 0.0 }
 0x1c4   : > { %v2057_v36 = vmul.f32 %v5002_v57, %v2021_v28  ;;  %v2365_v11 = vadd.f32 %v2333_v63, %v2295_v46  ;;  %v2197_v27 = vmul.f32 %v4968_v38, %v1923_v9  ;;  %2572 = vadd.xlane.f32.xlu0 %v2571_v41  ;;  %v2265_v17 = vmul.f32 %v5009_v62, %v2021_v28  ;;  %v1925_v50 = vld [vmem:[#allocation2 + $0xe0] sm:$0xff] }
 0x1c5   : > { %v1685_v3 = vsel %vm1678_vm9, %v7899_v20, %v7897_v35  ;;  %v1991_v8 = vadd.f32 %v1959_v29, %v1891_v19  ;;  %v2227_v2 = vadd.f32 %v2195_v26, %v2157_v44  ;;  %v1861_v43 = vmul.f32 %v4999_v56, %v1825_v39  ;;  %v1827_v20 = vld [vmem:[#allocation3 + $0xf0] sm:$0xff] }
 0x1c6   : > { %1779 = vst.msk [vmem:[#allocation4 + $0xe0] sm:$0xff] %vm731_vm14, %v1685_v3  ;;  %v2089_v14 = vadd.f32 %v2057_v36, %v1989_v4  ;;  %v2435_v10 = vadd.f32 %v2403_v6, %v2365_v11  ;;  %v2473_v18 = vmul.f32 %v6156_v58, %v2021_v28  ;;  %v2335_v0 = vmul.f32 %v5059_v30, %v1823_v53 }
 0x1c7   : > { %v2297_v46 = vadd.f32 %v2265_v17, %v2227_v2  ;;  %v2405_v35 = vmul.f32 %v5016_v7, %v1923_v9  ;;  %v2129_v32 = vmul.f32 %v5006_v61, %v1825_v39  ;;  %v1893_v26 = vadd.f32 %v6121_v12, %v1861_v43 }
 0x1c8   : > { %v2023_v13 = vld [vmem:[#allocation4 + $0xd0] sm:$0xff]  ;;  %v6429_v19 = vadd.f32 %v2473_v18, %v2435_v10  ;;  %v1961_v4 = vmul.f32 %v4965_v37, %v1925_v50  ;;  %v2159_v6 = vadd.f32 %v2127_v45, %v2089_v14  ;;  %v7900_v53 = vrot.slane %v5846_v1, 1 }
 0x1c9   : > { %v2059_v63 = vmul.f32 %v5002_v57, %v2023_v13  ;;  %v2267_v28 = vmul.f32 %v5009_v62, %v2023_v13  ;;  %v2367_v44 = vadd.f32 %v2335_v0, %v2297_v46  ;;  %v7901_v3 = vrot.slane %v5786_v55, 1  ;;  %v1927_v55 = vld [vmem:[#allocation2 + $0xf0] sm:$0xff] }
 0x1ca   : > { %v2577_v41 = vsel %vm731_vm14, %v6429_v19, 0.0  ;;  %v1993_v36 = vadd.f32 %v1961_v4, %v1893_v26  ;;  %v2229_v11 = vadd.f32 %v2197_v27, %v2159_v6  ;;  %v1863_v45 = vmul.f32 %v4999_v56, %v1827_v20 }
 0x1cb   : > { %v2091_v29 = vadd.f32 %v2059_v63, %v1991_v8  ;;  %v1683_v9 = vsel %vm1678_vm9, %v7901_v3, %v7900_v53  ;;  %2578 = vadd.xlane.f32.xlu0 %v2577_v41  ;;  %v2437_v17 = vadd.f32 %v2405_v35, %v2367_v44  ;;  %v2475_v8 = vmul.f32 %v6156_v58, %v2023_v13 }
 0x1cc   : > { %1781 = vst.msk [vmem:[#allocation4 + $0xf0] sm:$0xff] %vm731_vm14, %v1683_v9  ;;  %v2199_v1 = vmul.f32 %v4968_v38, %v1925_v50  ;;  %v2299_v10 = vadd.f32 %v2267_v28, %v2229_v11  ;;  %v2337_v18 = vmul.f32 %v5059_v30, %v1825_v39  ;;  %v2407_v27 = vmul.f32 %v5016_v7, %v1925_v50  ;;  %v2097_v28 = vld [vmem:[#allocation3 + $0x100] sm:$0xff] }
 0x1cd   : > { %v2025_v2 = vld [vmem:[#allocation4 + $0xe0] sm:$0xff]  ;;  %v2161_v43 = vadd.f32 %v2129_v32, %v2091_v29  ;;  %v6449_v0 = vadd.f32 %v2475_v8, %v2437_v17  ;;  %v1895_v63 = vadd.f32 %v6121_v12, %v1863_v45  ;;  %v1963_v26 = vmul.f32 %v4965_v37, %v1927_v55 }
 0x1ce   : > { %v2061_v14 = vmul.f32 %v5002_v57, %v2025_v2  ;;  %v2269_v56 = vmul.f32 %v5009_v62, %v2025_v2  ;;  %v2369_v35 = vadd.f32 %v2337_v18, %v2299_v10  ;;  %v2131_v32 = vmul.f32 %v5006_v61, %v1827_v20 }
 0x1cf   : > { %v2231_v46 = vadd.f32 %v2199_v1, %v2161_v43  ;;  %v2583_v4 = vsel %vm731_vm14, %v6449_v0, 0.0  ;;  %v2339_v39 = vmul.f32 %v5059_v30, %v1827_v20  ;;  %v7902_v50 = vrot.slane %v5946_v40, 1  ;;  %v2167_v43 = vld [vmem:[#allocation2 + $0x100] sm:$0xff] }
 0x1d0   : > { %v2093_v13 = vadd.f32 %v2061_v14, %v1993_v36  ;;  %v7903_v29 = vrot.slane %v5881_v48, 1  ;;  %2584 = vadd.xlane.f32.xlu0 %v2583_v4  ;;  %v2439_v44 = vadd.f32 %v2407_v27, %v2369_v35  ;;  %v2477_v37 = vmul.f32 %v6156_v58, %v2025_v2 }
 0x1d1   : > { %v2301_v6 = vadd.f32 %v2269_v56, %v2231_v46  ;;  %v1995_v53 = vadd.f32 %v1963_v26, %v1895_v63  ;;  %v2201_v41 = vmul.f32 %v4968_v38, %v1927_v55  ;;  %v2409_v40 = vmul.f32 %v5016_v7, %v1927_v55  ;;  %v2307_v46 = vld [vmem:[#allocation3 + $0x110] sm:$0xff] }
 0x1d2   : > { %v1681_v12 = vsel %vm1678_vm9, %v7903_v29, %v7902_v50  ;;  %v2163_v3 = vadd.f32 %v2131_v32, %v2093_v13  ;;  %v7904_v48 = vrot.slane %v5951_v54, 1  ;;  %v7905_v36 = vrot.slane %v5891_v16, 1  ;;  %v2377_v13 = vld [vmem:[#allocation2 + $0x110] sm:$0xff] }
 0x1d3   : > { %1783 = vst.msk [vmem:[#allocation4 + $0x100] sm:$0xff] %vm731_vm14, %v1681_v12  ;;  %v2027_v9 = vld [vmem:[#allocation4 + $0xf0] sm:$0xff]  ;;  %v2371_v20 = vadd.f32 %v2339_v39, %v2301_v6  ;;  %v6474_v45 = vadd.f32 %v2477_v37, %v2439_v44  ;;  %v2133_v8 = vmul.f32 %v5006_v61, %v2097_v28  ;;  %v2203_v61 = vmul.f32 %v4968_v38, %v2167_v43 }
 0x1d4   : > { %v1679_v11 = vsel %vm1678_vm9, %v7905_v36, %v7904_v48  ;;  %v2063_v17 = vmul.f32 %v5002_v57, %v2027_v9  ;;  %v2271_v2 = vmul.f32 %v5009_v62, %v2027_v9  ;;  %v2479_v55 = vmul.f32 %v6156_v58, %v2027_v9  ;;  %v2525_v9 = vpop.xlane.xlu1 %2524 }
 0x1d5   : > { %1785 = vst.msk [vmem:[#allocation4 + $0x110] sm:$0xff] %vm731_vm14, %v1679_v11  ;;  %v2441_v1 = vadd.f32 %v2409_v40, %v2371_v20  ;;  %v2233_v54 = vadd.f32 %v2201_v41, %v2163_v3  ;;  %v2589_v16 = vsel %vm731_vm14, %v6474_v45, 0.0  ;;  %v2341_v57 = vmul.f32 %v5059_v30, %v2097_v28  ;;  %v7906_v11 = vld [vmem:[#allocation37_spill] sm:$0xff] }
 0x1d6   : > { %v2095_v21 = vadd.f32 %v2063_v17, %v1995_v53  ;;  %2590 = vadd.xlane.f32.xlu0 %v2589_v16  ;;  %v2411_v63 = vmul.f32 %v5016_v7, %v2167_v43  ;;  %v2343_v38 = vmul.f32 %v5059_v30, %v2307_v46  ;;  %v2413_v29 = vmul.f32 %v5016_v7, %v2377_v13  ;;  %v7908_v13 = vld [vmem:[#allocation46_spill] sm:$0xff] }
 0x1d7   : > { %v6483_v14 = vadd.f32 %v2479_v55, %v2441_v1  ;;  %v2303_v10 = vadd.f32 %v2271_v2, %v2233_v54  ;;  %v2615_v40 = vmul.f32 0.0625, %v2525_v9 }
 0x1d8   : > { %v2165_v18 = vadd.f32 %v2133_v8, %v2095_v21  ;;  %v2528_v30 = vpop.xlane.xlu1 %2527 }
 0x1d9   : > { %v2373_v56 = vadd.f32 %v2341_v57, %v2303_v10  ;;  %v2595_v35 = vsel %vm731_vm14, %v6483_v14, 0.0  ;;  %v6504_v17 = vsub.f32 %v7906_v11, %v2615_v40  ;;  %v2616_v55 = vmul.f32 0.0625, %v2528_v30  ;;  %v7907_v57 = vld [vmem:[#allocation44_spill] sm:$0xff] }
 0x1da   : > { %v2237_v27 = vld [vmem:[#allocation4 + $0x100] sm:$0xff]  ;;  %v2235_v32 = vadd.f32 %v2203_v61, %v2165_v18  ;;  %2596 = vadd.xlane.f32.xlu0 %v2595_v35 }
 0x1db   : > { %v2273_v26 = vmul.f32 %v5009_v62, %v2237_v27  ;;  %v2443_v4 = vadd.f32 %v2411_v63, %v2373_v56  ;;  %v2481_v6 = vmul.f32 %v6156_v58, %v2237_v27  ;;  %v2679_v54 = vmul.f32 %v6504_v17, %v6504_v17 }
 0x1dc   : > { %v2447_v39 = vld [vmem:[#allocation4 + $0x110] sm:$0xff]  ;;  %v2534_v41 = vpop.xlane.xlu1 %2533  ;;  %v6515_v61 = vsub.f32 %v7907_v57, %v2616_v55 }
 0x1dd   : > { %v2305_v50 = vadd.f32 %v2273_v26, %v2235_v32  ;;  %v6494_v12 = vadd.f32 %v2481_v6, %v2443_v4  ;;  %v2483_v44 = vmul.f32 %v6156_v58, %v2447_v39  ;;  %v2618_v10 = vmul.f32 0.0625, %v2534_v41 }
 0x1de   : > { %v2715_v18 = vsel %vm731_vm14, %v2679_v54, 0.0 }
 0x1df   : > { %v2375_v28 = vadd.f32 %v2343_v38, %v2305_v50  ;;  %v2601_v37 = vsel %vm731_vm14, %v6494_v12, 0.0  ;;  %v6524_v35 = vsub.f32 %v7908_v13, %v2618_v10  ;;  %v7909_v38 = vld [vmem:[#allocation47_spill] sm:$0xff]  ;;  %v7911_v10 = vld [vmem:[#allocation10_spill] sm:$0xff] }
 0x1e0   : > { %2602 = vadd.xlane.f32.xlu0 %v2601_v37  ;;  %v2540_v7 = vpop.xlane.xlu1 %2539 }
 0x1e1   : > { %v2445_v62 = vadd.f32 %v2413_v29, %v2375_v28  ;;  %v2620_v26 = vmul.f32 0.0625, %v2540_v7 }
 0x1e3   : > { %v6499_v53 = vadd.f32 %v2483_v44, %v2445_v62  ;;  %v6535_v29 = vsub.f32 %v7909_v38, %v2620_v26  ;;  %v2682_v44 = vmul.f32 %v6524_v35, %v6524_v35 }
 0x1e4   : > { %v2546_v20 = vpop.xlane.xlu1 %2545 }
 0x1e5   : > { %v2607_v3 = vsel %vm731_vm14, %v6499_v53, 0.0  ;;  %v2724_v7 = vsel %vm731_vm14, %v2682_v44, 0.0  ;;  %v2684_v40 = vmul.f32 %v6535_v29, %v6535_v29 }
 0x1e6   : > { %2608 = vadd.xlane.f32.xlu0 %v2607_v3 }
 0x1e9   : > { %v2552_v48 = vpop.xlane.xlu1 %2551 }
 0x1f0   : > { %v2558_v1 = vpop.xlane.xlu1 %2557 }
 0x1f6   : > { %v2564_v27 = vpop.xlane.xlu1 %2563 }
 0x1fc   : > { %v2570_v28 = vpop.xlane.xlu1 %2569 }
 0x222   : > { %v2519_v36 = vpop.xlane.xlu0 %2518 }
 0x223   : > { %v2613_v58 = vmul.f32 0.0625, %v2519_v36 }
 0x225   : > { %v6507_v8 = vsub.f32 %v6226_v5, %v2613_v58 }
 0x227   : > { %v2677_v2 = vmul.f32 %v6507_v8, %v6507_v8 }
 0x229   : > { %v2709_v43 = vsel %vm731_vm14, %v2677_v2, 0.0  ;;  %v2576_v2 = vpop.xlane.xlu1 %2575 }
 0x22a   : > { %2710 = vadd.xlane.f32.xlu0 %v2709_v43 }
 0x22b   : > { %v2522_v16 = vpop.xlane.xlu0 %2521 }
 0x22c   : > { %v2614_v21 = vmul.f32 0.0625, %v2522_v16  ;;  %v2626_v16 = vmul.f32 0.0625, %v2558_v1  ;;  %v7912_v1 = vld [vmem:[#allocation36_spill] sm:$0xff] }
 0x22d   : > { %v2582_v13 = vpop.xlane.xlu1 %2581 }
 0x22e   : > { %v6518_v5 = vsub.f32 %v6255_v49, %v2614_v21  ;;  %2716 = vadd.xlane.f32.xlu0 %v2715_v18  ;;  %v2680_v49 = vmul.f32 %v6515_v61, %v6515_v61  ;;  %v2730_v21 = vsel %vm731_vm14, %v2684_v40, 0.0 }
 0x22f   : > { %v2531_v56 = vpop.xlane.xlu0 %2530 }
 0x230   : > { %v2617_v63 = vmul.f32 0.0625, %v2531_v56  ;;  %v2678_v46 = vmul.f32 %v6518_v5, %v6518_v5  ;;  %v2718_v62 = vsel %vm731_vm14, %v2680_v49, 0.0 }
 0x232   : > { %v6527_v32 = vsub.f32 %v6264_v24, %v2617_v63  ;;  %v2712_v4 = vsel %vm731_vm14, %v2678_v46, 0.0  ;;  %v2622_v24 = vmul.f32 0.0625, %v2546_v20  ;;  %v7910_v20 = vld [vmem:[#allocation8_spill] sm:$0xff]  ;;  %v6571_v46 = vsub.f32 %v7912_v1, %v2626_v16 }
 0x233   : > { %2713 = vadd.xlane.f32.xlu1 %v2712_v4  ;;  %v2537_v6 = vpop.xlane.xlu0 %2536  ;;  %v2628_v4 = vmul.f32 0.0625, %v2564_v27  ;;  %v7913_v27 = vld [vmem:[#allocation13_spill] sm:$0xff] }
 0x234   : > { %v2619_v39 = vmul.f32 0.0625, %v2537_v6  ;;  %v2681_v50 = vmul.f32 %v6527_v32, %v6527_v32  ;;  %v6550_v36 = vsub.f32 %v7910_v20, %v2622_v24  ;;  %v2690_v44 = vmul.f32 %v6571_v46, %v6571_v46 }
 0x235   : > { %v6585_v24 = vsub.f32 %v7913_v27, %v2628_v4  ;;  %v2632_v20 = vmul.f32 0.0625, %v2576_v2  ;;  %v2634_v2 = vmul.f32 0.0625, %v2582_v13 }
 0x236   : > { %v6540_v37 = vsub.f32 %v6277_v22, %v2619_v39  ;;  %v2721_v3 = vsel %vm731_vm14, %v2681_v50, 0.0  ;;  %v2624_v22 = vmul.f32 0.0625, %v2552_v48  ;;  %v2686_v18 = vmul.f32 %v6550_v36, %v6550_v36 }
 0x237   : > { %2719 = vadd.xlane.f32.xlu1 %v2718_v62  ;;  %2722 = vadd.xlane.f32.xlu0 %v2721_v3  ;;  %v2543_v9 = vpop.xlane.xlu0 %2542  ;;  %v2630_v62 = vmul.f32 0.0625, %v2570_v28 }
 0x238   : > { %v2621_v30 = vmul.f32 0.0625, %v2543_v9  ;;  %v2683_v41 = vmul.f32 %v6540_v37, %v6540_v37  ;;  %v6560_v57 = vsub.f32 %v7911_v10, %v2624_v22 }
 0x239   : > { %v6594_v40 = vsub.f32 %v6062_v52, %v2630_v62  ;;  %v6605_v52 = vsub.f32 %v6088_v25, %v2632_v20  ;;  %v6617_v25 = vsub.f32 %v6102_v23, %v2634_v2 }
 0x23a   : > { %v6553_v58 = vsub.f32 %v6300_v34, %v2621_v30  ;;  %v2727_v11 = vsel %vm731_vm14, %v2683_v41, 0.0  ;;  %v2688_v6 = vmul.f32 %v6560_v57, %v6560_v57  ;;  %v2588_v30 = vpop.xlane.xlu1 %2587 }
 0x23b   : > { %2725 = vadd.xlane.f32.xlu1 %v2724_v7  ;;  %2728 = vadd.xlane.f32.xlu0 %v2727_v11  ;;  %v2748_v7 = vsel %vm731_vm14, %v2690_v44, 0.0  ;;  %v2692_v11 = vmul.f32 %v6585_v24, %v6585_v24  ;;  %v2694_v10 = vmul.f32 %v6594_v40, %v6594_v40  ;;  %v2696_v13 = vmul.f32 %v6605_v52, %v6605_v52 }
 0x23c   : > { %v2549_v55 = vpop.xlane.xlu0 %2548  ;;  %v2685_v54 = vmul.f32 %v6553_v58, %v6553_v58  ;;  %v2742_v9 = vsel %vm731_vm14, %v2688_v6, 0.0 }
 0x23d   : > { %v2623_v43 = vmul.f32 0.0625, %v2549_v55  ;;  %v2760_v1 = vsel %vm731_vm14, %v2694_v10, 0.0 }
 0x23e   : > { %v2733_v34 = vsel %vm731_vm14, %v2685_v54, 0.0 }
 0x23f   : > { %v6563_v48 = vsub.f32 %v6322_v31, %v2623_v43  ;;  %2731 = vadd.xlane.f32.xlu1 %v2730_v21  ;;  %2734 = vadd.xlane.f32.xlu0 %v2733_v34  ;;  %v2736_v31 = vsel %vm731_vm14, %v2686_v18, 0.0  ;;  %v2754_v21 = vsel %vm731_vm14, %v2692_v11, 0.0 }
 0x241   : > { %v2687_v63 = vmul.f32 %v6563_v48, %v6563_v48 }
 0x242   : > { %v2555_v56 = vpop.xlane.xlu0 %2554 }
 0x243   : > { %v2625_v26 = vmul.f32 0.0625, %v2555_v56  ;;  %v2739_v49 = vsel %vm731_vm14, %v2687_v63, 0.0  ;;  %2737 = vadd.xlane.f32.xlu1 %v2736_v31  ;;  %v2636_v56 = vmul.f32 0.0625, %v2588_v30 }
 0x244   : > { %2740 = vadd.xlane.f32.xlu0 %v2739_v49 }
 0x245   : > { %v6578_v39 = vsub.f32 %v6345_v15, %v2625_v26 }
 0x247   : > { %v2689_v38 = vmul.f32 %v6578_v39, %v6578_v39  ;;  %2743 = vadd.xlane.f32.xlu1 %v2742_v9 }
 0x248   : > { %v2561_v50 = vpop.xlane.xlu0 %2560 }
 0x249   : > { %v2627_v3 = vmul.f32 0.0625, %v2561_v50  ;;  %v2745_v15 = vsel %vm731_vm14, %v2689_v38, 0.0  ;;  %v2766_v50 = vsel %vm731_vm14, %v2696_v13, 0.0  ;;  %v2698_v38 = vmul.f32 %v6617_v25, %v6617_v25 }
 0x24a   : > { %2746 = vadd.xlane.f32.xlu0 %v2745_v15 }
 0x24b   : > { %v6590_v41 = vsub.f32 %v6365_v59, %v2627_v3  ;;  %2749 = vadd.xlane.f32.xlu1 %v2748_v7  ;;  %v2594_v59 = vpop.xlane.xlu1 %2593  ;;  %v2772_v7 = vsel %vm731_vm14, %v2698_v38, 0.0 }
 0x24c   : > { %v2638_v23 = vmul.f32 0.0625, %v2594_v59 }
 0x24d   : > { %v2567_v22 = vpop.xlane.xlu0 %2566  ;;  %v2691_v28 = vmul.f32 %v6590_v41, %v6590_v41 }
 0x24e   : > { %v2629_v55 = vmul.f32 0.0625, %v2567_v22  ;;  %v6639_v9 = vsub.f32 %v6142_v60, %v2638_v23 }
 0x24f   : > { %v2751_v43 = vsel %vm731_vm14, %v2691_v28, 0.0  ;;  %2755 = vadd.xlane.f32.xlu1 %v2754_v21  ;;  %v2600_v26 = vpop.xlane.xlu1 %2599  ;;  %v7914_v21 = vld [vmem:[#allocation11_spill] sm:$0xff] }
 0x250   : > { %v6602_v54 = vsub.f32 %v6385_v33, %v2629_v55  ;;  %2752 = vadd.xlane.f32.xlu0 %v2751_v43  ;;  %v2640_v30 = vmul.f32 0.0625, %v2600_v26  ;;  %v2702_v43 = vmul.f32 %v6639_v9, %v6639_v9  ;;  %v7916_v26 = vld [vmem:[#allocation9_spill] sm:$0xff] }
 0x251   : > { %v2573_v16 = vpop.xlane.xlu0 %2572 }
 0x252   : > { %v2631_v34 = vmul.f32 0.0625, %v2573_v16  ;;  %v2693_v18 = vmul.f32 %v6602_v54, %v6602_v54  ;;  %v6648_v28 = vsub.f32 %v6163_v47, %v2640_v30 }
 0x253   : > { %2761 = vadd.xlane.f32.xlu1 %v2760_v1  ;;  %v2606_v27 = vpop.xlane.xlu1 %2605 }
 0x254   : > { %v6613_v33 = vsub.f32 %v6403_v51, %v2631_v34  ;;  %v2757_v63 = vsel %vm731_vm14, %v2693_v18, 0.0  ;;  %v6625_v51 = vsub.f32 %v6115_v42, %v2636_v56  ;;  %v2642_v11 = vmul.f32 0.0625, %v2606_v27 }
 0x255   : > { %2758 = vadd.xlane.f32.xlu0 %v2757_v63  ;;  %v2784_v18 = vsel %vm731_vm14, %v2702_v43, 0.0  ;;  %v2704_v56 = vmul.f32 %v6648_v28, %v6648_v28 }
 0x256   : > { %v2695_v4 = vmul.f32 %v6613_v33, %v6613_v33  ;;  %v2700_v3 = vmul.f32 %v6625_v51, %v6625_v51  ;;  %v6659_v47 = vsub.f32 %v7914_v21, %v2642_v11  ;;  %v4507_v11 = vld [vmem:[%s7681_s7] sm:$0xff]  }
 0x257   : > { %2767 = vadd.xlane.f32.xlu1 %v2766_v50  ;;  %v2612_v59 = vpop.xlane.xlu1 %2611  ;;  %4395 = vmatprep.subr.bf16.mxu1 %v4507_v11 }
 0x258   : > { %v2579_v31 = vpop.xlane.xlu0 %2578  ;;  %v2763_v6 = vsel %vm731_vm14, %v2695_v4, 0.0  ;;  %v2778_v22 = vsel %vm731_vm14, %v2700_v3, 0.0  ;;  %7915 = vst [vmem:[#allocation12_spill] sm:$0xff] %v6659_v47  ;;  %v2644_v10 = vmul.f32 0.0625, %v2612_v59  ;;  %4396 = vmatpush3.bf16.msra.mxu1 %v4507_v11 }
 0x259   : > { %v2633_v49 = vmul.f32 0.0625, %v2579_v31  ;;  %2764 = vadd.xlane.f32.xlu0 %v2763_v6  ;;  %v2790_v31 = vsel %vm731_vm14, %v2704_v56, 0.0 }
 0x25a   : > { %v6671_v4 = vsub.f32 %v7916_v26, %v2644_v10 }
 0x25b   : > { %v6632_v44 = vsub.f32 %v6429_v19, %v2633_v49  ;;  %2773 = vadd.xlane.f32.xlu1 %v2772_v7  ;;  %v2706_v49 = vmul.f32 %v6659_v47, %v6659_v47 }
 0x25c   : > { %7917 = vst [vmem:[#allocation41_spill] sm:$0xff] %v6671_v4 }
 0x25d   : > { %v2585_v62 = vpop.xlane.xlu0 %2584  ;;  %v2697_v42 = vmul.f32 %v6632_v44, %v6632_v44  ;;  %v2796_v27 = vsel %vm731_vm14, %v2706_v49, 0.0 }
 0x25e   : > { %v2635_v15 = vmul.f32 0.0625, %v2585_v62  ;;  %v2708_v62 = vmul.f32 %v6671_v4, %v6671_v4 }
 0x25f   : > { %v2769_v20 = vsel %vm731_vm14, %v2697_v42, 0.0  ;;  %2779 = vadd.xlane.f32.xlu1 %v2778_v22 }
 0x260   : > { %v6644_v19 = vsub.f32 %v6449_v0, %v2635_v15  ;;  %2770 = vadd.xlane.f32.xlu0 %v2769_v20  ;;  %v2802_v7 = vsel %vm731_vm14, %v2708_v62, 0.0 }
 0x262   : > { %v2699_v60 = vmul.f32 %v6644_v19, %v6644_v19 }
 0x263   : > { %v2591_v55 = vpop.xlane.xlu0 %2590  ;;  %2785 = vadd.xlane.f32.xlu1 %v2784_v18 }
 0x264   : > { %v2637_v2 = vmul.f32 0.0625, %v2591_v55  ;;  %v2775_v0 = vsel %vm731_vm14, %v2699_v60, 0.0 }
 0x265   : > { %2776 = vadd.xlane.f32.xlu0 %v2775_v0 }
 0x266   : > { %v6656_v16 = vsub.f32 %v6474_v45, %v2637_v2 }
 0x267   : > { %v2597_v34 = vpop.xlane.xlu0 %2596  ;;  %2791 = vadd.xlane.f32.xlu1 %v2790_v31 }
 0x268   : > { %v2639_v63 = vmul.f32 0.0625, %v2597_v34  ;;  %v2701_v1 = vmul.f32 %v6656_v16, %v6656_v16 }
 0x26a   : > { %v6667_v13 = vsub.f32 %v6483_v14, %v2639_v63  ;;  %v2781_v45 = vsel %vm731_vm14, %v2701_v1, 0.0  ;;  %v6701_v1 = vld [vmem:[%s7679_s5] ss:$0 sm:$0xff] }
 0x26b   : > { %2782 = vadd.xlane.f32.xlu0 %v2781_v45  ;;  %2797 = vadd.xlane.f32.xlu1 %v2796_v27 }
 0x26c   : > { %v2703_v23 = vmul.f32 %v6667_v13, %v6667_v13 }
 0x26d   : > { %v2603_v6 = vpop.xlane.xlu0 %2602 }
 0x26e   : > { %v2641_v50 = vmul.f32 0.0625, %v2603_v6  ;;  %v2787_v14 = vsel %vm731_vm14, %v2703_v23, 0.0  ;;  %v6707_v6 = vld [vmem:[%s7680_s6] ss:$0 sm:$0xff] }
 0x26f   : > { %2788 = vadd.xlane.f32.xlu0 %v2787_v14  ;;  %2803 = vadd.xlane.f32.xlu1 %v2802_v7 }
 0x270   : > { %v6680_v38 = vsub.f32 %v6494_v12, %v2641_v50 }
 0x272   : > { %7918 = vst [vmem:[#allocation14_spill] sm:$0xff] %v6680_v38  ;;  %v2705_v3 = vmul.f32 %v6680_v38, %v6680_v38 }
 0x273   : > { %v2609_v42 = vpop.xlane.xlu0 %2608 }
 0x274   : > { %v2643_v30 = vmul.f32 0.0625, %v2609_v42  ;;  %v2793_v15 = vsel %vm731_vm14, %v2705_v3, 0.0 }
 0x275   : > { %2794 = vadd.xlane.f32.xlu0 %v2793_v15 }
 0x276   : > { %v6690_v20 = vsub.f32 %v6499_v53, %v2643_v30 }
 0x278   : > { %7919 = vst [vmem:[#allocation40_spill] sm:$0xff] %v6690_v20  ;;  %v2707_v12 = vmul.f32 %v6690_v20, %v6690_v20 }
 0x27a   : > { %v2799_v22 = vsel %vm731_vm14, %v2707_v12, 0.0 }
 0x27b   : > { %2800 = vadd.xlane.f32.xlu0 %v2799_v22 }
 0x2b7   : > { %v2711_v55 = vpop.xlane.xlu0 %2710 }
 0x2b8   : > { %v2805_v60 = vmul.f32 0.0625, %v2711_v55 }
 0x2ba   : > { %v2837_v43 = vadd.f32 1e-05, %v2805_v60 }
 0x2bb   : > { %v2717_v59 = vpop.xlane.xlu0 %2716 }
 0x2bc   : > { %4508 = vrsqrt.f32 %v2837_v43  ;;  %v2807_v53 = vmul.f32 0.0625, %v2717_v59 }
 0x2be   : > { %v2839_v2 = vadd.f32 1e-05, %v2807_v53 }
 0x2c0   : > { %v2714_v0 = vpop.xlane.xlu1 %2713  ;;  %4510 = vrsqrt.f32 %v2839_v2 }
 0x2c1   : > { %v2806_v21 = vmul.f32 0.0625, %v2714_v0 }
 0x2c3   : > { %v2838_v10 = vadd.f32 1e-05, %v2806_v21 }
 0x2c4   : > { %v2720_v34 = vpop.xlane.xlu1 %2719  ;;  %v2723_v18 = vpop.xlane.xlu0 %2722 }
 0x2c5   : > { %4512 = vrsqrt.f32 %v2838_v10  ;;  %v2808_v56 = vmul.f32 0.0625, %v2720_v34  ;;  %v2809_v14 = vmul.f32 0.0625, %v2723_v18 }
 0x2c6   : > { %v4509_v63 = vpop.eup %4508 }
 0x2c7   : > { %v2840_v45 = vadd.f32 1e-05, %v2808_v56  ;;  %v2901_v49 = vmul.f32 %v4509_v63, %v6507_v8  ;;  %v2841_v7 = vadd.f32 1e-05, %v2809_v14 }
 0x2c8   : > { %v2726_v26 = vpop.xlane.xlu1 %2725  ;;  %v2729_v31 = vpop.xlane.xlu0 %2728 }
 0x2c9   : > { %4514 = vrsqrt.f32 %v2840_v45  ;;  %v2940_v23 = vmul.f32 %v6701_v1, %v2901_v49  ;;  %v2810_v3 = vmul.f32 0.0625, %v2726_v26  ;;  %v2811_v43 = vmul.f32 0.0625, %v2729_v31 }
 0x2ca   : > { %v4511_v50 = vpop.eup %4510  ;;  %4516 = vrsqrt.f32 %v2841_v7 }
 0x2cb   : > { %v6711_v42 = vadd.f32 %v6707_v6, %v2940_v23  ;;  %v2903_v30 = vmul.f32 %v4511_v50, %v6504_v17  ;;  %v2842_v60 = vadd.f32 1e-05, %v2810_v3 }
 0x2cc   : > { %v2732_v27 = vpop.xlane.xlu1 %2731  ;;  %v2735_v62 = vpop.xlane.xlu0 %2734 }
 0x2cd   : > { %v6715_v8 = vmul.f32 0.70710677, %v6711_v42  ;;  %v2942_v59 = vmul.f32 %v6701_v1, %v2903_v30  ;;  %v2812_v21 = vmul.f32 0.0625, %v2732_v27  ;;  %4518 = vrsqrt.f32 %v2842_v60 }
 0x2ce   : > { %v2813_v56 = vmul.f32 0.0625, %v2735_v62 }
 0x2cf   : > { %v4513_v15 = vpop.eup %4512  ;;  %v3075_v55 = vand.u32 2147483647, %v6715_v8  ;;  %v2981_v31 = vadd.f32 %v6707_v6, %v2942_v59  ;;  %vm3683_vm9 = vcmp.ge.f32.partialorder %v6715_v8, 0.0 }
 0x2d0   : > { %v2738_v12 = vpop.xlane.xlu1 %2737  ;;  %v2902_v11 = vmul.f32 %v4513_v15, %v6518_v5  ;;  %v2843_v5 = vadd.f32 1e-05, %v2811_v43  ;;  %v2845_v27 = vadd.f32 1e-05, %v2813_v56 }
 0x2d1   : > { %v2741_v22 = vpop.xlane.xlu0 %2740  ;;  %v3107_v2 = vmul.f32 0.3275911, %v3075_v55  ;;  %v2814_v26 = vmul.f32 0.0625, %v2738_v12  ;;  %v6734_v7 = vmul.f32 0.70710677, %v2981_v31 }
 0x2d2   : > { %v2941_v53 = vmul.f32 %v6701_v1, %v2902_v11  ;;  %v2815_v49 = vmul.f32 0.0625, %v2741_v22 }
 0x2d3   : > { %v4515_v0 = vpop.eup %4514  ;;  %v3139_v18 = vadd.f32 1.0, %v3107_v2  ;;  %v2846_v3 = vadd.f32 1e-05, %v2814_v26  ;;  %vm3685_vm12 = vcmp.ge.f32.partialorder %v6734_v7, 0.0 }
 0x2d4   : > { %v2904_v17 = vmul.f32 %v4515_v0, %v6515_v61  ;;  %v2744_v10 = vpop.xlane.xlu1 %2743  ;;  %v6723_v34 = vadd.f32 %v6707_v6, %v2941_v53  ;;  %v2844_v61 = vadd.f32 1e-05, %v2812_v21  ;;  %v2847_v12 = vadd.f32 1e-05, %v2815_v49  ;;  %v4517_v53 = vpop.eup %4516 }
 0x2d5   : > { %4520 = vrcp.f32 %v3139_v18  ;;  %v2816_v30 = vmul.f32 0.0625, %v2744_v10  ;;  %v3491_v0 = vsub.f32 0.0, %v3075_v55  ;;  %v6740_v10 = vand.u32 2147483647, %v6734_v7 }
 0x2d6   : > { %v2943_v45 = vmul.f32 %v6701_v1, %v2904_v17  ;;  %v6728_v23 = vmul.f32 0.70710677, %v6723_v34  ;;  %4522 = vrsqrt.f32 %v2843_v5 }
 0x2d7   : > { %v2747_v63 = vpop.xlane.xlu0 %2746  ;;  %4524 = vrsqrt.f32 %v2844_v61  ;;  %v2848_v17 = vadd.f32 1e-05, %v2816_v30  ;;  %v4519_v18 = vpop.eup %4518  ;;  %v6746_v61 = vmul.f32 0.5, %v6711_v42  ;;  %v6750_v30 = vmul.f32 0.5, %v2981_v31 }
 0x2d8   : > { %v2750_v50 = vpop.xlane.xlu1 %2749  ;;  %v6731_v14 = vadd.f32 %v6707_v6, %v2943_v45  ;;  %v3076_v62 = vand.u32 2147483647, %v6728_v23  ;;  %v2817_v22 = vmul.f32 0.0625, %v2747_v63  ;;  %4526 = vrsqrt.f32 %v2845_v27 }
 0x2d9   : > { %v2818_v60 = vmul.f32 0.0625, %v2750_v50  ;;  %4528 = vrsqrt.f32 %v2846_v3  ;;  %v3523_v3 = vmul.f32 %v3491_v0, %v3075_v55  ;;  %vm3684_vm11 = vcmp.ge.f32.partialorder %v6728_v23, 0.0 }
 0x2da   : > { %v3108_v11 = vmul.f32 0.3275911, %v3076_v62  ;;  %v6737_v59 = vmul.f32 0.70710677, %v6731_v14  ;;  %4530 = vrsqrt.f32 %v2847_v12  ;;  %v2849_v5 = vadd.f32 1e-05, %v2817_v22 }
 0x2db   : > { %v2850_v45 = vadd.f32 1e-05, %v2818_v60  ;;  %v2905_v12 = vmul.f32 %v4517_v53, %v6527_v32  ;;  %v2906_v22 = vmul.f32 %v4519_v18, %v6524_v35  ;;  %v3555_v32 = vmul.f32 1.442695, %v3523_v3 }
 0x2dc   : > { %v2756_v43 = vpop.xlane.xlu1 %2755  ;;  %v3140_v21 = vadd.f32 1.0, %v3108_v11  ;;  %v6743_v63 = vand.u32 2147483647, %v6737_v59  ;;  %vm3686_vm13 = vcmp.ge.f32.partialorder %v6737_v59, 0.0 }
 0x2dd   : > { %v2753_v15 = vpop.xlane.xlu0 %2752  ;;  %v2820_v26 = vmul.f32 0.0625, %v2756_v43  ;;  %v3492_v43 = vsub.f32 0.0, %v3076_v62  ;;  %v6760_v47 = vmul.f32 %v6701_v1, %v2905_v12  ;;  %v6769_v12 = vmul.f32 0.5, %v6731_v14 }
 0x2de   : > { %v2819_v2 = vmul.f32 0.0625, %v2753_v15  ;;  %4532 = vrcp.f32 %v3140_v21  ;;  %v3109_v15 = vmul.f32 0.3275911, %v6740_v10  ;;  %v3110_v21 = vmul.f32 0.3275911, %v6743_v63 }
 0x2df   : > { %v6748_v50 = vpop.eup %4520  ;;  %4534 = vrsqrt.f32 %v2848_v17  ;;  %v2852_v55 = vadd.f32 1e-05, %v2820_v26 }
 0x2e0   : > { %v2762_v49 = vpop.xlane.xlu1 %2761  ;;  %v2851_v27 = vadd.f32 1e-05, %v2819_v2  ;;  %v3203_v11 = vmul.f32 1.0614054, %v6748_v50  ;;  %v4523_v60 = vpop.eup %4522  ;;  %4536 = vrsqrt.f32 %v2849_v5  ;;  %v3141_v20 = vadd.f32 1.0, %v3109_v15 }
 0x2e1   : > { %4538 = vrsqrt.f32 %v2850_v45  ;;  %v2822_v4 = vmul.f32 0.0625, %v2762_v49  ;;  %v3142_v53 = vadd.f32 1.0, %v3110_v21  ;;  %v4525_v35 = vpop.eup %4524  ;;  %v2907_v17 = vmul.f32 %v4523_v60, %v6540_v37 }
 0x2e2   : > { %v2759_v56 = vpop.xlane.xlu0 %2758  ;;  %v3235_v0 = vadd.f32 -1.4531521, %v3203_v11  ;;  %4540 = vrsqrt.f32 %v2851_v27  ;;  %v4527_v38 = vpop.eup %4526  ;;  %v6763_v45 = vmul.f32 0.5, %v6723_v34  ;;  %v6766_v11 = vmul.f32 %v6701_v1, %v2906_v22 }
 0x2e3   : > { %v2821_v31 = vmul.f32 0.0625, %v2759_v56  ;;  %4542 = vrcp.f32 %v3141_v20  ;;  %v3524_v56 = vmul.f32 %v3492_v43, %v3076_v62  ;;  %v4529_v26 = vpop.eup %4528  ;;  %v2854_v20 = vadd.f32 1e-05, %v2822_v4 }
 0x2e4   : > { %v2768_v2 = vpop.xlane.xlu1 %2767  ;;  %v3267_v5 = vmul.f32 %v6748_v50, %v3235_v0  ;;  %4544 = vrcp.f32 %v3142_v53  ;;  %v4531_v37 = vpop.eup %4530  ;;  %v6774_v34 = vmul.f32 %v6701_v1, %v2907_v17  ;;  %v2908_v62 = vmul.f32 %v4525_v35, %v6535_v29 }
 0x2e5   : > { %4546 = vrsqrt.f32 %v2852_v55  ;;  %v2853_v49 = vadd.f32 1e-05, %v2821_v31  ;;  %v2824_v27 = vmul.f32 0.0625, %v2768_v2  ;;  %v2909_v21 = vmul.f32 %v4527_v38, %v6553_v58 }
 0x2e6   : > { %v2765_v42 = vpop.xlane.xlu0 %2764  ;;  %v3299_v15 = vadd.f32 1.4214138, %v3267_v5  ;;  %4548 = vpow2.f32 %v3555_v32  ;;  %v2910_v22 = vmul.f32 %v4529_v26, %v6550_v36  ;;  %v3557_v31 = vmul.f32 1.442695, %v3524_v56 }
 0x2e7   : > { %v2823_v18 = vmul.f32 0.0625, %v2765_v42  ;;  %v2911_v2 = vmul.f32 %v4531_v37, %v6563_v48  ;;  %4550 = vrsqrt.f32 %v2853_v49  ;;  %v2856_v0 = vadd.f32 1e-05, %v2824_v27 }
 0x2e8   : > { %v2774_v3 = vpop.xlane.xlu1 %2773  ;;  %v6771_v60 = vpop.eup %4532  ;;  %v3331_v43 = vmul.f32 %v6748_v50, %v3299_v15  ;;  %4552 = vrsqrt.f32 %v2854_v20  ;;  %v3493_v17 = vsub.f32 0.0, %v6740_v10  ;;  %v6784_v58 = vmul.f32 %v6701_v1, %v2908_v62 }
 0x2e9   : > { %v2855_v42 = vadd.f32 1e-05, %v2823_v18  ;;  %v3204_v4 = vmul.f32 1.0614054, %v6771_v60  ;;  %v4535_v14 = vpop.eup %4534  ;;  %v2826_v29 = vmul.f32 0.0625, %v2774_v3  ;;  %v6788_v48 = vmul.f32 %v6701_v1, %v2909_v21 }
 0x2ea   : > { %v3363_v32 = vadd.f32 -0.28449672, %v3331_v43  ;;  %v4537_v53 = vpop.eup %4536  ;;  %v2912_v26 = vmul.f32 %v4535_v14, %v6560_v57  ;;  %v6795_v3 = vmul.f32 %v6701_v1, %v2910_v22  ;;  %v3494_v37 = vsub.f32 0.0, %v6743_v63 }
 0x2eb   : > { %v3236_v35 = vadd.f32 -1.4531521, %v3204_v4  ;;  %v4539_v18 = vpop.eup %4538  ;;  %4554 = vrsqrt.f32 %v2855_v42  ;;  %v6801_v62 = vmul.f32 %v6701_v1, %v2911_v2  ;;  %v2913_v42 = vmul.f32 %v4537_v53, %v6578_v39 }
 0x2ec   : > { %v2780_v38 = vpop.xlane.xlu1 %2779  ;;  %v3395_v5 = vmul.f32 %v6748_v50, %v3363_v32  ;;  %v4541_v56 = vpop.eup %4540  ;;  %4556 = vpow2.f32 %v3557_v31  ;;  %v2858_v57 = vadd.f32 1e-05, %v2826_v29  ;;  %v3525_v21 = vmul.f32 %v3493_v17, %v6740_v10 }
 0x2ed   : > { %v2771_v55 = vpop.xlane.xlu0 %2770  ;;  %v3268_v49 = vmul.f32 %v6771_v60, %v3236_v35  ;;  %v6792_v27 = vpop.eup %4542  ;;  %4558 = vrsqrt.f32 %v2856_v0  ;;  %v6808_v32 = vmul.f32 %v6701_v1, %v2912_v26  ;;  %v2914_v2 = vmul.f32 %v4539_v18, %v6571_v46 }
 0x2ee   : > { %v2825_v36 = vmul.f32 0.0625, %v2771_v55  ;;  %v3427_v15 = vadd.f32 0.2548296, %v3395_v5  ;;  %v6798_v20 = vpop.eup %4544  ;;  %v3205_v14 = vmul.f32 1.0614054, %v6792_v27  ;;  %v2828_v35 = vmul.f32 0.0625, %v2780_v38 }
 0x2ef   : > { %v4547_v55 = vpop.eup %4546  ;;  %v3300_v31 = vadd.f32 1.4214138, %v3268_v49  ;;  %v3206_v39 = vmul.f32 1.0614054, %v6798_v20  ;;  %v2915_v53 = vmul.f32 %v4541_v56, %v6590_v41  ;;  %4560 = vrsqrt.f32 %v2858_v57 }
 0x2f0   : > { %v2857_v4 = vadd.f32 1e-05, %v2825_v36  ;;  %v3459_v22 = vmul.f32 %v6748_v50, %v3427_v15  ;;  %v4549_v0 = vpop.eup %4548  ;;  %v2786_v29 = vpop.xlane.xlu1 %2785  ;;  %v3526_v50 = vmul.f32 %v3494_v37, %v6743_v63  ;;  %v2916_v36 = vmul.f32 %v4547_v55, %v6585_v24 }
 0x2f1   : > { %v3332_v10 = vmul.f32 %v6771_v60, %v3300_v31  ;;  %v3237_v26 = vadd.f32 -1.4531521, %v3205_v14  ;;  %v4551_v49 = vpop.eup %4550  ;;  %v6819_v46 = vmul.f32 %v6701_v1, %v2913_v42  ;;  %v3559_v38 = vmul.f32 1.442695, %v3525_v21 }
 0x2f2   : > { %v2777_v43 = vpop.xlane.xlu0 %2776  ;;  %v6814_v17 = vmul.f32 %v4549_v0, %v3459_v22  ;;  %4562 = vrsqrt.f32 %v2857_v4  ;;  %v4553_v41 = vpop.eup %4552  ;;  %v6822_v56 = vmul.f32 %v6701_v1, %v2914_v2  ;;  %v2860_v15 = vadd.f32 1e-05, %v2828_v35 }
 0x2f3   : > { %v2827_v5 = vmul.f32 0.0625, %v2777_v43  ;;  %v3364_v18 = vadd.f32 -0.28449672, %v3332_v10  ;;  %v3238_v63 = vadd.f32 -1.4531521, %v3206_v39  ;;  %v3269_v24 = vmul.f32 %v6792_v27, %v3237_v26 }
 0x2f4   : > { %v6827_v57 = vmul.f32 %v6701_v1, %v2915_v53  ;;  %v2830_v42 = vmul.f32 0.0625, %v2786_v29  ;;  %v3651_v21 = vsub.f32 1.0, %v6814_v17  ;;  %v6832_v4 = vmul.f32 %v6701_v1, %v2916_v36  ;;  %v2792_v39 = vpop.xlane.xlu1 %2791 }
 0x2f5   : > { %v4555_v37 = vpop.eup %4554  ;;  %v3396_v43 = vmul.f32 %v6771_v60, %v3364_v18  ;;  %v2917_v22 = vmul.f32 %v4551_v49, %v6602_v54  ;;  %v2859_v14 = vadd.f32 1e-05, %v2827_v5  ;;  %v3561_v0 = vmul.f32 1.442695, %v3526_v50 }
 0x2f6   : > { %v4557_v55 = vpop.eup %4556  ;;  %v3270_v53 = vmul.f32 %v6798_v20, %v3238_v63  ;;  %4564 = vpow2.f32 %v3559_v38  ;;  %v2918_v29 = vmul.f32 %v4553_v41, %v6594_v40  ;;  %v2919_v26 = vmul.f32 %v4555_v37, %v6613_v33 }
 0x2f7   : > { %v4559_v2 = vpop.eup %4558  ;;  %v3428_v10 = vadd.f32 0.2548296, %v3396_v43  ;;  %4566 = vrsqrt.f32 %v2860_v15  ;;  %v3301_v17 = vadd.f32 1.4214138, %v3269_v24  ;;  %v2862_v36 = vadd.f32 1e-05, %v2830_v42 }
 0x2f8   : > { %v2783_v31 = vpop.xlane.xlu0 %2782  ;;  %v3715_v5 = vsub.f32 0.0, %v3651_v21  ;;  %v6842_v50 = vadd.f32 %v6707_v6, %v6760_v47  ;;  %v2920_v49 = vmul.f32 %v4559_v2, %v6605_v52  ;;  %4568 = vrsqrt.f32 %v2859_v14  ;;  %v2798_v14 = vpop.xlane.xlu1 %2797 }
 0x2f9   : > { %v2829_v35 = vmul.f32 0.0625, %v2783_v31  ;;  %v3460_v54 = vmul.f32 %v6771_v60, %v3428_v10  ;;  %v2832_v38 = vmul.f32 0.0625, %v2792_v39  ;;  %v3302_v40 = vadd.f32 1.4214138, %v3270_v53  ;;  %v4561_v31 = vpop.eup %4560 }
 0x2fa   : > { %v6846_v33 = vmul.f32 %v6701_v1, %v2917_v22  ;;  %4570 = vpow2.f32 %v3561_v0  ;;  %v6849_v60 = vmul.f32 %v6701_v1, %v2918_v29  ;;  %v6852_v63 = vmul.f32 %v6701_v1, %v2919_v26 }
 0x2fb   : > { %v2861_v41 = vadd.f32 1e-05, %v2829_v35  ;;  %v3620_v15 = vmul.f32 %v4557_v55, %v3460_v54  ;;  %v3333_v47 = vmul.f32 %v6792_v27, %v3301_v17  ;;  %v3334_v52 = vmul.f32 %v6798_v20, %v3302_v40 }
 0x2fc   : > { %v2789_v18 = vpop.xlane.xlu0 %2788  ;;  %v4563_v24 = vpop.eup %4562  ;;  %4572 = vrsqrt.f32 %v2862_v36  ;;  %v3747_v43 = vsel %vm3683_vm9, %v3651_v21, %v3715_v5  ;;  %v6859_v55 = vmul.f32 %v6701_v1, %v2920_v49  ;;  %v2864_v22 = vadd.f32 1e-05, %v2832_v38 }
 0x2fd   : > { %v2831_v37 = vmul.f32 0.0625, %v2789_v18  ;;  %v3652_v42 = vsub.f32 1.0, %v3620_v15  ;;  %v3365_v0 = vadd.f32 -0.28449672, %v3333_v47  ;;  %v3366_v2 = vadd.f32 -0.28449672, %v3334_v52 }
 0x2fe   : > { %v2922_v35 = vmul.f32 %v4561_v31, %v6617_v25  ;;  %4574 = vrsqrt.f32 %v2861_v41  ;;  %v6864_v10 = vadd.f32 %v6707_v6, %v6766_v11  ;;  %v2921_v53 = vmul.f32 %v4563_v24, %v6632_v44  ;;  %v2804_v31 = vpop.xlane.xlu1 %2803 }
 0x2ff   : > { %v3716_v39 = vsub.f32 0.0, %v3652_v42  ;;  %v3779_v8 = vadd.f32 1.0, %v3747_v43  ;;  %v3397_v21 = vmul.f32 %v6792_v27, %v3365_v0  ;;  %v3398_v26 = vmul.f32 %v6798_v20, %v3366_v2 }
 0x300   : > { %v4565_v17 = vpop.eup %4564  ;;  %v2863_v36 = vadd.f32 1e-05, %v2831_v37  ;;  %v2834_v54 = vmul.f32 0.0625, %v2798_v14  ;;  %v6872_v5 = vmul.f32 0.70710677, %v6842_v50  ;;  %4576 = vrsqrt.f32 %v2864_v22 }
 0x301   : > { %v3748_v25 = vsel %vm3684_vm11, %v3652_v42, %v3716_v39  ;;  %v4567_v49 = vpop.eup %4566  ;;  %v3429_v18 = vadd.f32 0.2548296, %v3397_v21  ;;  %v3430_v44 = vadd.f32 0.2548296, %v3398_v26  ;;  %v6875_v38 = vmul.f32 %v6701_v1, %v2922_v35 }
 0x302   : > { %v2795_v29 = vpop.xlane.xlu0 %2794  ;;  %v3780_v11 = vadd.f32 1.0, %v3748_v25  ;;  %v6880_v41 = vmul.f32 0.70710677, %v6864_v10  ;;  %v3079_v23 = vand.u32 2147483647, %v6872_v5  ;;  %v4569_v15 = vpop.eup %4568  ;;  %v3811_v47 = vmul.f32 %v3779_v8, %v6746_v61 }
 0x303   : > { %v2833_v40 = vmul.f32 0.0625, %v2795_v29  ;;  %v3461_v24 = vmul.f32 %v6792_v27, %v3429_v18  ;;  %v3462_v37 = vmul.f32 %v6798_v20, %v3430_v44  ;;  %v2924_v43 = vmul.f32 %v4567_v49, %v6625_v51 }
 0x304   : > { %v3812_v52 = vmul.f32 %v3780_v11, %v6763_v45  ;;  %v4571_v42 = vpop.eup %4570  ;;  %v2866_v22 = vadd.f32 1e-05, %v2834_v54  ;;  %v3080_v14 = vand.u32 2147483647, %v6880_v41  ;;  %v3111_v0 = vmul.f32 0.3275911, %v3079_v23 }
 0x305   : > { %4578 = vrsqrt.f32 %v2863_v36  ;;  %v3621_v35 = vmul.f32 %v4565_v17, %v3461_v24  ;;  %v3622_v39 = vmul.f32 %v4571_v42, %v3462_v37  ;;  %v2923_v61 = vmul.f32 %v4569_v15, %v6644_v19 }
 0x306   : > { %v3843_v2 = vpack.c.bf16 %v3812_v52, %v3811_v47  ;;  %v4573_v29 = vpop.eup %4572  ;;  %v2836_v8 = vmul.f32 0.0625, %v2804_v31  ;;  %v3112_v45 = vmul.f32 0.3275911, %v3080_v14  ;;  %v3143_v21 = vadd.f32 1.0, %v3111_v0 }
 0x307   : > { %v2865_v27 = vadd.f32 1e-05, %v2833_v40  ;;  %v3653_v20 = vsub.f32 1.0, %v3621_v35  ;;  %v3654_v26 = vsub.f32 1.0, %v3622_v39  ;;  %v3495_v51 = vsub.f32 0.0, %v3079_v23 }
 0x308   : > { %4397 = vmatprep.mubr.msk.bf16.mxu1 %vm731_vm14, %v3843_v2  ;;  %v4575_v54 = vpop.eup %4574  ;;  %v6892_v25 = vmul.f32 %v6701_v1, %v2921_v53  ;;  %v3144_v36 = vadd.f32 1.0, %v3112_v45  ;;  %4580 = vrcp.f32 %v3143_v21  ;;  %v3496_v17 = vsub.f32 0.0, %v3080_v14  ;;  %v2801_v40 = vpop.xlane.xlu0 %2800 }
 0x309   : > { %v6895_v49 = vmul.f32 %v6701_v1, %v2924_v43  ;;  %4582 = vrsqrt.f32 %v2866_v22  ;;  %v3717_v19 = vsub.f32 0.0, %v3653_v20  ;;  %v3718_v11 = vsub.f32 0.0, %v3654_v26 }
 0x30a   : > { %v6898_v18 = vmul.f32 %v6701_v1, %v2923_v61  ;;  %v2926_v44 = vmul.f32 %v4573_v29, %v6639_v9  ;;  %v2868_v15 = vadd.f32 1e-05, %v2836_v8  ;;  %4584 = vrcp.f32 %v3144_v36  ;;  %v4577_v31 = vpop.eup %4576 }
 0x30b   : > { %4586 = vrsqrt.f32 %v2865_v27  ;;  %v3749_v53 = vsel %vm3685_vm12, %v3653_v20, %v3717_v19  ;;  %v3750_v47 = vsel %vm3686_vm13, %v3654_v26, %v3718_v11  ;;  %v3527_v52 = vmul.f32 %v3495_v51, %v3079_v23 }
 0x30c   : > { %v3781_v24 = vadd.f32 1.0, %v3749_v53  ;;  %v3782_v37 = vadd.f32 1.0, %v3750_v47  ;;  %v3528_v42 = vmul.f32 %v3496_v17, %v3080_v14  ;;  %v6907_v43 = vadd.f32 %v6707_v6, %v6774_v34 }
 0x30d   : > { %v2835_v9 = vmul.f32 0.0625, %v2801_v40  ;;  %v6910_v22 = vmul.f32 0.5, %v6842_v50  ;;  %v6914_v0 = vadd.f32 %v6707_v6, %v6784_v58  ;;  %v6918_v7 = vadd.f32 %v6707_v6, %v6788_v48 }
 0x30e   : > { %v3813_v59 = vmul.f32 %v3781_v24, %v6750_v30  ;;  %v3814_v23 = vmul.f32 %v3782_v37, %v6769_v12  ;;  %v6923_v14 = vmul.f32 0.70710677, %v6907_v43  ;;  %v6927_v34 = vadd.f32 %v6707_v6, %v6795_v3 }
 0x30f   : > { %v6929_v50 = vpop.eup %4578  ;;  %v6932_v58 = vmul.f32 %v6701_v1, %v2926_v44  ;;  %4588 = vrsqrt.f32 %v2868_v15  ;;  %v3563_v2 = vmul.f32 1.442695, %v3527_v52  ;;  %v6935_v48 = vmul.f32 0.70710677, %v6914_v0 }
 0x310   : > { %v3844_v30 = vpack.c.bf16 %v3814_v23, %v3813_v59  ;;  %v6938_v12 = vmul.f32 0.5, %v6864_v10  ;;  %v3565_v35 = vmul.f32 1.442695, %v3528_v42  ;;  %v3081_v39 = vand.u32 2147483647, %v6923_v14 }
 0x311   : > { %7920 = vst [vmem:[#allocation15_spill] sm:$0xff] %v6932_v58  ;;  %v2925_v3 = vmul.f32 %v4575_v54, %v6656_v16  ;;  %v6942_v29 = vadd.f32 1e-05, %v2835_v9  ;;  %v3082_v61 = vand.u32 2147483647, %v6935_v48  ;;  %v2928_v21 = vmul.f32 %v4577_v31, %v6648_v28 }
 0x312   : > { %v6946_v8 = vmul.f32 0.70710677, %v6918_v7  ;;  %v6948_v45 = vpop.eup %4580  ;;  %4398 = vmatmul.mubr.msk.bf16.vlgmr.msra.gmra.mrb[0].mxu1 %vm731_vm14, %v3844_v30  ;;  %v3113_v10 = vmul.f32 0.3275911, %v3081_v39  ;;  %v3497_v27 = vsub.f32 0.0, %v3081_v39  ;;  %4590 = vpow2.f32 %v3563_v2 }
 0x313   : > { %v6953_v20 = vmul.f32 0.70710677, %v6927_v34  ;;  %v6955_v26 = vpop.eup %4582  ;;  %v3207_v16 = vmul.f32 1.0614054, %v6948_v45  ;;  %v3114_v51 = vmul.f32 0.3275911, %v3082_v61  ;;  %4592 = vpow2.f32 %v3565_v35 }
 0x314   : > { %v3498_v54 = vsub.f32 0.0, %v3082_v61  ;;  %v6958_v36 = vpop.eup %4584  ;;  %v3145_v17 = vadd.f32 1.0, %v3113_v10  ;;  %v3083_v28 = vand.u32 2147483647, %v6946_v8  ;;  %v3529_v31 = vmul.f32 %v3497_v27, %v3081_v39 }
 0x315   : > { %v3084_v19 = vand.u32 2147483647, %v6953_v20  ;;  %v6962_v11 = vpop.eup %4586  ;;  %v3208_v44 = vmul.f32 1.0614054, %v6958_v36  ;;  %v3239_v40 = vadd.f32 -1.4531521, %v3207_v16  ;;  %v6966_v24 = vmul.f32 %v6701_v1, %v2925_v3 }
 0x316   : > { %v3146_v15 = vadd.f32 1.0, %v3114_v51  ;;  %4594 = vrcp.f32 %v3145_v17  ;;  %v3530_v53 = vmul.f32 %v3498_v54, %v3082_v61  ;;  %v3115_v47 = vmul.f32 0.3275911, %v3083_v28 }
 0x317   : > { %v3116_v52 = vmul.f32 0.3275911, %v3084_v19  ;;  %7921 = vst [vmem:[#allocation16_spill] sm:$0xff] %v6966_v24  ;;  %v3240_v37 = vadd.f32 -1.4531521, %v3208_v44  ;;  %v3271_v42 = vmul.f32 %v6948_v45, %v3239_v40  ;;  %v3499_v23 = vsub.f32 0.0, %v3083_v28 }
 0x318   : > { %4596 = vrcp.f32 %v3146_v15  ;;  %v3147_v9 = vadd.f32 1.0, %v3115_v47  ;;  %v6971_v2 = vadd.f32 %v6707_v6, %v6801_v62  ;;  %v3567_v61 = vmul.f32 1.442695, %v3529_v31 }
 0x319   : > { %v3148_v59 = vadd.f32 1.0, %v3116_v52  ;;  %v6973_v30 = vpop.eup %4588  ;;  %v3272_v35 = vmul.f32 %v6958_v36, %v3240_v37  ;;  %v3303_v39 = vadd.f32 1.4214138, %v3271_v42  ;;  %v6978_v3 = vadd.f32 %v6707_v6, %v6808_v32 }
 0x31a   : > { %7922 = vst [vmem:[#allocation17_spill] sm:$0xff] %v6973_v30  ;;  %v6981_v10 = vmul.f32 %v6701_v1, %v2928_v21  ;;  %v3569_v27 = vmul.f32 1.442695, %v3530_v53  ;;  %4598 = vrcp.f32 %v3147_v9  ;;  %v3531_v16 = vmul.f32 %v3499_v23, %v3083_v28 }
 0x31b   : > { %v3304_v51 = vadd.f32 1.4214138, %v3272_v35  ;;  %v3335_v62 = vmul.f32 %v6948_v45, %v3303_v39  ;;  %4600 = vrcp.f32 %v3148_v59  ;;  %v3500_v54 = vsub.f32 0.0, %v3084_v19 }
 0x31c   : > { %7923 = vst [vmem:[#allocation18_spill] sm:$0xff] %v6981_v10  ;;  %v6985_v17 = vmul.f32 0.5, %v6907_v43  ;;  %v6988_v44 = vmul.f32 0.5, %v6914_v0  ;;  %v3571_v40 = vmul.f32 1.442695, %v3531_v16  ;;  %v4591_v1 = vpop.eup %4590  ;;  %4602 = vpow2.f32 %v3567_v61 }
 0x31d   : > { %v6991_v32 = vmul.f32 0.70710677, %v6971_v2  ;;  %v3336_v21 = vmul.f32 %v6958_v36, %v3304_v51  ;;  %v3367_v15 = vadd.f32 -0.28449672, %v3335_v62  ;;  %v6995_v28 = vmul.f32 0.70710677, %v6978_v3  ;;  %v4593_v31 = vpop.eup %4592 }
 0x31e   : > { %4604 = vpow2.f32 %v3569_v27  ;;  %v6998_v43 = vmul.f32 0.5, %v6918_v7  ;;  %v7001_v0 = vmul.f32 0.5, %v6927_v34  ;;  %v3532_v37 = vmul.f32 %v3500_v54, %v3084_v19 }
 0x31f   : > { %v3085_v53 = vand.u32 2147483647, %v6991_v32  ;;  %v3368_v47 = vadd.f32 -0.28449672, %v3336_v21  ;;  %v3399_v52 = vmul.f32 %v6948_v45, %v3367_v15  ;;  %v3086_v42 = vand.u32 2147483647, %v6995_v28 }
 0x320   : > { %v7006_v9 = vpop.eup %4594  ;;  %4606 = vpow2.f32 %v3571_v40  ;;  %v7010_v7 = vadd.f32 %v6707_v6, %v6819_v46  ;;  %vm3687_vm15 = vcmp.ge.f32.partialorder %v6872_v5, 0.0  ;;  %vm3688_vm0 = vcmp.ge.f32.partialorder %v6880_v41, 0.0 }
 0x321   : > { %v3117_v59 = vmul.f32 0.3275911, %v3085_v53  ;;  %v3501_v23 = vsub.f32 0.0, %v3085_v53  ;;  %v3400_v34 = vmul.f32 %v6958_v36, %v3368_v47  ;;  %v3431_v39 = vadd.f32 0.2548296, %v3399_v52 }
 0x322   : > { %v7012_v35 = vpop.eup %4596  ;;  %v3209_v61 = vmul.f32 1.0614054, %v7006_v9  ;;  %v3118_v27 = vmul.f32 0.3275911, %v3086_v42  ;;  %v3502_v51 = vsub.f32 0.0, %v3086_v42  ;;  %vm3689_vm1 = vcmp.ge.f32.partialorder %v6923_v14, 0.0 }
 0x323   : > { %v3210_v19 = vmul.f32 1.0614054, %v7012_v35  ;;  %v3149_v16 = vadd.f32 1.0, %v3117_v59  ;;  %v3533_v62 = vmul.f32 %v3501_v23, %v3085_v53  ;;  %v3432_v54 = vadd.f32 0.2548296, %v3400_v34 }
 0x324   : > { %v3463_v40 = vmul.f32 %v6948_v45, %v3431_v39  ;;  %v3241_v46 = vadd.f32 -1.4531521, %v3209_v61  ;;  %v3150_v21 = vadd.f32 1.0, %v3118_v27  ;;  %v7019_v15 = vpop.eup %4598  ;;  %v3573_v52 = vmul.f32 1.442695, %v3532_v37 }
 0x325   : > { %v3242_v47 = vadd.f32 -1.4531521, %v3210_v19  ;;  %4608 = vrcp.f32 %v3149_v16  ;;  %v3534_v10 = vmul.f32 %v3502_v51, %v3086_v42  ;;  %v7022_v30 = vpop.eup %4600  ;;  %v3464_v58 = vmul.f32 %v6958_v36, %v3432_v54 }
 0x326   : > { %v3623_v59 = vmul.f32 %v4591_v1, %v3463_v40  ;;  %v3273_v53 = vmul.f32 %v7006_v9, %v3241_v46  ;;  %v3211_v23 = vmul.f32 1.0614054, %v7019_v15  ;;  %v3212_v34 = vmul.f32 1.0614054, %v7022_v30  ;;  %v4603_v61 = vpop.eup %4602 }
 0x327   : > { %v3274_v45 = vmul.f32 %v7012_v35, %v3242_v47  ;;  %4610 = vrcp.f32 %v3150_v21  ;;  %v3575_v39 = vmul.f32 1.442695, %v3533_v62  ;;  %v3624_v27 = vmul.f32 %v4593_v31, %v3464_v58 }
 0x328   : > { %v3655_v37 = vsub.f32 1.0, %v3623_v59  ;;  %v3305_v19 = vadd.f32 1.4214138, %v3273_v53  ;;  %v3243_v42 = vadd.f32 -1.4531521, %v3211_v23  ;;  %v4605_v16 = vpop.eup %4604  ;;  %v7031_v1 = vadd.f32 %v6707_v6, %v6822_v56 }
 0x329   : > { %v3306_v51 = vadd.f32 1.4214138, %v3274_v45  ;;  %v3244_v24 = vadd.f32 -1.4531521, %v3212_v34  ;;  %v3577_v36 = vmul.f32 1.442695, %v3534_v10  ;;  %4612 = vpow2.f32 %v3573_v52 }
 0x32a   : > { %v3656_v54 = vsub.f32 1.0, %v3624_v27  ;;  %v3719_v40 = vsub.f32 0.0, %v3655_v37  ;;  %v3337_v46 = vmul.f32 %v7006_v9, %v3305_v19  ;;  %v3275_v21 = vmul.f32 %v7019_v15, %v3243_v42  ;;  %v7035_v62 = vpop.eup %4606 }
 0x32b   : > { %v3338_v58 = vmul.f32 %v7012_v35, %v3306_v51  ;;  %v3276_v31 = vmul.f32 %v7022_v30, %v3244_v24  ;;  %v7040_v47 = vmul.f32 0.70710677, %v7010_v7  ;;  %4614 = vpow2.f32 %v3575_v39 }
 0x32c   : > { %v3720_v10 = vsub.f32 0.0, %v3656_v54  ;;  %v3751_v6 = vsel %vm3687_vm15, %v3655_v37, %v3719_v40  ;;  %v3369_v56 = vadd.f32 -0.28449672, %v3337_v46  ;;  %v3307_v59 = vadd.f32 1.4214138, %v3275_v21 }
 0x32d   : > { %v3783_v53 = vadd.f32 1.0, %v3751_v6  ;;  %v3370_v23 = vadd.f32 -0.28449672, %v3338_v58  ;;  %v3308_v45 = vadd.f32 1.4214138, %v3276_v31  ;;  %4616 = vpow2.f32 %v3577_v36 }
 0x32e   : > { %v3752_v34 = vsel %vm3688_vm0, %v3656_v54, %v3720_v10  ;;  %v3401_v27 = vmul.f32 %v7006_v9, %v3369_v56  ;;  %v3339_v24 = vmul.f32 %v7019_v15, %v3307_v59  ;;  %v7053_v42 = vmul.f32 0.70710677, %v7031_v1 }
 0x32f   : > { %v7048_v52 = vpop.eup %4608  ;;  %v3784_v19 = vadd.f32 1.0, %v3752_v34  ;;  %v3402_v5 = vmul.f32 %v7012_v35, %v3370_v23  ;;  %v3340_v37 = vmul.f32 %v7022_v30, %v3308_v45  ;;  %v3815_v39 = vmul.f32 %v3783_v53, %v6910_v22 }
 0x330   : > { %v3433_v51 = vadd.f32 0.2548296, %v3401_v27  ;;  %v3371_v41 = vadd.f32 -0.28449672, %v3339_v24  ;;  %v3213_v54 = vmul.f32 1.0614054, %v7048_v52 }
 0x331   : > { %v7057_v40 = vpop.eup %4610  ;;  %v3816_v36 = vmul.f32 %v3784_v19, %v6938_v12  ;;  %v3434_v46 = vadd.f32 0.2548296, %v3402_v5  ;;  %v3372_v21 = vadd.f32 -0.28449672, %v3340_v37  ;;  %v3087_v58 = vand.u32 2147483647, %v7040_v47 }
 0x332   : > { %v3465_v31 = vmul.f32 %v7006_v9, %v3433_v51  ;;  %vm3690_vm2 = vcmp.ge.f32.partialorder %v6935_v48, 0.0  ;;  %v3403_v22 = vmul.f32 %v7019_v15, %v3371_v41  ;;  %v3214_v10 = vmul.f32 1.0614054, %v7057_v40 }
 0x333   : > { %v3245_v6 = vadd.f32 -1.4531521, %v3213_v54  ;;  %v3845_v56 = vpack.c.bf16 %v3816_v36, %v3815_v39  ;;  %v3466_v59 = vmul.f32 %v7012_v35, %v3434_v46  ;;  %v3404_v12 = vmul.f32 %v7022_v30, %v3372_v21  ;;  %v4613_v9 = vpop.eup %4612 }
 0x334   : > { %v3088_v53 = vand.u32 2147483647, %v7053_v42  ;;  %v3625_v23 = vmul.f32 %v4603_v61, %v3465_v31  ;;  %v3435_v45 = vadd.f32 0.2548296, %v3403_v22  ;;  %v3246_v34 = vadd.f32 -1.4531521, %v3214_v10 }
 0x335   : > { %v3277_v27 = vmul.f32 %v7048_v52, %v3245_v6  ;;  %4401 = vmatprep.mubr.msk.bf16.mxu1 %vm731_vm14, %v3845_v56  ;;  %v3626_v24 = vmul.f32 %v4605_v16, %v3466_v59  ;;  %v3436_v19 = vadd.f32 0.2548296, %v3404_v12  ;;  %vm3691_vm3 = vcmp.ge.f32.partialorder %v6946_v8, 0.0  ;;  %v4615_v61 = vpop.eup %4614 }
 0x336   : > { %v3119_v5 = vmul.f32 0.3275911, %v3087_v58  ;;  %v3120_v37 = vmul.f32 0.3275911, %v3088_v53  ;;  %v3657_v39 = vsub.f32 1.0, %v3625_v23  ;;  %v3467_v35 = vmul.f32 %v7019_v15, %v3435_v45 }
 0x337   : > { %v3278_v51 = vmul.f32 %v7057_v40, %v3246_v34  ;;  %v3309_v41 = vadd.f32 1.4214138, %v3277_v27  ;;  %v3658_v54 = vsub.f32 1.0, %v3626_v24  ;;  %v3468_v36 = vmul.f32 %v7022_v30, %v3436_v19  ;;  %v4617_v31 = vpop.eup %4616 }
 0x338   : > { %v3151_v46 = vadd.f32 1.0, %v3119_v5  ;;  %v3152_v21 = vadd.f32 1.0, %v3120_v37  ;;  %v3721_v22 = vsub.f32 0.0, %v3657_v39  ;;  %v3627_v16 = vmul.f32 %v7035_v62, %v3467_v35 }
 0x339   : > { %v3310_v10 = vadd.f32 1.4214138, %v3278_v51  ;;  %v3341_v6 = vmul.f32 %v7048_v52, %v3309_v41  ;;  %v3722_v56 = vsub.f32 0.0, %v3658_v54  ;;  %v3628_v59 = vmul.f32 %v4613_v9, %v3468_v36 }
 0x33a   : > { %4618 = vrcp.f32 %v3151_v46  ;;  %v3503_v15 = vsub.f32 0.0, %v3087_v58  ;;  %v3753_v12 = vsel %vm3689_vm1, %v3657_v39, %v3721_v22  ;;  %v3659_v23 = vsub.f32 1.0, %v3627_v16 }
 0x33b   : > { %v3342_v45 = vmul.f32 %v7057_v40, %v3310_v10  ;;  %v3373_v30 = vadd.f32 -0.28449672, %v3341_v6  ;;  %v3754_v34 = vsel %vm3690_vm2, %v3658_v54, %v3722_v56  ;;  %v3785_v27 = vadd.f32 1.0, %v3753_v12 }
 0x33c   : > { %v3660_v24 = vsub.f32 1.0, %v3628_v59  ;;  %4620 = vrcp.f32 %v3152_v21  ;;  %v3786_v62 = vadd.f32 1.0, %v3754_v34  ;;  %v3723_v19 = vsub.f32 0.0, %v3659_v23  ;;  %v7092_v21 = vld [vmem:[%s7680_s6] ss:$0 sm:$0xff] }
 0x33d   : > { %v3374_v5 = vadd.f32 -0.28449672, %v3342_v45  ;;  %v3405_v9 = vmul.f32 %v7048_v52, %v3373_v30  ;;  %v3817_v37 = vmul.f32 %v3785_v27, %v6985_v17  ;;  %vm3692_vm4 = vcmp.ge.f32.partialorder %v6953_v20, 0.0 }
 0x33e   : > { %v3724_v14 = vsub.f32 0.0, %v3660_v24  ;;  %v3504_v39 = vsub.f32 0.0, %v3088_v53  ;;  %v3818_v35 = vmul.f32 %v3786_v62, %v6988_v44  ;;  %v3755_v48 = vsel %vm3691_vm3, %v3659_v23, %v3723_v19 }
 0x33f   : > { %v3406_v51 = vmul.f32 %v7057_v40, %v3374_v5  ;;  %v3437_v41 = vadd.f32 0.2548296, %v3405_v9  ;;  %v3787_v36 = vadd.f32 1.0, %v3755_v48  ;;  %v3535_v46 = vmul.f32 %v3503_v15, %v3087_v58 }
 0x340   : > { %v3756_v54 = vsel %vm3692_vm4, %v3660_v24, %v3724_v14  ;;  %v7096_v20 = vadd.f32 %v7092_v21, %v6827_v57  ;;  %v3846_v17 = vpack.c.bf16 %v3818_v35, %v3817_v37  ;;  %v3021_v10 = vmul.f32 0.5, %v6971_v2 }
 0x341   : > { %v3788_v44 = vadd.f32 1.0, %v3756_v54  ;;  %v3438_v22 = vadd.f32 0.2548296, %v3406_v51  ;;  %v3469_v8 = vmul.f32 %v7048_v52, %v3437_v41  ;;  %v3819_v16 = vmul.f32 %v3787_v36, %v6998_v43 }
 0x342   : > { %v3022_v58 = vmul.f32 0.5, %v6978_v3  ;;  %v3536_v6 = vmul.f32 %v3504_v39, %v3088_v53  ;;  %4402 = vmatmul.mubr.msk.bf16.gmra.mrb[4].mxu1 %vm731_vm14, %v3846_v17  ;;  %v7107_v15 = vadd.f32 %v7092_v21, %v6832_v4  ;;  %vm3693_vm5 = vcmp.ge.f32.partialorder %v6991_v32, 0.0 }
 0x343   : > { %v3820_v56 = vmul.f32 %v3788_v44, %v7001_v0  ;;  %v3470_v59 = vmul.f32 %v7057_v40, %v3438_v22  ;;  %v3629_v57 = vmul.f32 %v4615_v61, %v3469_v8  ;;  %vm3694_vm6 = vcmp.ge.f32.partialorder %v6995_v28, 0.0 }
 0x344   : > { %v7109_v12 = vpop.eup %4618  ;;  %v3579_v2 = vmul.f32 1.442695, %v3535_v46  ;;  %v7114_v3 = vmul.f32 0.70710677, %v7096_v20  ;;  %v2927_v4 = vmul.f32 %v6929_v50, %v6667_v13  ;;  %v3581_v61 = vmul.f32 1.442695, %v3536_v6 }
 0x345   : > { %v3847_v43 = vpack.c.bf16 %v3820_v56, %v3819_v16  ;;  %v3630_v52 = vmul.f32 %v4617_v31, %v3470_v59  ;;  %v3661_v0 = vsub.f32 1.0, %v3629_v57  ;;  %v3215_v40 = vmul.f32 1.0614054, %v7109_v12  ;;  %v7924_v6 = vld [vmem:[#allocation12_spill] sm:$0xff] }
 0x346   : > { %v7117_v53 = vpop.eup %4620  ;;  %v7122_v23 = vmul.f32 0.70710677, %v7107_v15  ;;  %v3089_v45 = vand.u32 2147483647, %v7114_v3  ;;  %4622 = vpow2.f32 %v3579_v2  ;;  %v7136_v32 = vadd.f32 %v7092_v21, %v6846_v33 }
 0x347   : > { %4405 = vmatprep.mubr.msk.bf16.mxu1 %vm731_vm14, %v3847_v43  ;;  %v3662_v30 = vsub.f32 1.0, %v3630_v52  ;;  %v3725_v34 = vsub.f32 0.0, %v3661_v0  ;;  %v3216_v31 = vmul.f32 1.0614054, %v7117_v53  ;;  %v3247_v27 = vadd.f32 -1.4531521, %v3215_v40 }
 0x348   : > { %v3090_v24 = vand.u32 2147483647, %v7122_v23  ;;  %v3121_v62 = vmul.f32 0.3275911, %v3089_v45  ;;  %v3505_v19 = vsub.f32 0.0, %v3089_v45  ;;  %4624 = vpow2.f32 %v3581_v61 }
 0x349   : > { %v3726_v5 = vsub.f32 0.0, %v3662_v30  ;;  %v3757_v13 = vsel %vm3693_vm5, %v3661_v0, %v3725_v34  ;;  %v3248_v50 = vadd.f32 -1.4531521, %v3216_v31  ;;  %v3279_v9 = vmul.f32 %v7109_v12, %v3247_v27 }
 0x34a   : > { %v3789_v37 = vadd.f32 1.0, %v3757_v13  ;;  %v3122_v14 = vmul.f32 0.3275911, %v3090_v24  ;;  %v3153_v39 = vadd.f32 1.0, %v3121_v62  ;;  %v3506_v35 = vsub.f32 0.0, %v3090_v24 }
 0x34b   : > { %v3758_v48 = vsel %vm3694_vm6, %v3662_v30, %v3726_v5  ;;  %v3280_v51 = vmul.f32 %v7117_v53, %v3248_v50  ;;  %v3311_v41 = vadd.f32 1.4214138, %v3279_v9  ;;  %v3537_v22 = vmul.f32 %v3505_v19, %v3089_v45 }
 0x34c   : > { %v3790_v54 = vadd.f32 1.0, %v3758_v48  ;;  %v3154_v36 = vadd.f32 1.0, %v3122_v14  ;;  %4626 = vrcp.f32 %v3153_v39  ;;  %v3821_v46 = vmul.f32 %v3789_v37, %v3021_v10 }
 0x34d   : > { %v3312_v17 = vadd.f32 1.4214138, %v3280_v51  ;;  %v3343_v44 = vmul.f32 %v7109_v12, %v3311_v41  ;;  %v3538_v28 = vmul.f32 %v3506_v35, %v3090_v24  ;;  %v7141_v16 = vadd.f32 %v7092_v21, %v6849_v60 }
 0x34e   : > { %v3822_v8 = vmul.f32 %v3790_v54, %v3022_v58  ;;  %4628 = vrcp.f32 %v3154_v36  ;;  %v7145_v56 = vmul.f32 %v6955_v26, %v7924_v6  ;;  %v7150_v57 = vmul.f32 0.5, %v7010_v7  ;;  %v7166_v7 = vld [vmem:[%s7679_s5] ss:$0 sm:$0xff] }
 0x34f   : > { %4630 = vrsqrt.f32 %v6942_v29  ;;  %v3344_v33 = vmul.f32 %v7117_v53, %v3312_v17  ;;  %v3375_v10 = vadd.f32 -0.28449672, %v3343_v44  ;;  %v7153_v58 = vmul.f32 0.70710677, %v7136_v32 }
 0x350   : > { %v3848_v59 = vpack.c.bf16 %v3822_v8, %v3821_v46  ;;  %v7156_v2 = vmul.f32 0.70710677, %v7141_v16  ;;  %v3583_v26 = vmul.f32 1.442695, %v3537_v22  ;;  %v7161_v29 = vadd.f32 %v7092_v21, %v6852_v63  ;;  %v4623_v52 = vpop.eup %4622 }
 0x351   : > { %v3376_v60 = vadd.f32 -0.28449672, %v3344_v33  ;;  %v3407_v43 = vmul.f32 %v7109_v12, %v3375_v10  ;;  %v7169_v0 = vmul.f32 %v7166_v7, %v2927_v4  ;;  %v3585_v40 = vmul.f32 1.442695, %v3538_v28 }
 0x352   : > { %4406 = vmatmul.mubr.msk.bf16.gmra.mrb[8].mxu1 %vm731_vm14, %v3848_v59  ;;  %v3091_v61 = vand.u32 2147483647, %v7153_v58  ;;  %v3092_v45 = vand.u32 2147483647, %v7156_v2  ;;  %v7175_v30 = vmul.f32 0.5, %v7031_v1  ;;  %v7180_v31 = vadd.f32 %v7092_v21, %v6859_v55  ;;  %v4625_v62 = vpop.eup %4624 }
 0x353   : > { %v3408_v63 = vmul.f32 %v7117_v53, %v3376_v60  ;;  %v3439_v34 = vadd.f32 0.2548296, %v3407_v43  ;;  %vm3695_vm7 = vcmp.ge.f32.partialorder %v7040_v47, 0.0  ;;  %4632 = vpow2.f32 %v3583_v26 }
 0x354   : > { %v3123_v4 = vmul.f32 0.3275911, %v3091_v61  ;;  %v3124_v27 = vmul.f32 0.3275911, %v3092_v45  ;;  %v3507_v24 = vsub.f32 0.0, %v3091_v61  ;;  %vm3696_vm10 = vcmp.ge.f32.partialorder %v7053_v42, 0.0 }
 0x355   : > { %v3440_v19 = vadd.f32 0.2548296, %v3408_v63  ;;  %v3471_v5 = vmul.f32 %v7109_v12, %v3439_v34  ;;  %v7185_v1 = vmul.f32 0.70710677, %v7161_v29  ;;  %4634 = vpow2.f32 %v3585_v40 }
 0x356   : > { %v7187_v13 = vpop.eup %4626  ;;  %v3155_v55 = vadd.f32 1.0, %v3123_v4  ;;  %v3156_v50 = vadd.f32 1.0, %v3124_v27  ;;  %v7193_v39 = vmul.f32 0.70710677, %v7180_v31  ;;  %v3508_v35 = vsub.f32 0.0, %v3092_v45 }
 0x357   : > { %v3472_v9 = vmul.f32 %v7117_v53, %v3440_v19  ;;  %v3631_v37 = vmul.f32 %v4623_v52, %v3471_v5  ;;  %v3217_v14 = vmul.f32 1.0614054, %v7187_v13  ;;  %v3539_v48 = vmul.f32 %v3507_v24, %v3091_v61 }
 0x358   : > { %v7195_v12 = vpop.eup %4628  ;;  %4636 = vrcp.f32 %v3155_v55  ;;  %v3093_v51 = vand.u32 2147483647, %v7185_v1  ;;  %v3094_v17 = vand.u32 2147483647, %v7193_v39  ;;  %v3540_v10 = vmul.f32 %v3508_v35, %v3092_v45 }
 0x359   : > { %v7198_v41 = vpop.eup %4630  ;;  %v3632_v54 = vmul.f32 %v4625_v62, %v3472_v9  ;;  %v3663_v36 = vsub.f32 1.0, %v3631_v37  ;;  %v3218_v46 = vmul.f32 1.0614054, %v7195_v12  ;;  %v3249_v53 = vadd.f32 -1.4531521, %v3217_v14 }
 0x35a   : > { %4638 = vrcp.f32 %v3156_v50  ;;  %v3125_v44 = vmul.f32 0.3275911, %v3093_v51  ;;  %v3509_v22 = vsub.f32 0.0, %v3093_v51  ;;  %v3126_v59 = vmul.f32 0.3275911, %v3094_v17 }
 0x35b   : > { %v3664_v8 = vsub.f32 1.0, %v3632_v54  ;;  %v3727_v28 = vsub.f32 0.0, %v3663_v36  ;;  %v3250_v6 = vadd.f32 -1.4531521, %v3218_v46  ;;  %v3281_v33 = vmul.f32 %v7187_v13, %v3249_v53 }
 0x35c   : > { %v3157_v60 = vadd.f32 1.0, %v3125_v44  ;;  %v3510_v43 = vsub.f32 0.0, %v3094_v17  ;;  %v3587_v34 = vmul.f32 1.442695, %v3539_v48  ;;  %v3158_v4 = vadd.f32 1.0, %v3126_v59 }
 0x35d   : > { %v3728_v26 = vsub.f32 0.0, %v3664_v8  ;;  %v3759_v52 = vsel %vm3695_vm7, %v3663_v36, %v3727_v28  ;;  %v3282_v40 = vmul.f32 %v7195_v12, %v3250_v6  ;;  %v3313_v61 = vadd.f32 1.4214138, %v3281_v33  ;;  %v4633_v24 = vpop.eup %4632 }
 0x35e   : > { %v3791_v63 = vadd.f32 1.0, %v3759_v52  ;;  %v3541_v27 = vmul.f32 %v3509_v22, %v3093_v51  ;;  %4640 = vrcp.f32 %v3157_v60  ;;  %v3589_v50 = vmul.f32 1.442695, %v3540_v10 }
 0x35f   : > { %v3760_v62 = vsel %vm3696_vm10, %v3664_v8, %v3728_v26  ;;  %v3314_v19 = vadd.f32 1.4214138, %v3282_v40  ;;  %v3345_v45 = vmul.f32 %v7187_v13, %v3313_v61  ;;  %v4635_v5 = vpop.eup %4634  ;;  %4642 = vrcp.f32 %v3158_v4 }
 0x360   : > { %v3792_v55 = vadd.f32 1.0, %v3760_v62  ;;  %v3542_v47 = vmul.f32 %v3510_v43, %v3094_v17  ;;  %v7210_v9 = vmul.f32 0.5, %v7096_v20  ;;  %v7213_v37 = vmul.f32 0.5, %v7107_v15 }
 0x361   : > { %v3346_v14 = vmul.f32 %v7195_v12, %v3314_v19  ;;  %v3377_v35 = vadd.f32 -0.28449672, %v3345_v45  ;;  %v3823_v48 = vmul.f32 %v3791_v63, %v7150_v57  ;;  %v3591_v54 = vmul.f32 1.442695, %v3541_v27 }
 0x362   : > { %v7216_v42 = vpop.eup %4636  ;;  %v3824_v51 = vmul.f32 %v3792_v55, %v7175_v30  ;;  %v7222_v36 = vadd.f32 %v7092_v21, %v6892_v25  ;;  %4644 = vpow2.f32 %v3587_v34  ;;  %v3593_v44 = vmul.f32 1.442695, %v3542_v47 }
 0x363   : > { %v3378_v46 = vadd.f32 -0.28449672, %v3346_v14  ;;  %v3409_v20 = vmul.f32 %v7187_v13, %v3377_v35  ;;  %v3219_v15 = vmul.f32 1.0614054, %v7216_v42  ;;  %4646 = vpow2.f32 %v3589_v50 }
 0x364   : > { %v7226_v53 = vpop.eup %4638  ;;  %v3849_v17 = vpack.c.bf16 %v3824_v51, %v3823_v48  ;;  %v7230_v57 = vadd.f32 %v7092_v21, %v6875_v38  ;;  %vm3697_vm8 = vcmp.ge.f32.partialorder %v7114_v3, 0.0  ;;  %4648 = vpow2.f32 %v3591_v54 }
 0x365   : > { %v3410_v30 = vmul.f32 %v7195_v12, %v3378_v46  ;;  %v3441_v22 = vadd.f32 0.2548296, %v3409_v20  ;;  %v3220_v25 = vmul.f32 1.0614054, %v7226_v53  ;;  %v3251_v8 = vadd.f32 -1.4531521, %v3219_v15 }
 0x366   : > { %4409 = vmatprep.mubr.msk.bf16.mxu1 %vm731_vm14, %v3849_v17  ;;  %v7237_v28 = vmul.f32 0.70710677, %v7222_v36  ;;  %v7240_v6 = vmul.f32 0.70710677, %v7230_v57  ;;  %vm3698_vm9 = vcmp.ge.f32.partialorder %v7122_v23, 0.0  ;;  %v7246_v60 = vmul.f32 0.5, %v7136_v32 }
 0x367   : > { %v3442_v33 = vadd.f32 0.2548296, %v3410_v30  ;;  %v3473_v38 = vmul.f32 %v7187_v13, %v3441_v22  ;;  %v3252_v10 = vadd.f32 -1.4531521, %v3220_v25  ;;  %v3283_v59 = vmul.f32 %v7216_v42, %v3251_v8 }
 0x368   : > { %4650 = vpow2.f32 %v3593_v44  ;;  %v3095_v43 = vand.u32 2147483647, %v7237_v28  ;;  %v3096_v26 = vand.u32 2147483647, %v7240_v6  ;;  %v7250_v52 = vpop.eup %4640  ;;  %v7259_v62 = vadd.f32 %v7092_v21, %v6898_v18 }
 0x369   : > { %v3474_v40 = vmul.f32 %v7195_v12, %v3442_v33  ;;  %v3633_v61 = vmul.f32 %v4633_v24, %v3473_v38  ;;  %v3284_v13 = vmul.f32 %v7226_v53, %v3252_v10  ;;  %v3315_v63 = vadd.f32 1.4214138, %v3283_v59  ;;  %v7254_v34 = vpop.eup %4642 }
 0x36a   : > { %v3221_v4 = vmul.f32 1.0614054, %v7250_v52  ;;  %v3127_v27 = vmul.f32 0.3275911, %v3095_v43  ;;  %v3128_v32 = vmul.f32 0.3275911, %v3096_v26 }
 0x36b   : > { %v3634_v19 = vmul.f32 %v4635_v5, %v3474_v40  ;;  %v3665_v45 = vsub.f32 1.0, %v3633_v61  ;;  %v3316_v55 = vadd.f32 1.4214138, %v3284_v13  ;;  %v3347_v50 = vmul.f32 %v7216_v42, %v3315_v63 }
 0x36c   : > { %v3222_v12 = vmul.f32 1.0614054, %v7254_v34  ;;  %v3253_v24 = vadd.f32 -1.4531521, %v3221_v4  ;;  %v3159_v47 = vadd.f32 1.0, %v3127_v27  ;;  %v3160_v14 = vadd.f32 1.0, %v3128_v32  ;;  %v4645_v35 = vpop.eup %4644 }
 0x36d   : > { %v3666_v48 = vsub.f32 1.0, %v3634_v19  ;;  %v3729_v51 = vsub.f32 0.0, %v3665_v45  ;;  %v3348_v54 = vmul.f32 %v7226_v53, %v3316_v55  ;;  %v3379_v46 = vadd.f32 -0.28449672, %v3347_v50  ;;  %v4647_v20 = vpop.eup %4646 }
 0x36e   : > { %v3254_v15 = vadd.f32 -1.4531521, %v3222_v12  ;;  %v3285_v18 = vmul.f32 %v7250_v52, %v3253_v24  ;;  %4652 = vrcp.f32 %v3159_v47  ;;  %v3511_v5 = vsub.f32 0.0, %v3095_v43  ;;  %v4649_v25 = vpop.eup %4648 }
 0x36f   : > { %v3730_v17 = vsub.f32 0.0, %v3666_v48  ;;  %v3761_v44 = vsel %vm3697_vm8, %v3665_v45, %v3729_v51  ;;  %v3380_v30 = vadd.f32 -0.28449672, %v3348_v54  ;;  %v3411_v22 = vmul.f32 %v7216_v42, %v3379_v46 }
 0x370   : > { %v3793_v8 = vadd.f32 1.0, %v3761_v44  ;;  %v3286_v33 = vmul.f32 %v7254_v34, %v3254_v15  ;;  %v3317_v38 = vadd.f32 1.4214138, %v3285_v18  ;;  %4654 = vrcp.f32 %v3160_v14 }
 0x371   : > { %v3762_v10 = vsel %vm3698_vm9, %v3666_v48, %v3730_v17  ;;  %v3412_v59 = vmul.f32 %v7226_v53, %v3380_v30  ;;  %v3443_v40 = vadd.f32 0.2548296, %v3411_v22  ;;  %v3512_v61 = vsub.f32 0.0, %v3096_v26 }
 0x372   : > { %v4651_v13 = vpop.eup %4650  ;;  %v3794_v63 = vadd.f32 1.0, %v3762_v10  ;;  %v3318_v3 = vadd.f32 1.4214138, %v3286_v33  ;;  %v3349_v4 = vmul.f32 %v7250_v52, %v3317_v38  ;;  %v7275_v27 = vadd.f32 %v7092_v21, %v6895_v49 }
 0x373   : > { %v3825_v32 = vmul.f32 %v3793_v8, %v7210_v9  ;;  %v3444_v19 = vadd.f32 0.2548296, %v3412_v59  ;;  %v3475_v45 = vmul.f32 %v7216_v42, %v3443_v40  ;;  %v3543_v23 = vmul.f32 %v3511_v5, %v3095_v43 }
 0x374   : > { %v3826_v55 = vmul.f32 %v3794_v63, %v7213_v37  ;;  %v3350_v50 = vmul.f32 %v7254_v34, %v3318_v3  ;;  %v3381_v12 = vadd.f32 -0.28449672, %v3349_v4  ;;  %v3544_v24 = vmul.f32 %v3512_v61, %v3096_v26 }
 0x375   : > { %v3028_v47 = vmul.f32 0.5, %v7141_v16  ;;  %v3476_v14 = vmul.f32 %v7226_v53, %v3444_v19  ;;  %v3635_v48 = vmul.f32 %v4645_v35, %v3475_v45  ;;  %vm3699_vm11 = vcmp.ge.f32.partialorder %v7153_v58, 0.0 }
 0x376   : > { %v3850_v49 = vpack.c.bf16 %v3826_v55, %v3825_v32  ;;  %v3382_v51 = vadd.f32 -0.28449672, %v3350_v50  ;;  %v3413_v9 = vmul.f32 %v7250_v52, %v3381_v12  ;;  %v3595_v54 = vmul.f32 1.442695, %v3543_v23 }
 0x377   : > { %v3636_v42 = vmul.f32 %v4647_v20, %v3476_v14  ;;  %v3667_v43 = vsub.f32 1.0, %v3635_v48  ;;  %vm3700_vm12 = vcmp.ge.f32.partialorder %v7156_v2, 0.0  ;;  %v7287_v37 = vmul.f32 0.70710677, %v7259_v62 }
 0x378   : > { %v7289_v26 = vpop.eup %4652  ;;  %4410 = vmatmul.mubr.msk.bf16.gmra.mrb[12].mxu1 %vm731_vm14, %v3850_v49  ;;  %v3414_v16 = vmul.f32 %v7254_v34, %v3382_v51  ;;  %v3445_v53 = vadd.f32 0.2548296, %v3413_v9  ;;  %v3597_v35 = vmul.f32 1.442695, %v3544_v24  ;;  %v7294_v46 = vmul.f32 0.70710677, %v7275_v27 }
 0x379   : > { %v3668_v15 = vsub.f32 1.0, %v3636_v42  ;;  %v3731_v18 = vsub.f32 0.0, %v3667_v43  ;;  %v3223_v20 = vmul.f32 1.0614054, %v7289_v26  ;;  %v7298_v5 = vand.u32 2147483647, %v7287_v37 }
 0x37a   : > { %v7300_v17 = vpop.eup %4654  ;;  %v3446_v44 = vadd.f32 0.2548296, %v3414_v16  ;;  %v3477_v30 = vmul.f32 %v7250_v52, %v3445_v53  ;;  %4656 = vpow2.f32 %v3595_v54  ;;  %v7304_v22 = vand.u32 2147483647, %v7294_v46  ;;  %v7926_v53 = vld [vmem:[#allocation16_spill] sm:$0xff] }
 0x37b   : > { %v3732_v8 = vsub.f32 0.0, %v3668_v15  ;;  %v3763_v33 = vsel %vm3699_vm11, %v3667_v43, %v3731_v18  ;;  %v3224_v38 = vmul.f32 1.0614054, %v7300_v17  ;;  %v3255_v10 = vadd.f32 -1.4531521, %v3223_v20 }
 0x37c   : > { %v3795_v59 = vadd.f32 1.0, %v3763_v33  ;;  %v3478_v40 = vmul.f32 %v7254_v34, %v3446_v44  ;;  %v3637_v61 = vmul.f32 %v4649_v25, %v3477_v30  ;;  %v3129_v63 = vmul.f32 0.3275911, %v7298_v5 }
 0x37d   : > { %v3764_v52 = vsel %vm3700_vm12, %v3668_v15, %v3732_v8  ;;  %v3256_v3 = vadd.f32 -1.4531521, %v3224_v38  ;;  %v3287_v4 = vmul.f32 %v7289_v26, %v3255_v10  ;;  %v3130_v32 = vmul.f32 0.3275911, %v7304_v22  ;;  %v7927_v8 = vld [vmem:[#allocation15_spill] sm:$0xff] }
 0x37e   : > { %v3796_v19 = vadd.f32 1.0, %v3764_v52  ;;  %v3638_v58 = vmul.f32 %v4651_v13, %v3478_v40  ;;  %v3669_v45 = vsub.f32 1.0, %v3637_v61  ;;  %4658 = vpow2.f32 %v3597_v35  ;;  %v7928_v61 = vld [vmem:[#allocation41_spill] sm:$0xff] }
 0x37f   : > { %v3288_v23 = vmul.f32 %v7300_v17, %v3256_v3  ;;  %v3319_v55 = vadd.f32 1.4214138, %v3287_v4  ;;  %v3161_v50 = vadd.f32 1.0, %v3129_v63  ;;  %v3162_v34 = vadd.f32 1.0, %v3130_v32  ;;  %v7930_v4 = vld [vmem:[#allocation40_spill] sm:$0xff] }
 0x380   : > { %v3827_v25 = vmul.f32 %v3795_v59, %v7246_v60  ;;  %v3828_v12 = vmul.f32 %v3796_v19, %v3028_v47  ;;  %v3670_v24 = vsub.f32 1.0, %v3638_v58  ;;  %v3733_v2 = vsub.f32 0.0, %v3669_v45  ;;  %v7925_v47 = vld [vmem:[#allocation14_spill] sm:$0xff] }
 0x381   : > { %vm3701_vm13 = vcmp.ge.f32.partialorder %v7185_v1, 0.0  ;;  %v3320_v14 = vadd.f32 1.4214138, %v3288_v23  ;;  %v3351_v48 = vmul.f32 %v7289_v26, %v3319_v55  ;;  %4660 = vrcp.f32 %v3161_v50 }
 0x382   : > { %v3851_v49 = vpack.c.bf16 %v3828_v12, %v3827_v25  ;;  %v3734_v13 = vsub.f32 0.0, %v3670_v24  ;;  %v3765_v51 = vsel %vm3701_vm13, %v3669_v45, %v3733_v2  ;;  %4662 = vrcp.f32 %v3162_v34 }
 0x383   : > { %vm3702_vm15 = vcmp.ge.f32.partialorder %v7193_v39, 0.0  ;;  %v3797_v9 = vadd.f32 1.0, %v3765_v51  ;;  %v3352_v54 = vmul.f32 %v7300_v17, %v3320_v14  ;;  %v3383_v42 = vadd.f32 -0.28449672, %v3351_v48 }
 0x384   : > { %v4657_v60 = vpop.eup %4656  ;;  %v2929_v43 = vmul.f32 %v6962_v11, %v7925_v47  ;;  %4413 = vmatprep.mubr.msk.bf16.mxu1 %vm731_vm14, %v3851_v49  ;;  %v3029_v1 = vmul.f32 0.5, %v7161_v29  ;;  %v3766_v16 = vsel %vm3702_vm15, %v3670_v24, %v3734_v13  ;;  %v7327_v35 = vadd.f32 %v7092_v21, %v7926_v53 }
 0x385   : > { %v3030_v15 = vmul.f32 0.5, %v7180_v31  ;;  %v3798_v39 = vadd.f32 1.0, %v3766_v16  ;;  %v3384_v18 = vadd.f32 -0.28449672, %v3352_v54  ;;  %v3415_v20 = vmul.f32 %v7289_v26, %v3383_v42 }
 0x386   : > { %v7333_v44 = vmul.f32 %v7166_v7, %v7145_v56  ;;  %v3829_v11 = vmul.f32 %v3797_v9, %v3029_v1  ;;  %v3513_v30 = vsub.f32 0.0, %v7298_v5  ;;  %v7338_v29 = vadd.f32 %v7092_v21, %v7927_v8  ;;  %v7929_v56 = vld [vmem:[#allocation17_spill] sm:$0xff]  ;;  %v7931_v1 = vld [vmem:[#allocation18_spill] sm:$0xff] }
 0x387   : > { %v3830_v33 = vmul.f32 %v3798_v39, %v3030_v15  ;;  %v3416_v38 = vmul.f32 %v7300_v17, %v3384_v18  ;;  %v3447_v10 = vadd.f32 0.2548296, %v3415_v20  ;;  %v7342_v31 = vmul.f32 0.70710677, %v7327_v35 }
 0x388   : > { %v4659_v59 = vpop.eup %4658  ;;  %v2968_v40 = vmul.f32 %v7166_v7, %v2929_v43  ;;  %v2932_v63 = vmul.f32 %v7929_v56, %v7928_v61  ;;  %v3514_v52 = vsub.f32 0.0, %v7304_v22  ;;  %v7349_v3 = vmul.f32 0.70710677, %v7338_v29 }
 0x389   : > { %v7353_v32 = vmul.f32 %v7198_v41, %v7930_v4  ;;  %v3852_v19 = vpack.c.bf16 %v3830_v33, %v3829_v11  ;;  %v3448_v58 = vadd.f32 0.2548296, %v3416_v38  ;;  %v3479_v45 = vmul.f32 %v7289_v26, %v3447_v10 }
 0x38a   : > { %v3031_v23 = vmul.f32 0.5, %v7222_v36  ;;  %v3545_v55 = vmul.f32 %v3513_v30, %v7298_v5  ;;  %v3099_v50 = vand.u32 2147483647, %v7342_v31  ;;  %v3100_v34 = vand.u32 2147483647, %v7349_v3 }
 0x38b   : > { %v7360_v25 = vpop.eup %4660  ;;  %4414 = vmatmul.mubr.msk.bf16.gmra.mrb[16].mxu1 %vm731_vm14, %v3852_v19  ;;  %v3032_v12 = vmul.f32 0.5, %v7230_v57  ;;  %v3480_v41 = vmul.f32 %v7300_v17, %v3448_v58  ;;  %v3639_v24 = vmul.f32 %v4657_v60, %v3479_v45  ;;  %vm3703_vm0 = vcmp.ge.f32.partialorder %v7237_v28, 0.0 }
 0x38c   : > { %v7366_v26 = vpop.eup %4662  ;;  %v3225_v36 = vmul.f32 1.0614054, %v7360_v25  ;;  %v3546_v5 = vmul.f32 %v3514_v52, %v7304_v22  ;;  %v3131_v2 = vmul.f32 0.3275911, %v3099_v50  ;;  %v3132_v14 = vmul.f32 0.3275911, %v3100_v34 }
 0x38d   : > { %v3640_v48 = vmul.f32 %v4659_v59, %v3480_v41  ;;  %v3671_v49 = vsub.f32 1.0, %v3639_v24  ;;  %vm3704_vm1 = vcmp.ge.f32.partialorder %v7240_v6, 0.0  ;;  %v3226_v13 = vmul.f32 1.0614054, %v7366_v26 }
 0x38e   : > { %v3257_v57 = vadd.f32 -1.4531521, %v3225_v36  ;;  %v3599_v51 = vmul.f32 1.442695, %v3545_v55  ;;  %v3163_v17 = vadd.f32 1.0, %v3131_v2  ;;  %v3164_v9 = vadd.f32 1.0, %v3132_v14 }
 0x38f   : > { %v3672_v54 = vsub.f32 1.0, %v3640_v48  ;;  %v3735_v42 = vsub.f32 0.0, %v3671_v49  ;;  %v3258_v60 = vadd.f32 -1.4531521, %v3226_v13  ;;  %v7374_v47 = vadd.f32 %v7092_v21, %v7169_v0 }
 0x390   : > { %v3289_v22 = vmul.f32 %v7360_v25, %v3257_v57  ;;  %v3601_v43 = vmul.f32 1.442695, %v3546_v5  ;;  %4664 = vrcp.f32 %v3163_v17  ;;  %v7379_v16 = vadd.f32 %v7092_v21, %v7931_v1 }
 0x391   : > { %v3736_v53 = vsub.f32 0.0, %v3672_v54  ;;  %v3767_v15 = vsel %vm3703_vm0, %v3671_v49, %v3735_v42  ;;  %v3290_v39 = vmul.f32 %v7366_v26, %v3258_v60  ;;  %4666 = vrcp.f32 %v3164_v9 }
 0x392   : > { %v3799_v18 = vadd.f32 1.0, %v3767_v15  ;;  %v7385_v20 = vmul.f32 0.5, %v7259_v62  ;;  %v3321_v0 = vadd.f32 1.4214138, %v3289_v22  ;;  %v3515_v11 = vsub.f32 0.0, %v3099_v50 }
 0x393   : > { %v3768_v30 = vsel %vm3704_vm1, %v3672_v54, %v3736_v53  ;;  %v3322_v8 = vadd.f32 1.4214138, %v3290_v39  ;;  %4668 = vpow2.f32 %v3599_v51  ;;  %v7390_v33 = vmul.f32 0.70710677, %v7374_v47 }
 0x394   : > { %v3800_v38 = vadd.f32 1.0, %v3768_v30  ;;  %v3353_v28 = vmul.f32 %v7360_v25, %v3321_v0  ;;  %4670 = vpow2.f32 %v3601_v43  ;;  %v3516_v10 = vsub.f32 0.0, %v3100_v34 }
 0x395   : > { %v3354_v59 = vmul.f32 %v7366_v26, %v3322_v8  ;;  %v7395_v62 = vmul.f32 0.70710677, %v7379_v16  ;;  %v7398_v61 = vand.u32 2147483647, %v7390_v33  ;;  %v7401_v6 = vadd.f32 %v7092_v21, %v2968_v40 }
 0x396   : > { %v3831_v56 = vmul.f32 %v3799_v18, %v3031_v23  ;;  %v3832_v52 = vmul.f32 %v3800_v38, %v3032_v12  ;;  %v3385_v4 = vadd.f32 -0.28449672, %v3353_v28  ;;  %v3547_v19 = vmul.f32 %v3515_v11, %v3099_v50 }
 0x397   : > { %v7404_v58 = vmul.f32 %v7166_v7, %v2932_v63  ;;  %v3386_v45 = vadd.f32 -0.28449672, %v3354_v59  ;;  %v7407_v55 = vand.u32 2147483647, %v7395_v62  ;;  %v3133_v41 = vmul.f32 0.3275911, %v7398_v61 }
 0x398   : > { %v3853_v24 = vpack.c.bf16 %v3832_v52, %v3831_v56  ;;  %v7411_v36 = vmul.f32 0.5, %v7275_v27  ;;  %v3417_v40 = vmul.f32 %v7360_v25, %v3385_v4  ;;  %v3548_v5 = vmul.f32 %v3516_v10, %v3100_v34 }
 0x399   : > { %v3418_v23 = vmul.f32 %v7366_v26, %v3386_v45  ;;  %v3134_v50 = vmul.f32 0.3275911, %v7407_v55  ;;  %v3165_v12 = vadd.f32 1.0, %v3133_v41  ;;  %v7418_v63 = vadd.f32 %v7092_v21, %v7333_v44 }
 0x39a   : > { %v7420_v2 = vpop.eup %4664  ;;  %v2970_v14 = vmul.f32 %v7166_v7, %v7353_v32  ;;  %4417 = vmatprep.mubr.msk.bf16.mxu1 %vm731_vm14, %v3853_v24  ;;  %v3449_v27 = vadd.f32 0.2548296, %v3417_v40  ;;  %v3603_v48 = vmul.f32 1.442695, %v3547_v19  ;;  %v7426_v34 = vmul.f32 0.70710677, %v7401_v6 }
 0x39b   : > { %v7428_v49 = vpop.eup %4666  ;;  %v3450_v13 = vadd.f32 0.2548296, %v3418_v23  ;;  %vm3705_vm2 = vcmp.ge.f32.partialorder %v7287_v37, 0.0  ;;  %v3227_v44 = vmul.f32 1.0614054, %v7420_v2  ;;  %v3166_v57 = vadd.f32 1.0, %v3134_v50 }
 0x39c   : > { %4672 = vrcp.f32 %v3165_v12  ;;  %v3481_v51 = vmul.f32 %v7360_v25, %v3449_v27  ;;  %vm3706_vm3 = vcmp.ge.f32.partialorder %v7294_v46, 0.0  ;;  %v7435_v7 = vmul.f32 0.5, %v7327_v35 }
 0x39d   : > { %v3228_v32 = vmul.f32 1.0614054, %v7428_v49  ;;  %v3605_v17 = vmul.f32 1.442695, %v3548_v5  ;;  %v4669_v9 = vpop.eup %4668  ;;  %v3482_v54 = vmul.f32 %v7366_v26, %v3450_v13  ;;  %v3259_v42 = vadd.f32 -1.4531521, %v3227_v44 }
 0x39e   : > { %4674 = vrcp.f32 %v3166_v57  ;;  %v7440_v60 = vmul.f32 0.70710677, %v7418_v63  ;;  %v4671_v22 = vpop.eup %4670  ;;  %v3641_v43 = vmul.f32 %v4669_v9, %v3481_v51  ;;  %v3517_v25 = vsub.f32 0.0, %v7398_v61 }
 0x39f   : > { %v3260_v1 = vadd.f32 -1.4531521, %v3228_v32  ;;  %4676 = vpow2.f32 %v3603_v48  ;;  %v3642_v53 = vmul.f32 %v4671_v22, %v3482_v54  ;;  %v3291_v35 = vmul.f32 %v7420_v2, %v3259_v42 }
 0x3a0   : > { %v3103_v15 = vand.u32 2147483647, %v7426_v34  ;;  %v3104_v39 = vand.u32 2147483647, %v7440_v60  ;;  %v3673_v18 = vsub.f32 1.0, %v3641_v43  ;;  %v7447_v26 = vmul.f32 0.5, %v7338_v29 }
 0x3a1   : > { %v3292_v0 = vmul.f32 %v7428_v49, %v3260_v1  ;;  %4678 = vpow2.f32 %v3605_v17  ;;  %v3674_v11 = vsub.f32 1.0, %v3642_v53  ;;  %v3323_v30 = vadd.f32 1.4214138, %v3291_v35 }
 0x3a2   : > { %v3135_v8 = vmul.f32 0.3275911, %v3103_v15  ;;  %v7451_v38 = vadd.f32 %v7092_v21, %v2970_v14  ;;  %v3737_v28 = vsub.f32 0.0, %v3673_v18  ;;  %v3518_v59 = vsub.f32 0.0, %v7407_v55 }
 0x3a3   : > { %v3324_v10 = vadd.f32 1.4214138, %v3292_v0  ;;  %v3136_v56 = vmul.f32 0.3275911, %v3104_v39  ;;  %v3738_v52 = vsub.f32 0.0, %v3674_v11  ;;  %v3355_v4 = vmul.f32 %v7420_v2, %v3323_v30 }
 0x3a4   : > { %v3549_v29 = vmul.f32 %v3517_v25, %v7398_v61  ;;  %v3167_v19 = vadd.f32 1.0, %v3135_v8  ;;  %v3769_v45 = vsel %vm3705_vm2, %v3673_v18, %v3737_v28  ;;  %v3519_v40 = vsub.f32 0.0, %v3103_v15 }
 0x3a5   : > { %v3356_v41 = vmul.f32 %v7428_v49, %v3324_v10  ;;  %v3168_v24 = vadd.f32 1.0, %v3136_v56  ;;  %v3770_v23 = vsel %vm3706_vm3, %v3674_v11, %v3738_v52  ;;  %v3801_v50 = vadd.f32 1.0, %v3769_v45 }
 0x3a6   : > { %v7459_v5 = vpop.eup %4672  ;;  %v3387_v12 = vadd.f32 -0.28449672, %v3355_v4  ;;  %4680 = vrcp.f32 %v3167_v19  ;;  %v3802_v14 = vadd.f32 1.0, %v3770_v23  ;;  %v3550_v44 = vmul.f32 %v3518_v59, %v7407_v55 }
 0x3a7   : > { %v3388_v27 = vadd.f32 -0.28449672, %v3356_v41  ;;  %v3229_v61 = vmul.f32 1.0614054, %v7459_v5  ;;  %4682 = vrcp.f32 %v3168_v24  ;;  %v3833_v37 = vmul.f32 %v3801_v50, %v7385_v20 }
 0x3a8   : > { %v7464_v48 = vpop.eup %4674  ;;  %v3419_v13 = vmul.f32 %v7420_v2, %v3387_v12  ;;  %v3520_v57 = vsub.f32 0.0, %v3104_v39  ;;  %v3834_v46 = vmul.f32 %v3802_v14, %v7411_v36  ;;  %v3607_v42 = vmul.f32 1.442695, %v3549_v29 }
 0x3a9   : > { %v4677_v51 = vpop.eup %4676  ;;  %v3420_v32 = vmul.f32 %v7428_v49, %v3388_v27  ;;  %v3230_v17 = vmul.f32 1.0614054, %v7464_v48  ;;  %v3261_v9 = vadd.f32 -1.4531521, %v3229_v61  ;;  %v3551_v22 = vmul.f32 %v3519_v40, %v3103_v15 }
 0x3aa   : > { %v3451_v54 = vadd.f32 0.2548296, %v3419_v13  ;;  %v7474_v43 = vadd.f32 %v7092_v21, %v7404_v58  ;;  %v3854_v1 = vpack.c.bf16 %v3834_v46, %v3833_v37  ;;  %vm3707_vm4 = vcmp.ge.f32.partialorder %v7342_v31, 0.0 }
 0x3ab   : > { %v4679_v20 = vpop.eup %4678  ;;  %v3452_v25 = vadd.f32 0.2548296, %v3420_v32  ;;  %v3262_v55 = vadd.f32 -1.4531521, %v3230_v17  ;;  %v3293_v36 = vmul.f32 %v7459_v5, %v3261_v9  ;;  %vm3708_vm5 = vcmp.ge.f32.partialorder %v7349_v3, 0.0 }
 0x3ac   : > { %v3483_v53 = vmul.f32 %v7420_v2, %v3451_v54  ;;  %v3609_v35 = vmul.f32 1.442695, %v3550_v44  ;;  %v3552_v18 = vmul.f32 %v3520_v57, %v3104_v39  ;;  %4418 = vmatmul.mubr.msk.bf16.gmra.mrb[20].mxu1 %vm731_vm14, %v3854_v1  ;;  %v7484_v0 = vmul.f32 0.70710677, %v7451_v38 }
 0x3ad   : > { %v3484_v15 = vmul.f32 %v7428_v49, %v3452_v25  ;;  %v3294_v21 = vmul.f32 %v7464_v48, %v3262_v55  ;;  %v3325_v58 = vadd.f32 1.4214138, %v3293_v36  ;;  %4684 = vpow2.f32 %v3607_v42 }
 0x3ae   : > { %v3643_v11 = vmul.f32 %v4677_v51, %v3483_v53  ;;  %v3611_v30 = vmul.f32 1.442695, %v3551_v22  ;;  %v7487_v8 = vmul.f32 0.70710677, %v7474_v43  ;;  %v7491_v10 = vand.u32 2147483647, %v7484_v0 }
 0x3af   : > { %v3644_v2 = vmul.f32 %v4679_v20, %v3484_v15  ;;  %v3326_v28 = vadd.f32 1.4214138, %v3294_v21  ;;  %v3357_v39 = vmul.f32 %v7459_v5, %v3325_v58  ;;  %4686 = vpow2.f32 %v3609_v35 }
 0x3b0   : > { %v7493_v49 = vpop.eup %4680  ;;  %v3675_v59 = vsub.f32 1.0, %v3643_v11  ;;  %v3613_v56 = vmul.f32 1.442695, %v3552_v18  ;;  %v7496_v52 = vand.u32 2147483647, %v7487_v8  ;;  %4688 = vpow2.f32 %v3611_v30 }
 0x3b1   : > { %v7498_v4 = vpop.eup %4682  ;;  %v3676_v29 = vsub.f32 1.0, %v3644_v2  ;;  %v3358_v19 = vmul.f32 %v7464_v48, %v3326_v28  ;;  %v3389_v45 = vadd.f32 -0.28449672, %v3357_v39  ;;  %v3231_v41 = vmul.f32 1.0614054, %v7493_v49 }
 0x3b2   : > { %v3739_v24 = vsub.f32 0.0, %v3675_v59  ;;  %v3232_v40 = vmul.f32 1.0614054, %v7498_v4  ;;  %v3137_v23 = vmul.f32 0.3275911, %v7491_v10  ;;  %v3521_v28 = vsub.f32 0.0, %v7491_v10 }
 0x3b3   : > { %v3740_v50 = vsub.f32 0.0, %v3676_v29  ;;  %v3390_v12 = vadd.f32 -0.28449672, %v3358_v19  ;;  %v3421_v14 = vmul.f32 %v7459_v5, %v3389_v45  ;;  %v3263_v27 = vadd.f32 -1.4531521, %v3231_v41 }
 0x3b4   : > { %v3771_v61 = vsel %vm3707_vm4, %v3675_v59, %v3739_v24  ;;  %v3264_v37 = vadd.f32 -1.4531521, %v3232_v40  ;;  %v3138_v13 = vmul.f32 0.3275911, %v7496_v52  ;;  %v3169_v44 = vadd.f32 1.0, %v3137_v23 }
 0x3b5   : > { %v3772_v57 = vsel %vm3708_vm5, %v3676_v29, %v3740_v50  ;;  %v3803_v51 = vadd.f32 1.0, %v3771_v61  ;;  %v3422_v46 = vmul.f32 %v7464_v48, %v3390_v12  ;;  %v3453_v32 = vadd.f32 0.2548296, %v3421_v14 }
 0x3b6   : > { %v3804_v17 = vadd.f32 1.0, %v3772_v57  ;;  %v3295_v9 = vmul.f32 %v7493_v49, %v3263_v27  ;;  %v3296_v54 = vmul.f32 %v7498_v4, %v3264_v37  ;;  %v3170_v42 = vadd.f32 1.0, %v3138_v13 }
 0x3b7   : > { %v3835_v31 = vmul.f32 %v3803_v51, %v7435_v7  ;;  %v3454_v22 = vadd.f32 0.2548296, %v3422_v46  ;;  %v3485_v20 = vmul.f32 %v7459_v5, %v3453_v32  ;;  %4690 = vrcp.f32 %v3169_v44  ;;  %v4685_v1 = vpop.eup %4684 }
 0x3b8   : > { %v3836_v3 = vmul.f32 %v3804_v17, %v7447_v26  ;;  %v3327_v25 = vadd.f32 1.4214138, %v3295_v9  ;;  %v3328_v55 = vadd.f32 1.4214138, %v3296_v54  ;;  %4692 = vrcp.f32 %v3170_v42 }
 0x3b9   : > { %v3486_v36 = vmul.f32 %v7464_v48, %v3454_v22  ;;  %v3645_v53 = vmul.f32 %v4685_v1, %v3485_v20  ;;  %4694 = vpow2.f32 %v3613_v56  ;;  %v4687_v35 = vpop.eup %4686  ;;  %vm3709_vm6 = vcmp.ge.f32.partialorder %v7390_v33, 0.0 }
 0x3ba   : > { %v3855_v18 = vpack.c.bf16 %v3836_v3, %v3835_v31  ;;  %v3359_v15 = vmul.f32 %v7493_v49, %v3327_v25  ;;  %v3360_v7 = vmul.f32 %v7498_v4, %v3328_v55  ;;  %v4689_v5 = vpop.eup %4688  ;;  %v3522_v59 = vsub.f32 0.0, %v7496_v52 }
 0x3bb   : > { %v3646_v21 = vmul.f32 %v4687_v35, %v3486_v36  ;;  %v3677_v58 = vsub.f32 1.0, %v3645_v53  ;;  %vm3710_vm7 = vcmp.ge.f32.partialorder %v7395_v62, 0.0  ;;  %v3037_v40 = vmul.f32 0.5, %v7374_v47 }
 0x3bc   : > { %4421 = vmatprep.mubr.msk.bf16.mxu1 %vm731_vm14, %v3855_v18  ;;  %v3391_v11 = vadd.f32 -0.28449672, %v3359_v15  ;;  %v3392_v26 = vadd.f32 -0.28449672, %v3360_v7  ;;  %v3038_v23 = vmul.f32 0.5, %v7379_v16  ;;  %v3553_v33 = vmul.f32 %v3521_v28, %v7491_v10 }
 0x3bd   : > { %v3678_v30 = vsub.f32 1.0, %v3646_v21  ;;  %v3741_v2 = vsub.f32 0.0, %v3677_v58  ;;  %v3554_v37 = vmul.f32 %v3522_v59, %v7496_v52  ;;  %v3039_v52 = vmul.f32 0.5, %v7401_v6 }
 0x3be   : > { %v3423_v48 = vmul.f32 %v7493_v49, %v3391_v11  ;;  %v3424_v39 = vmul.f32 %v7498_v4, %v3392_v26  ;;  %v3615_v17 = vmul.f32 1.442695, %v3553_v33  ;;  %vm3711_vm10 = vcmp.ge.f32.partialorder %v7426_v34, 0.0 }
 0x3bf   : > { %v3742_v56 = vsub.f32 0.0, %v3678_v30  ;;  %v3773_v29 = vsel %vm3709_vm6, %v3677_v58, %v3741_v2  ;;  %v3617_v42 = vmul.f32 1.442695, %v3554_v37  ;;  %vm3712_vm8 = vcmp.ge.f32.partialorder %v7440_v60, 0.0 }
 0x3c0   : > { %v3805_v19 = vadd.f32 1.0, %v3773_v29  ;;  %v3455_v45 = vadd.f32 0.2548296, %v3423_v48  ;;  %v3456_v41 = vadd.f32 0.2548296, %v3424_v39  ;;  %4696 = vpow2.f32 %v3615_v17 }
 0x3c1   : > { %v4691_v24 = vpop.eup %4690  ;;  %v3774_v50 = vsel %vm3710_vm7, %v3678_v30, %v3742_v56  ;;  %v3040_v3 = vmul.f32 0.5, %v7418_v63  ;;  %4698 = vpow2.f32 %v3617_v42  ;;  %vm3713_vm9 = vcmp.ge.f32.partialorder %v7484_v0, 0.0  ;;  %v7549_v0 = vld [vmem:[%s7682_s8] ss:$0 sm:$0xff] }
 0x3c2   : > { %v4693_v12 = vpop.eup %4692  ;;  %v3806_v14 = vadd.f32 1.0, %v3774_v50  ;;  %v3487_v27 = vmul.f32 %v7493_v49, %v3455_v45  ;;  %v3488_v61 = vmul.f32 %v7498_v4, %v3456_v41  ;;  %v3233_v13 = vmul.f32 1.0614054, %v4691_v24 }
 0x3c3   : > { %v4695_v62 = vpop.eup %4694  ;;  %v3234_v44 = vmul.f32 1.0614054, %v4693_v12  ;;  %v3837_v57 = vmul.f32 %v3805_v19, %v3037_v40  ;;  %vm3714_vm11 = vcmp.ge.f32.partialorder %v7487_v8, 0.0  ;;  %v3041_v41 = vmul.f32 0.5, %v7451_v38 }
 0x3c4   : > { %v3838_v51 = vmul.f32 %v3806_v14, %v3038_v23  ;;  %v3647_v46 = vmul.f32 %v4689_v5, %v3487_v27  ;;  %v3648_v47 = vmul.f32 %v4695_v62, %v3488_v61  ;;  %v3265_v32 = vadd.f32 -1.4531521, %v3233_v13 }
 0x3c5   : > { %v3266_v16 = vadd.f32 -1.4531521, %v3234_v44 }
 0x3c6   : > { %v3856_v9 = vpack.c.bf16 %v3838_v51, %v3837_v57  ;;  %v3679_v10 = vsub.f32 1.0, %v3647_v46  ;;  %v3680_v54 = vsub.f32 1.0, %v3648_v47  ;;  %v3297_v31 = vmul.f32 %v4691_v24, %v3265_v32 }
 0x3c7   : > { %v3298_v49 = vmul.f32 %v4693_v12, %v3266_v16 }
 0x3c8   : > { %4422 = vmatmul.mubr.msk.bf16.gmra.mrb[24].mxu1 %vm731_vm14, %v3856_v9  ;;  %v3743_v4 = vsub.f32 0.0, %v3679_v10  ;;  %v3744_v22 = vsub.f32 0.0, %v3680_v54  ;;  %v3329_v20 = vadd.f32 1.4214138, %v3297_v31 }
 0x3c9   : > { %v3330_v1 = vadd.f32 1.4214138, %v3298_v49 }
 0x3ca   : > { %v3775_v25 = vsel %vm3711_vm10, %v3679_v10, %v3743_v4  ;;  %v3776_v55 = vsel %vm3712_vm8, %v3680_v54, %v3744_v22  ;;  %v3361_v35 = vmul.f32 %v4691_v24, %v3329_v20  ;;  %v4697_v26 = vpop.eup %4696 }
 0x3cb   : > { %v3807_v36 = vadd.f32 1.0, %v3775_v25  ;;  %v3808_v53 = vadd.f32 1.0, %v3776_v55  ;;  %v3362_v18 = vmul.f32 %v4693_v12, %v3330_v1  ;;  %v4699_v2 = vpop.eup %4698 }
 0x3cc   : > { %v3393_v7 = vadd.f32 -0.28449672, %v3361_v35 }
 0x3cd   : > { %v3839_v15 = vmul.f32 %v3807_v36, %v3039_v52  ;;  %v3840_v6 = vmul.f32 %v3808_v53, %v3040_v3  ;;  %v3394_v34 = vadd.f32 -0.28449672, %v3362_v18 }
 0x3ce   : > { %v3425_v58 = vmul.f32 %v4691_v24, %v3393_v7 }
 0x3cf   : > { %v3857_v21 = vpack.c.bf16 %v3840_v6, %v3839_v15  ;;  %v3426_v5 = vmul.f32 %v4693_v12, %v3394_v34 }
 0x3d0   : > { %v3457_v60 = vadd.f32 0.2548296, %v3425_v58 }
 0x3d1   : > { %4425 = vmatprep.mubr.msk.bf16.mxu1 %vm731_vm14, %v3857_v21  ;;  %v3458_v11 = vadd.f32 0.2548296, %v3426_v5 }
 0x3d2   : > { %v3489_v63 = vmul.f32 %v4691_v24, %v3457_v60  ;;  %v3042_v24 = vmul.f32 0.5, %v7474_v43 }
 0x3d3   : > { %v3490_v30 = vmul.f32 %v4693_v12, %v3458_v11 }
 0x3d4   : > { %v3649_v28 = vmul.f32 %v4697_v26, %v3489_v63 }
 0x3d5   : > { %v3650_v48 = vmul.f32 %v4699_v2, %v3490_v30 }
 0x3d6   : > { %v3681_v39 = vsub.f32 1.0, %v3649_v28 }
 0x3d7   : > { %v3682_v59 = vsub.f32 1.0, %v3650_v48 }
 0x3d8   : > { %v3745_v56 = vsub.f32 0.0, %v3681_v39 }
 0x3d9   : > { %v3746_v29 = vsub.f32 0.0, %v3682_v59 }
 0x3da   : > { %v3777_v19 = vsel %vm3713_vm9, %v3681_v39, %v3745_v56 }
 0x3db   : > { %v3778_v45 = vsel %vm3714_vm11, %v3682_v59, %v3746_v29  ;;  %v3809_v40 = vadd.f32 1.0, %v3777_v19 }
 0x3dc   : > { %v3810_v23 = vadd.f32 1.0, %v3778_v45 }
 0x3dd   : > { %v3841_v50 = vmul.f32 %v3809_v40, %v3041_v41 }
 0x3de   : > { %v3842_v33 = vmul.f32 %v3810_v23, %v3042_v24 }
 0x3e0   : > { %v3858_v12 = vpack.c.bf16 %v3842_v33, %v3841_v50 }
 0x3e2   : > { %4426 = vmatmul.mubr.msk.bf16.gmra.mrb[28].mxu1 %vm731_vm14, %v3858_v12 }
 0x3e5   : > { %v4399_v8 = vpop.f32.mrb[0].mxu1 }
 0x3e6   : > { %v3965_v38 = vadd.f32 %v4399_v8, %v7549_v0  ;;  %v3956_v14 = vpop.f32.mrb[1].mxu1 }
 0x3e7   : > { %v3957_v43 = vadd.f32 %v7549_v0, %v3956_v14  ;;  %v4400_v27 = vpop.f32.mrb[2].mxu1 }
 0x3e8   : > { %4085 = vst [vmem:[%s7553_s23 + $0x10] sm:$0xff] %v3965_v38  ;;  %v3968_v61 = vadd.f32 %v4400_v27, %v7549_v0  ;;  %v3959_v37 = vpop.f32.mrb[3].mxu1 }
 0x3e9   : > { %4083 = vst [vmem:[%s7553_s23] sm:$0xff] %v3957_v43  ;;  %v3960_v62 = vadd.f32 %v7549_v0, %v3959_v37 }
 0x3ea   : > { %4086 = vst [vmem:[%s7553_s23 + $0x18] sm:$0xff] %v3968_v61 }
 0x3eb   : > { %4084 = vst [vmem:[%s7553_s23 + $0x8] sm:$0xff] %v3960_v62 }
 0x415   : > { %v4403_v13 = vpop.f32.mrb[4].mxu1 }
 0x416   : > { %v3981_v44 = vadd.f32 %v4403_v13, %v7549_v0  ;;  %v3972_v57 = vpop.f32.mrb[5].mxu1 }
 0x417   : > { %v3973_v51 = vadd.f32 %v7549_v0, %v3972_v57  ;;  %v4404_v46 = vpop.f32.mrb[6].mxu1 }
 0x418   : > { %4089 = vst [vmem:[%s7553_s23 + $0x30] sm:$0xff] %v3981_v44  ;;  %v3984_v47 = vadd.f32 %v4404_v46, %v7549_v0  ;;  %v3975_v32 = vpop.f32.mrb[7].mxu1 }
 0x419   : > { %4087 = vst [vmem:[%s7553_s23 + $0x20] sm:$0xff] %v3973_v51  ;;  %v3976_v16 = vadd.f32 %v7549_v0, %v3975_v32 }
 0x41a   : > { %4090 = vst [vmem:[%s7553_s23 + $0x38] sm:$0xff] %v3984_v47 }
 0x41b   : > { %4088 = vst [vmem:[%s7553_s23 + $0x28] sm:$0xff] %v3976_v16 }
 0x425   : > { %v4407_v17 = vpop.f32.mrb[8].mxu1 }
 0x426   : > { %v3997_v9 = vadd.f32 %v4407_v17, %v7549_v0  ;;  %v3988_v10 = vpop.f32.mrb[9].mxu1 }
 0x427   : > { %v3989_v54 = vadd.f32 %v7549_v0, %v3988_v10  ;;  %v4408_v42 = vpop.f32.mrb[10].mxu1 }
 0x428   : > { %4093 = vst [vmem:[%s7553_s23 + $0x50] sm:$0xff] %v3997_v9  ;;  %v4000_v31 = vadd.f32 %v4408_v42, %v7549_v0  ;;  %v3991_v49 = vpop.f32.mrb[11].mxu1 }
 0x429   : > { %4091 = vst [vmem:[%s7553_s23 + $0x40] sm:$0xff] %v3989_v54  ;;  %v3992_v52 = vadd.f32 %v7549_v0, %v3991_v49 }
 0x42a   : > { %4094 = vst [vmem:[%s7553_s23 + $0x58] sm:$0xff] %v4000_v31 }
 0x42b   : > { %4092 = vst [vmem:[%s7553_s23 + $0x48] sm:$0xff] %v3992_v52 }
 0x44b   : > { %v4411_v4 = vpop.f32.mrb[12].mxu1 }
 0x44c   : > { %v4013_v22 = vadd.f32 %v4411_v4, %v7549_v0  ;;  %v4004_v20 = vpop.f32.mrb[13].mxu1 }
 0x44d   : > { %v4005_v1 = vadd.f32 %v7549_v0, %v4004_v20  ;;  %v4412_v3 = vpop.f32.mrb[14].mxu1 }
 0x44e   : > { %4097 = vst [vmem:[%s7553_s23 + $0x70] sm:$0xff] %v4013_v22  ;;  %v4016_v25 = vadd.f32 %v4412_v3, %v7549_v0  ;;  %v4007_v55 = vpop.f32.mrb[15].mxu1 }
 0x44f   : > { %4095 = vst [vmem:[%s7553_s23 + $0x60] sm:$0xff] %v4005_v1  ;;  %v4008_v36 = vadd.f32 %v7549_v0, %v4007_v55 }
 0x450   : > { %4098 = vst [vmem:[%s7553_s23 + $0x78] sm:$0xff] %v4016_v25 }
 0x451   : > { %4096 = vst [vmem:[%s7553_s23 + $0x68] sm:$0xff] %v4008_v36 }
 0x45e   : > { %v4415_v53 = vpop.f32.mrb[16].mxu1 }
 0x45f   : > { %v4029_v35 = vadd.f32 %v4415_v53, %v7549_v0  ;;  %v4020_v18 = vpop.f32.mrb[17].mxu1 }
 0x460   : > { %v4021_v15 = vadd.f32 %v7549_v0, %v4020_v18  ;;  %v4416_v6 = vpop.f32.mrb[18].mxu1 }
 0x461   : > { %4101 = vst [vmem:[%s7553_s23 + $0x90] sm:$0xff] %v4029_v35  ;;  %v4032_v7 = vadd.f32 %v4416_v6, %v7549_v0  ;;  %v4023_v34 = vpop.f32.mrb[19].mxu1 }
 0x462   : > { %4099 = vst [vmem:[%s7553_s23 + $0x80] sm:$0xff] %v4021_v15  ;;  %v4024_v21 = vadd.f32 %v7549_v0, %v4023_v34 }
 0x463   : > { %4102 = vst [vmem:[%s7553_s23 + $0x98] sm:$0xff] %v4032_v7 }
 0x464   : > { %4100 = vst [vmem:[%s7553_s23 + $0x88] sm:$0xff] %v4024_v21 }
 0x47f   : > { %v4419_v58 = vpop.f32.mrb[20].mxu1 }
 0x480   : > { %v4045_v5 = vadd.f32 %v4419_v58, %v7549_v0  ;;  %v4036_v60 = vpop.f32.mrb[21].mxu1 }
 0x481   : > { %v4037_v11 = vadd.f32 %v7549_v0, %v4036_v60  ;;  %v4420_v26 = vpop.f32.mrb[22].mxu1 }
 0x482   : > { %4105 = vst [vmem:[%s7553_s23 + $0xb0] sm:$0xff] %v4045_v5  ;;  %v4048_v63 = vadd.f32 %v4420_v26, %v7549_v0  ;;  %v4039_v30 = vpop.f32.mrb[23].mxu1 }
 0x483   : > { %4103 = vst [vmem:[%s7553_s23 + $0xa0] sm:$0xff] %v4037_v11  ;;  %v4040_v2 = vadd.f32 %v7549_v0, %v4039_v30 }
 0x484   : > { %4106 = vst [vmem:[%s7553_s23 + $0xb8] sm:$0xff] %v4048_v63 }
 0x485   : > { %4104 = vst [vmem:[%s7553_s23 + $0xa8] sm:$0xff] %v4040_v2 }
 0x49b   : > { %v4423_v28 = vpop.f32.mrb[24].mxu1 }
 0x49c   : > { %v4061_v48 = vadd.f32 %v4423_v28, %v7549_v0  ;;  %v4052_v39 = vpop.f32.mrb[25].mxu1 }
 0x49d   : > { %v4053_v59 = vadd.f32 %v7549_v0, %v4052_v39  ;;  %v4424_v56 = vpop.f32.mrb[26].mxu1 }
 0x49e   : > { %4109 = vst [vmem:[%s7553_s23 + $0xd0] sm:$0xff] %v4061_v48  ;;  %v4064_v29 = vadd.f32 %v4424_v56, %v7549_v0  ;;  %v4055_v19 = vpop.f32.mrb[27].mxu1 }
 0x49f   : > { %4107 = vst [vmem:[%s7553_s23 + $0xc0] sm:$0xff] %v4053_v59  ;;  %v4056_v45 = vadd.f32 %v7549_v0, %v4055_v19 }
 0x4a0   : > { %4110 = vst [vmem:[%s7553_s23 + $0xd8] sm:$0xff] %v4064_v29 }
 0x4a1   : > { %4108 = vst [vmem:[%s7553_s23 + $0xc8] sm:$0xff] %v4056_v45 }
 0x4b5   : > { %v4427_v41 = vpop.f32.mrb[28].mxu1 }
 0x4b6   : > { %v4077_v24 = vadd.f32 %v4427_v41, %v7549_v0  ;;  %v4068_v40 = vpop.f32.mrb[29].mxu1 }
 0x4b7   : > { %v4069_v23 = vadd.f32 %v7549_v0, %v4068_v40  ;;  %v4428_v50 = vpop.f32.mrb[30].mxu1 }
 0x4b8   : > { %4113 = vst [vmem:[%s7553_s23 + $0xf0] sm:$0xff] %v4077_v24  ;;  %v4080_v33 = vadd.f32 %v4428_v50, %v7549_v0  ;;  %v4071_v12 = vpop.f32.mrb[31].mxu1 }
 0x4b9   : > { %4111 = vst [vmem:[%s7553_s23 + $0xe0] sm:$0xff] %v4069_v23  ;;  %v4072_v8 = vadd.f32 %v7549_v0, %v4071_v12 }
 0x4ba   : > { %4114 = vst [vmem:[%s7553_s23 + $0xf8] sm:$0xff] %v4080_v33 }
 0x4bb   : > { %4112 = vst [vmem:[%s7553_s23 + $0xe8] sm:$0xff] %v4072_v8 }
 0x4bc   : > { %4727 = shalt.err (!%p4724_p5)
}
 0x4bd   : > { %s4728_s15 = scalar_lea.hbm %s7618_s28, 4096  ;;  %s4732_s26 = scalar_lea.hbm %s7683_s9, 8192 }
 0x4be   : > { %p4729_p6 = scmp.ne.s32.totalorder %s7618_s28, %s4728_s15  ;;  %p4733_p10 = scmp.lt.u32.totalorder %s7618_s28, %s7683_s9 }
 0x4bf   : > { %p4734_p11 = scmp.lt.u32.totalorder %s4732_s26, %s4728_s15  ;;  %p4736_p13 = scmp.lt.u32.totalorder %s4728_s15, %s7618_s28 }
 0x4c0   : > { %p4730_p7 = pnand %p4729_p6, %p4888_p4 }
 0x4c1   : > { %p4735_p12 = por %p4734_p11, %p4733_p10 }
 0x4c2   : > { %p4731_p9 = pneg %p4730_p7 }
 0x4c3   : > { %p4737_p0 = por %p4736_p13, %p4735_p12 }
 0x4c5   : > { %p4738_p1 = pnand %p4737_p0, %p4731_p9 }
 0x4c7   : > { %4741 = shalt.err (!%p4738_p1)
}
 0x4c8   : > { %s4796_s29 = smov 128   ;;  %s4797_s18 = smov 8  }
 0x4c9   : > { %4431 = dma.vmem_to_hbm [thread:$0]  (%p4888_p4), %s7620_s25, 4096, %s7618_s28, %s7628_s12, %s4796_s29, %s4796_s29, %s4797_s18  }
 0x4ca PF: > { %p4437_p2 = scmp.ge.s32.totalorder %s4792_s14, 2  ;;  %s4146_s20 = sand.u32 1, %s4772_s30  }
 0x4cb   : > { %s4147_s15 = scalar_lea.sflag [#allocation6], %s4146_s20 }
 0x4cc   : > { %p4434_p3 = pnand %p4437_p2, %p4895_p8 }
 0x4ce   : > { %4767 = dma.done.wait (!%p4434_p3), %s4147_s15, 4096  }
 0x4cf   : > { %4769 = vsyncadd (!%p4434_p3), %s4147_s15, 4294963200  ;;  %s22_s14 = sadd.s32 1, %s4792_s14   ;;  %s7932_s30 = smov %s4776_s10 }
 0x4d0   : > { %p19_p5 = scmp.ge.s32.totalorder %s22_s14, 4   ;;  %s7933_s10 = smov %s4780_s11 }
 0x4d1   : > { %s7934_s11 = smov %s4901_s22  ;;  %s7935_s12 = smov %s4788_s13 }
 0x4d2   : > { %s7936_s13 = smov %s7938_s17  ;;  %21 = sbr.rel (!%p19_p5) target bundleno = 4 (0x4), region = 95 }
 0x4d9   :  { %4152 = vsyncpa [#allocation6], 1 }
 0x4da   :  { %4154 = vsyncpa [#allocation6 + $0x1], 1 }

</bundles_post_ra>
